<compile_context>
chip_gen: v7x
topology: tpu7x:2x2x1
jax: 0.10.0
libtpu: 0.0.40
codegen_flags: <defaults>
</compile_context>

<pallas_src>
import functools

import jax
import jax.numpy as jnp
import numpy as np
from jax.experimental import pallas as pl
from jax.experimental.pallas import tpu as pltpu

# ---- config (DCGAN defaults) -------------------------------------------------
INIT_STD = 0.02
BN_EPS = 1e-5


def _round_up(x, m):
    return ((x + m - 1) // m) * m


def _choose_tm(m):
    """Pick an M tile: large power-of-two tiles when there is enough work,
    otherwise the (16-aligned) full extent.  Always a multiple of 16 so bf16
    outputs are tile-aligned."""
    m16 = _round_up(m, 16)
    for tm in (512, 256, 128):
        if m16 >= 2 * tm:
            return tm
    return m16


# ---- Pallas kernels ----------------------------------------------------------
def _matmul_act_kernel(x_ref, w_ref, o_ref, *, act):
    """One M-tile of conv-as-matmul (bf16 in, f32 accumulate) + activation."""
    y = jnp.dot(x_ref[...], w_ref[...], preferred_element_type=jnp.float32)
    if act == "tanh":
        y = jnp.tanh(y)
    o_ref[...] = y


def _matmul_stats_kernel(x_ref, w_ref, o_ref, st_ref):
    """Conv-as-matmul tile + fused per-column sum / sum-of-squares partials
    (rows 0 and 1 of an (8, Npad) side output; rows 2..7 are zero)."""
    y = jnp.dot(x_ref[...], w_ref[...], preferred_element_type=jnp.float32)
    o_ref[...] = y
    s0 = jnp.sum(y, axis=0, keepdims=True)          # (1, Npad)
    s1 = jnp.sum(y * y, axis=0, keepdims=True)      # (1, Npad)
    row = jax.lax.broadcasted_iota(jnp.int32, (8, y.shape[1]), 0)
    st_ref[...] = jnp.where(row == 0, s0, jnp.where(row == 1, s1, 0.0))


def _bn_relu_kernel(y_ref, s_ref, b_ref, o_ref):
    """Tiled BatchNorm-apply (precomputed per-column scale/shift) + ReLU."""
    y = y_ref[...] * s_ref[...] + b_ref[...]
    o_ref[...] = jnp.maximum(y, 0.0).astype(o_ref.dtype)


# ---- Pallas wrappers ---------------------------------------------------------
def _conv_matmul(a, b, act="none", collect_stats=False):
    """(M, K) @ (K, N) on the MXU in bf16 with f32 accumulation.

    Pads K, N to multiples of 128 and M to a multiple of the M tile.  When
    `collect_stats` is set, also returns per-M-tile partial (sum, sum_sq)
    per output column, fused into the matmul epilogue."""
    m, k = a.shape
    _, nout = b.shape
    kp = _round_up(k, 128)
    npad = _round_up(nout, 128)
    tm = _choose_tm(m)
    mp = _round_up(m, tm)

    ap = jnp.zeros((mp, kp), jnp.bfloat16).at[:m, :k].set(a.astype(jnp.bfloat16))
    bp = jnp.zeros((kp, npad), jnp.bfloat16).at[:k, :nout].set(b.astype(jnp.bfloat16))

    grid = (mp // tm,)
    in_specs = [
        pl.BlockSpec((tm, kp), lambda i: (i, 0)),
        pl.BlockSpec((kp, npad), lambda i: (0, 0)),
    ]
    cparams = pltpu.CompilerParams(
        dimension_semantics=("parallel",),
        vmem_limit_bytes=64 * 1024 * 1024,
    )

    if collect_stats:
        y2d, stats = pl.pallas_call(
            _matmul_stats_kernel,
            out_shape=(
                jax.ShapeDtypeStruct((mp, npad), jnp.float32),
                jax.ShapeDtypeStruct((8 * (mp // tm), npad), jnp.float32),
            ),
            grid_spec=pltpu.PrefetchScalarGridSpec(
                num_scalar_prefetch=0,
                grid=grid,
                in_specs=in_specs,
                out_specs=(
                    pl.BlockSpec((tm, npad), lambda i: (i, 0)),
                    pl.BlockSpec((8, npad), lambda i: (i, 0)),
                ),
            ),
            compiler_params=cparams,
        )(ap, bp)
    else:
        y2d = pl.pallas_call(
            functools.partial(_matmul_act_kernel, act=act),
            out_shape=jax.ShapeDtypeStruct((mp, npad), jnp.float32),
            grid_spec=pltpu.PrefetchScalarGridSpec(
                num_scalar_prefetch=0,
                grid=grid,
                in_specs=in_specs,
                out_specs=pl.BlockSpec((tm, npad), lambda i: (i, 0)),
            ),
            compiler_params=cparams,
        )(ap, bp)
        stats = None

    info = {"m": m, "nout": nout, "mp": mp, "npad": npad, "tm": tm}
    return y2d, stats, info


def _bn_relu_apply(y2d, scale, shift, tm):
    """M-tiled elementwise BatchNorm-apply + ReLU; output bf16 for next layer."""
    mp, npad = y2d.shape
    return pl.pallas_call(
        _bn_relu_kernel,
        out_shape=jax.ShapeDtypeStruct((mp, npad), jnp.bfloat16),
        grid_spec=pltpu.PrefetchScalarGridSpec(
            num_scalar_prefetch=0,
            grid=(mp // tm,),
            in_specs=[
                pl.BlockSpec((tm, npad), lambda i: (i, 0)),
                pl.BlockSpec((1, npad), lambda i: (0, 0)),
                pl.BlockSpec((1, npad), lambda i: (0, 0)),
            ],
            out_specs=pl.BlockSpec((tm, npad), lambda i: (i, 0)),
        ),
        compiler_params=pltpu.CompilerParams(dimension_semantics=("parallel",)),
    )(y2d, scale, shift)


# ---- tiny per-channel glue (O(C) work, plain JAX) -----------------------------
def _bn_scale_shift(stats, gamma, beta, m_valid, groups, co, npad):
    """Fold per-tile/per-parity partial sums into per-channel scale/shift
    (training-mode biased-variance BatchNorm, like a fresh PyTorch module)."""
    st = stats.reshape(-1, 8, npad)
    tot = jnp.sum(st[:, 0, :], axis=0)[: groups * co]
    totsq = jnp.sum(st[:, 1, :], axis=0)[: groups * co]
    cnt = float(m_valid * groups)
    mean = jnp.sum(tot.reshape(groups, co), axis=0) / cnt
    ex2 = jnp.sum(totsq.reshape(groups, co), axis=0) / cnt
    var = jnp.maximum(ex2 - mean * mean, 0.0)
    inv = gamma * jax.lax.rsqrt(var + BN_EPS)
    shift_c = beta - mean * inv
    scale = jnp.zeros((1, npad), jnp.float32).at[0, : groups * co].set(jnp.tile(inv, groups))
    shift = jnp.zeros((1, npad), jnp.float32).at[0, : groups * co].set(jnp.tile(shift_c, groups))
    return scale, shift


# ---- layout glue (plain JAX) ---------------------------------------------------
def _im2col3(h_nhwc):
    """3x3 / stride-1 patches of the 1-padded NHWC input; row=(n,u,v),
    column order (wh, ww, ci)."""
    n, hh, ww, c = h_nhwc.shape
    xp = jnp.pad(h_nhwc, ((0, 0), (1, 1), (1, 1), (0, 0)))
    cols = []
    for a in range(3):
        for b in range(3):
            cols.append(xp[:, a : a + hh, b : b + ww, :])
    p = jnp.stack(cols, axis=3)                      # (N, H, W, 9, C)
    return p.reshape(n * hh * ww, 9 * c)


def _make_wcat(w):
    """Repack a (Ci, Co, 4, 4) stride-2/pad-1 ConvTranspose2d kernel into a
    (9*Ci, 4*Co) matrix acting on 3x3 patches; column order (da, db, co)."""
    ci, co = w.shape[0], w.shape[1]
    wc = jnp.zeros((3, 3, ci, 2, 2, co), w.dtype)
    for wh in range(3):
        for ww in range(3):
            for da in range(2):
                for db in range(2):
                    r = 3 + da - 2 * wh
                    c = 3 + db - 2 * ww
                    if 0 <= r < 4 and 0 <= c < 4:
                        wc = wc.at[wh, ww, :, da, db, :].set(w[:, :, r, c])
    return wc.reshape(9 * ci, 4 * co)


def _pixel_shuffle(y2d, n, hh, ww, co):
    """(N*H*W, 4*Co) with columns (da, db, co) -> NHWC (N, 2H, 2W, Co)."""
    y = y2d[: n * hh * ww, : 4 * co].reshape(n, hh, ww, 2, 2, co)
    y = y.transpose(0, 1, 3, 2, 4, 5)
    return y.reshape(n, 2 * hh, 2 * ww, co)


# ---- layer blocks --------------------------------------------------------------
def _upconv_bn_relu(h, w, gamma, beta):
    n, hh, ww, _ = h.shape
    co = w.shape[1]
    patches = _im2col3(h)
    wcat = _make_wcat(w)
    y2d, stats, info = _conv_matmul(patches, wcat, collect_stats=True)
    scale, shift = _bn_scale_shift(stats, gamma, beta,
                                   m_valid=n * hh * ww, groups=4, co=co,
                                   npad=info["npad"])
    z2d = _bn_relu_apply(y2d, scale, shift, info["tm"])       # bf16
    return _pixel_shuffle(z2d, n, hh, ww, co)


def _upconv_tanh(h, w):
    n, hh, ww, _ = h.shape
    co = w.shape[1]
    patches = _im2col3(h)
    wcat = _make_wcat(w)
    y2d, _, _ = _conv_matmul(patches, wcat, act="tanh", collect_stats=False)
    return _pixel_shuffle(y2d, n, hh, ww, co)                 # f32


# ---- Generator forward ---------------------------------------------------------
def generator_forward(x, params):
    n, nz = x.shape[0], x.shape[1]

    # CT1 (1x1 -> 4x4) is a pure matmul; BN1 stats fused in its epilogue.
    w1 = params["CT1"]                                        # (nz, c1, 4, 4)
    c1 = w1.shape[1]
    x2d = x.reshape(n, nz)
    w2d = w1.transpose(0, 2, 3, 1).reshape(nz, 16 * c1)        # cols=(a*4+b)*c1+o
    y2d, stats, info = _conv_matmul(x2d, w2d, collect_stats=True)
    scale, shift = _bn_scale_shift(stats, params["BN1_g"], params["BN1_b"],
                                   m_valid=n, groups=16, co=c1, npad=info["npad"])
    h2d = _bn_relu_apply(y2d, scale, shift, info["tm"])        # bf16
    h = h2d[:n, : 16 * c1].reshape(n, 4, 4, c1)                # NHWC

    # CT2..CT4: sub-pixel matmul + fused-stat BN + ReLU, NHWC bf16 throughout.
    h = _upconv_bn_relu(h, params["CT2"], params["BN2_g"], params["BN2_b"])
    h = _upconv_bn_relu(h, params["CT3"], params["BN3_g"], params["BN3_b"])
    h = _upconv_bn_relu(h, params["CT4"], params["BN4_g"], params["BN4_b"])

    # CT5 + tanh (fused in matmul epilogue), then one NHWC -> NCHW transpose.
    h = _upconv_tanh(h, params["CT5"])                         # (N, 64, 64, nc) f32
    return h.transpose(0, 3, 1, 2)                             # (N, nc, 64, 64)


# ---- pure-JAX reference for correctness check ----------------------------------
def _ref_forward(x, params):
    def ctconv(x, w, stride, pad):
        k = w.shape[-1]
        wf = jnp.flip(w, (2, 3)).transpose(1, 0, 2, 3)         # (Co, Ci, k, k)
        return jax.lax.conv_general_dilated(
            x, wf, window_strides=(1, 1),
            padding=[(k - 1 - pad, k - 1 - pad)] * 2,
            lhs_dilation=(stride, stride),
            dimension_numbers=("NCHW", "OIHW", "NCHW"))

    def bn(x, g, b):
        mean = x.mean(axis=(0, 2, 3), keepdims=True)
        var = x.var(axis=(0, 2, 3), keepdims=True)
        return ((x - mean) / jnp.sqrt(var + BN_EPS) * g.reshape(1, -1, 1, 1)
                + b.reshape(1, -1, 1, 1))

    relu = lambda v: jnp.maximum(v, 0.0)
    h = relu(bn(ctconv(x, params["CT1"], 1, 0), params["BN1_g"], params["BN1_b"]))
    h = relu(bn(ctconv(h, params["CT2"], 2, 1), params["BN2_g"], params["BN2_b"]))
    h = relu(bn(ctconv(h, params["CT3"], 2, 1), params["BN3_g"], params["BN3_b"]))
    h = relu(bn(ctconv(h, params["CT4"], 2, 1), params["BN4_g"], params["BN4_b"]))
    return jnp.tanh(ctconv(h, params["CT5"], 2, 1))


# ---- parameter init (matches weights_init) --------------------------------------
def init_params(key, nz, ngf, nc):
    ks = jax.random.split(key, 9)
    normal = lambda k, s: jax.random.normal(k, s, jnp.float32)
    return {
        "CT1": INIT_STD * normal(ks[0], (nz, ngf * 8, 4, 4)),
        "BN1_g": 1.0 + INIT_STD * normal(ks[1], (ngf * 8,)),
        "BN1_b": jnp.zeros((ngf * 8,), jnp.float32),
        "CT2": INIT_STD * normal(ks[2], (ngf * 8, ngf * 4, 4, 4)),
        "BN2_g": 1.0 + INIT_STD * normal(ks[3], (ngf * 4,)),
        "BN2_b": jnp.zeros((ngf * 4,), jnp.float32),
        "CT3": INIT_STD * normal(ks[4], (ngf * 4, ngf * 2, 4, 4)),
        "BN3_g": 1.0 + INIT_STD * normal(ks[5], (ngf * 2,)),
        "BN3_b": jnp.zeros((ngf * 2,), jnp.float32),
        "CT4": INIT_STD * normal(ks[6], (ngf * 2, ngf, 4, 4)),
        "BN4_g": 1.0 + INIT_STD * normal(ks[7], (ngf,)),
        "BN4_b": jnp.zeros((ngf,), jnp.float32),
        "CT5": INIT_STD * normal(ks[8], (ngf, nc, 4, 4)),
    }


if __name__ == "__main__":
    # DCGAN generator: (N, nz, 1, 1) -> 4 -> 8 -> 16 -> 32 -> (N, nc, 64, 64).
    batch, nz, ngf, nc = 2, 16, 8, 3

    key = jax.random.PRNGKey(0)
    k_params, k_x = jax.random.split(key)
    params = init_params(k_params, nz, ngf, nc)
    x = jax.random.normal(k_x, (batch, nz, 1, 1), jnp.float32)

    out = jax.jit(generator_forward)(x, params)
    out = jax.block_until_ready(out)
    assert out.shape == (batch, nc, 64, 64), out.shape

    ref = jax.block_until_ready(_ref_forward(x, params))
    # Loose tolerance: matmul inputs and inter-layer activations are bf16.
    np.testing.assert_allclose(np.asarray(out), np.asarray(ref),
                               atol=5e-2, rtol=5e-2)

    print("KERNEL_OK")
</pallas_src>

<mosaic_0001>
module attributes {stable_mosaic.version = 11 : i64} {
  func.func @_matmul_stats_kernel(%arg0: i32, %arg1: memref<16x128xbf16, #tpu.memory_space<vmem>>, %arg2: memref<128x1024xbf16, #tpu.memory_space<vmem>>, %arg3: memref<16x1024xf32, #tpu.memory_space<vmem>>, %arg4: memref<8x1024xf32, #tpu.memory_space<vmem>>) attributes {dimension_semantics = [#tpu.dimension_semantics<parallel>], iteration_bounds = array<i64: 1>, scalar_prefetch = 0 : i64, scratch_operands = 0 : i64, tpu.core_type = #tpu.core_type<tc>, window_params = [{transform_indices = @transform_0, window_bounds = array<i64: 16, 128>}, {pipeline_mode = #tpu.pipeline_mode<synchronous>, transform_indices = @transform_1, window_bounds = array<i64: 128, 1024>}, {transform_indices = @transform_2, window_bounds = array<i64: 16, 1024>}, {transform_indices = @transform_3, window_bounds = array<i64: 8, 1024>}]} {
    %c0 = arith.constant 0 : index
    %c0_0 = arith.constant 0 : index
    %0 = vector.load %arg1[%c0, %c0_0] : memref<16x128xbf16, #tpu.memory_space<vmem>>, vector<16x128xbf16>
    %c0_1 = arith.constant 0 : index
    %c0_2 = arith.constant 0 : index
    %1 = vector.load %arg2[%c0_1, %c0_2] : memref<128x1024xbf16, #tpu.memory_space<vmem>>, vector<128x1024xbf16>
    %cst = arith.constant dense<0.000000e+00> : vector<16x1024xf32>
    %2 = tpu.matmul %0, %1, %cst {dimension_numbers = #tpu.dot_dimension_numbers<[1], [0], [0], [1], [0, 0, 1, 1], [], []>} : vector<16x128xbf16>, vector<128x1024xbf16>, vector<16x1024xf32> -> vector<16x1024xf32>
    %c0_3 = arith.constant 0 : index
    %c0_4 = arith.constant 0 : index
    %3 = vector.load %arg3[%c0_3, %c0_4] : memref<16x1024xf32, #tpu.memory_space<vmem>>, vector<16x1024xf32>
    tpu.vector_store %arg3[%c0_3, %c0_4], %2 {strides = array<i32>} : memref<16x1024xf32, #tpu.memory_space<vmem>>, vector<16x1024xf32>,
    %cst_5 = arith.constant dense<0.000000e+00> : vector<1024xf32>
    %4 = vector.multi_reduction <add>, %2, %cst_5 [0] : vector<16x1024xf32> to vector<1024xf32>
    %5 = vector.shape_cast %4 : vector<1024xf32> to vector<1x1024xf32>
    %6 = arith.mulf %2, %2 : vector<16x1024xf32>
    %cst_6 = arith.constant dense<0.000000e+00> : vector<1024xf32>
    %7 = vector.multi_reduction <add>, %6, %cst_6 [0] : vector<16x1024xf32> to vector<1024xf32>
    %8 = vector.shape_cast %7 : vector<1024xf32> to vector<1x1024xf32>
    %9 = tpu.iota {dimensions = array<i32: 0>} : vector<8x1024xi32>
    %c0_i32 = arith.constant 0 : i32
    %10 = vector.broadcast %c0_i32 : i32 to vector<8x1024xi32>
    %11 = arith.cmpi eq, %9, %10 : vector<8x1024xi32>
    %c1_i32 = arith.constant 1 : i32
    %12 = vector.broadcast %c1_i32 : i32 to vector<8x1024xi32>
    %13 = arith.cmpi eq, %9, %12 : vector<8x1024xi32>
    %cst_7 = arith.constant 0.000000e+00 : f32
    %14 = vector.shape_cast %8 : vector<1x1024xf32> to vector<1x1024xf32>
    %15 = vector.broadcast %14 : vector<1x1024xf32> to vector<8x1024xf32>
    %16 = vector.broadcast %cst_7 : f32 to vector<8x1024xf32>
    %17 = arith.select %13, %15, %16 : vector<8x1024xi1>, vector<8x1024xf32>
    %18 = vector.shape_cast %5 : vector<1x1024xf32> to vector<1x1024xf32>
    %19 = vector.broadcast %18 : vector<1x1024xf32> to vector<8x1024xf32>
    %20 = arith.select %11, %19, %17 : vector<8x1024xi1>, vector<8x1024xf32>
    %c0_8 = arith.constant 0 : index
    %c0_9 = arith.constant 0 : index
    %21 = vector.load %arg4[%c0_8, %c0_9] : memref<8x1024xf32, #tpu.memory_space<vmem>>, vector<8x1024xf32>
    tpu.vector_store %arg4[%c0_8, %c0_9], %20 {strides = array<i32>} : memref<8x1024xf32, #tpu.memory_space<vmem>>, vector<8x1024xf32>,
    return
  }
  func.func @transform_0(%arg0: i32) -> (i32, i32) {
    %c0_i32 = arith.constant 0 : i32
    %c0_i32_0 = arith.constant 0 : i32
    return %arg0, %c0_i32 : i32, i32
  }
  func.func @transform_1(%arg0: i32) -> (i32, i32) {
    %c0_i32 = arith.constant 0 : i32
    %c0_i32_0 = arith.constant 0 : i32
    %c0_i32_1 = arith.constant 0 : i32
    return %c0_i32, %c0_i32_0 : i32, i32
  }
  func.func @transform_2(%arg0: i32) -> (i32, i32) {
    %c0_i32 = arith.constant 0 : i32
    %c0_i32_0 = arith.constant 0 : i32
    return %arg0, %c0_i32 : i32, i32
  }
  func.func @transform_3(%arg0: i32) -> (i32, i32) {
    %c0_i32 = arith.constant 0 : i32
    %c0_i32_0 = arith.constant 0 : i32
    return %arg0, %c0_i32 : i32, i32
  }
}

module attributes {stable_mosaic.version = 11 : i64} {
  func.func @_bn_relu_kernel(%arg0: i32, %arg1: memref<16x1024xf32, #tpu.memory_space<vmem>>, %arg2: memref<1x1024xf32, #tpu.memory_space<vmem>>, %arg3: memref<1x1024xf32, #tpu.memory_space<vmem>>, %arg4: memref<16x1024xbf16, #tpu.memory_space<vmem>>) attributes {dimension_semantics = [#tpu.dimension_semantics<parallel>], iteration_bounds = array<i64: 1>, scalar_prefetch = 0 : i64, scratch_operands = 0 : i64, tpu.core_type = #tpu.core_type<tc>, window_params = [{transform_indices = @transform_0, window_bounds = array<i64: 16, 1024>}, {pipeline_mode = #tpu.pipeline_mode<synchronous>, transform_indices = @transform_1, window_bounds = array<i64: 1, 1024>}, {pipeline_mode = #tpu.pipeline_mode<synchronous>, transform_indices = @transform_2, window_bounds = array<i64: 1, 1024>}, {transform_indices = @transform_3, window_bounds = array<i64: 16, 1024>}]} {
    %c0 = arith.constant 0 : index
    %c0_0 = arith.constant 0 : index
    %0 = vector.load %arg1[%c0, %c0_0] : memref<16x1024xf32, #tpu.memory_space<vmem>>, vector<16x1024xf32>
    %c0_1 = arith.constant 0 : index
    %c0_2 = arith.constant 0 : index
    %1 = vector.load %arg2[%c0_1, %c0_2] : memref<1x1024xf32, #tpu.memory_space<vmem>>, vector<1x1024xf32>
    %2 = vector.broadcast %1 : vector<1x1024xf32> to vector<16x1024xf32>
    %3 = arith.mulf %0, %2 : vector<16x1024xf32>
    %c0_3 = arith.constant 0 : index
    %c0_4 = arith.constant 0 : index
    %4 = vector.load %arg3[%c0_3, %c0_4] : memref<1x1024xf32, #tpu.memory_space<vmem>>, vector<1x1024xf32>
    %5 = vector.broadcast %4 : vector<1x1024xf32> to vector<16x1024xf32>
    %6 = arith.addf %3, %5 : vector<16x1024xf32>
    %cst = arith.constant 0.000000e+00 : f32
    %7 = vector.broadcast %cst : f32 to vector<16x1024xf32>
    %8 = arith.maximumf %6, %7 : vector<16x1024xf32>
    %9 = arith.truncf %8 : vector<16x1024xf32> to vector<16x1024xbf16>
    %c0_5 = arith.constant 0 : index
    %c0_6 = arith.constant 0 : index
    %10 = vector.load %arg4[%c0_5, %c0_6] : memref<16x1024xbf16, #tpu.memory_space<vmem>>, vector<16x1024xbf16>
    tpu.vector_store %arg4[%c0_5, %c0_6], %9 {strides = array<i32>} : memref<16x1024xbf16, #tpu.memory_space<vmem>>, vector<16x1024xbf16>,
    return
  }
  func.func @transform_0(%arg0: i32) -> (i32, i32) {
    %c0_i32 = arith.constant 0 : i32
    %c0_i32_0 = arith.constant 0 : i32
    return %arg0, %c0_i32 : i32, i32
  }
  func.func @transform_1(%arg0: i32) -> (i32, i32) {
    %c0_i32 = arith.constant 0 : i32
    %c0_i32_0 = arith.constant 0 : i32
    %c0_i32_1 = arith.constant 0 : i32
    return %c0_i32, %c0_i32_0 : i32, i32
  }
  func.func @transform_2(%arg0: i32) -> (i32, i32) {
    %c0_i32 = arith.constant 0 : i32
    %c0_i32_0 = arith.constant 0 : i32
    %c0_i32_1 = arith.constant 0 : i32
    return %c0_i32, %c0_i32_0 : i32, i32
  }
  func.func @transform_3(%arg0: i32) -> (i32, i32) {
    %c0_i32 = arith.constant 0 : i32
    %c0_i32_0 = arith.constant 0 : i32
    return %arg0, %c0_i32 : i32, i32
  }
}

module attributes {stable_mosaic.version = 11 : i64} {
  func.func @_matmul_stats_kernel(%arg0: i32, %arg1: memref<32x640xbf16, #tpu.memory_space<vmem>>, %arg2: memref<640x128xbf16, #tpu.memory_space<vmem>>, %arg3: memref<32x128xf32, #tpu.memory_space<vmem>>, %arg4: memref<8x128xf32, #tpu.memory_space<vmem>>) attributes {dimension_semantics = [#tpu.dimension_semantics<parallel>], iteration_bounds = array<i64: 1>, scalar_prefetch = 0 : i64, scratch_operands = 0 : i64, tpu.core_type = #tpu.core_type<tc>, window_params = [{transform_indices = @transform_0, window_bounds = array<i64: 32, 640>}, {pipeline_mode = #tpu.pipeline_mode<synchronous>, transform_indices = @transform_1, window_bounds = array<i64: 640, 128>}, {transform_indices = @transform_2, window_bounds = array<i64: 32, 128>}, {transform_indices = @transform_3, window_bounds = array<i64: 8, 128>}]} {
    %c0 = arith.constant 0 : index
    %c0_0 = arith.constant 0 : index
    %0 = vector.load %arg1[%c0, %c0_0] : memref<32x640xbf16, #tpu.memory_space<vmem>>, vector<32x640xbf16>
    %c0_1 = arith.constant 0 : index
    %c0_2 = arith.constant 0 : index
    %1 = vector.load %arg2[%c0_1, %c0_2] : memref<640x128xbf16, #tpu.memory_space<vmem>>, vector<640x128xbf16>
    %cst = arith.constant dense<0.000000e+00> : vector<32x128xf32>
    %2 = tpu.matmul %0, %1, %cst {dimension_numbers = #tpu.dot_dimension_numbers<[1], [0], [0], [1], [0, 0, 1, 1], [], []>} : vector<32x640xbf16>, vector<640x128xbf16>, vector<32x128xf32> -> vector<32x128xf32>
    %c0_3 = arith.constant 0 : index
    %c0_4 = arith.constant 0 : index
    %3 = vector.load %arg3[%c0_3, %c0_4] : memref<32x128xf32, #tpu.memory_space<vmem>>, vector<32x128xf32>
    tpu.vector_store %arg3[%c0_3, %c0_4], %2 {strides = array<i32>} : memref<32x128xf32, #tpu.memory_space<vmem>>, vector<32x128xf32>,
    %cst_5 = arith.constant dense<0.000000e+00> : vector<128xf32>
    %4 = vector.multi_reduction <add>, %2, %cst_5 [0] : vector<32x128xf32> to vector<128xf32>
    %5 = vector.shape_cast %4 : vector<128xf32> to vector<1x128xf32>
    %6 = arith.mulf %2, %2 : vector<32x128xf32>
    %cst_6 = arith.constant dense<0.000000e+00> : vector<128xf32>
    %7 = vector.multi_reduction <add>, %6, %cst_6 [0] : vector<32x128xf32> to vector<128xf32>
    %8 = vector.shape_cast %7 : vector<128xf32> to vector<1x128xf32>
    %9 = tpu.iota {dimensions = array<i32: 0>} : vector<8x128xi32>
    %c0_i32 = arith.constant 0 : i32
    %10 = vector.broadcast %c0_i32 : i32 to vector<8x128xi32>
    %11 = arith.cmpi eq, %9, %10 : vector<8x128xi32>
    %c1_i32 = arith.constant 1 : i32
    %12 = vector.broadcast %c1_i32 : i32 to vector<8x128xi32>
    %13 = arith.cmpi eq, %9, %12 : vector<8x128xi32>
    %cst_7 = arith.constant 0.000000e+00 : f32
    %14 = vector.shape_cast %8 : vector<1x128xf32> to vector<1x128xf32>
    %15 = vector.broadcast %14 : vector<1x128xf32> to vector<8x128xf32>
    %16 = vector.broadcast %cst_7 : f32 to vector<8x128xf32>
    %17 = arith.select %13, %15, %16 : vector<8x128xi1>, vector<8x128xf32>
    %18 = vector.shape_cast %5 : vector<1x128xf32> to vector<1x128xf32>
    %19 = vector.broadcast %18 : vector<1x128xf32> to vector<8x128xf32>
    %20 = arith.select %11, %19, %17 : vector<8x128xi1>, vector<8x128xf32>
    %c0_8 = arith.constant 0 : index
    %c0_9 = arith.constant 0 : index
    %21 = vector.load %arg4[%c0_8, %c0_9] : memref<8x128xf32, #tpu.memory_space<vmem>>, vector<8x128xf32>
    tpu.vector_store %arg4[%c0_8, %c0_9], %20 {strides = array<i32>} : memref<8x128xf32, #tpu.memory_space<vmem>>, vector<8x128xf32>,
    return
  }
  func.func @transform_0(%arg0: i32) -> (i32, i32) {
    %c0_i32 = arith.constant 0 : i32
    %c0_i32_0 = arith.constant 0 : i32
    return %arg0, %c0_i32 : i32, i32
  }
  func.func @transform_1(%arg0: i32) -> (i32, i32) {
    %c0_i32 = arith.constant 0 : i32
    %c0_i32_0 = arith.constant 0 : i32
    %c0_i32_1 = arith.constant 0 : i32
    return %c0_i32, %c0_i32_0 : i32, i32
  }
  func.func @transform_2(%arg0: i32) -> (i32, i32) {
    %c0_i32 = arith.constant 0 : i32
    %c0_i32_0 = arith.constant 0 : i32
    return %arg0, %c0_i32 : i32, i32
  }
  func.func @transform_3(%arg0: i32) -> (i32, i32) {
    %c0_i32 = arith.constant 0 : i32
    %c0_i32_0 = arith.constant 0 : i32
    return %arg0, %c0_i32 : i32, i32
  }
}

module attributes {stable_mosaic.version = 11 : i64} {
  func.func @_bn_relu_kernel(%arg0: i32, %arg1: memref<32x128xf32, #tpu.memory_space<vmem>>, %arg2: memref<1x128xf32, #tpu.memory_space<vmem>>, %arg3: memref<1x128xf32, #tpu.memory_space<vmem>>, %arg4: memref<32x128xbf16, #tpu.memory_space<vmem>>) attributes {dimension_semantics = [#tpu.dimension_semantics<parallel>], iteration_bounds = array<i64: 1>, scalar_prefetch = 0 : i64, scratch_operands = 0 : i64, tpu.core_type = #tpu.core_type<tc>, window_params = [{transform_indices = @transform_0, window_bounds = array<i64: 32, 128>}, {pipeline_mode = #tpu.pipeline_mode<synchronous>, transform_indices = @transform_1, window_bounds = array<i64: 1, 128>}, {pipeline_mode = #tpu.pipeline_mode<synchronous>, transform_indices = @transform_2, window_bounds = array<i64: 1, 128>}, {transform_indices = @transform_3, window_bounds = array<i64: 32, 128>}]} {
    %c0 = arith.constant 0 : index
    %c0_0 = arith.constant 0 : index
    %0 = vector.load %arg1[%c0, %c0_0] : memref<32x128xf32, #tpu.memory_space<vmem>>, vector<32x128xf32>
    %c0_1 = arith.constant 0 : index
    %c0_2 = arith.constant 0 : index
    %1 = vector.load %arg2[%c0_1, %c0_2] : memref<1x128xf32, #tpu.memory_space<vmem>>, vector<1x128xf32>
    %2 = vector.broadcast %1 : vector<1x128xf32> to vector<32x128xf32>
    %3 = arith.mulf %0, %2 : vector<32x128xf32>
    %c0_3 = arith.constant 0 : index
    %c0_4 = arith.constant 0 : index
    %4 = vector.load %arg3[%c0_3, %c0_4] : memref<1x128xf32, #tpu.memory_space<vmem>>, vector<1x128xf32>
    %5 = vector.broadcast %4 : vector<1x128xf32> to vector<32x128xf32>
    %6 = arith.addf %3, %5 : vector<32x128xf32>
    %cst = arith.constant 0.000000e+00 : f32
    %7 = vector.broadcast %cst : f32 to vector<32x128xf32>
    %8 = arith.maximumf %6, %7 : vector<32x128xf32>
    %9 = arith.truncf %8 : vector<32x128xf32> to vector<32x128xbf16>
    %c0_5 = arith.constant 0 : index
    %c0_6 = arith.constant 0 : index
    %10 = vector.load %arg4[%c0_5, %c0_6] : memref<32x128xbf16, #tpu.memory_space<vmem>>, vector<32x128xbf16>
    tpu.vector_store %arg4[%c0_5, %c0_6], %9 {strides = array<i32>} : memref<32x128xbf16, #tpu.memory_space<vmem>>, vector<32x128xbf16>,
    return
  }
  func.func @transform_0(%arg0: i32) -> (i32, i32) {
    %c0_i32 = arith.constant 0 : i32
    %c0_i32_0 = arith.constant 0 : i32
    return %arg0, %c0_i32 : i32, i32
  }
  func.func @transform_1(%arg0: i32) -> (i32, i32) {
    %c0_i32 = arith.constant 0 : i32
    %c0_i32_0 = arith.constant 0 : i32
    %c0_i32_1 = arith.constant 0 : i32
    return %c0_i32, %c0_i32_0 : i32, i32
  }
  func.func @transform_2(%arg0: i32) -> (i32, i32) {
    %c0_i32 = arith.constant 0 : i32
    %c0_i32_0 = arith.constant 0 : i32
    %c0_i32_1 = arith.constant 0 : i32
    return %c0_i32, %c0_i32_0 : i32, i32
  }
  func.func @transform_3(%arg0: i32) -> (i32, i32) {
    %c0_i32 = arith.constant 0 : i32
    %c0_i32_0 = arith.constant 0 : i32
    return %arg0, %c0_i32 : i32, i32
  }
}

module attributes {stable_mosaic.version = 11 : i64} {
  func.func @_matmul_stats_kernel(%arg0: i32, %arg1: memref<128x384xbf16, #tpu.memory_space<vmem>>, %arg2: memref<384x128xbf16, #tpu.memory_space<vmem>>, %arg3: memref<128x128xf32, #tpu.memory_space<vmem>>, %arg4: memref<8x128xf32, #tpu.memory_space<vmem>>) attributes {dimension_semantics = [#tpu.dimension_semantics<parallel>], iteration_bounds = array<i64: 1>, scalar_prefetch = 0 : i64, scratch_operands = 0 : i64, tpu.core_type = #tpu.core_type<tc>, window_params = [{transform_indices = @transform_0, window_bounds = array<i64: 128, 384>}, {pipeline_mode = #tpu.pipeline_mode<synchronous>, transform_indices = @transform_1, window_bounds = array<i64: 384, 128>}, {transform_indices = @transform_2, window_bounds = array<i64: 128, 128>}, {transform_indices = @transform_3, window_bounds = array<i64: 8, 128>}]} {
    %c0 = arith.constant 0 : index
    %c0_0 = arith.constant 0 : index
    %0 = vector.load %arg1[%c0, %c0_0] : memref<128x384xbf16, #tpu.memory_space<vmem>>, vector<128x384xbf16>
    %c0_1 = arith.constant 0 : index
    %c0_2 = arith.constant 0 : index
    %1 = vector.load %arg2[%c0_1, %c0_2] : memref<384x128xbf16, #tpu.memory_space<vmem>>, vector<384x128xbf16>
    %cst = arith.constant dense<0.000000e+00> : vector<128x128xf32>
    %2 = tpu.matmul %0, %1, %cst {dimension_numbers = #tpu.dot_dimension_numbers<[1], [0], [0], [1], [0, 0, 1, 1], [], []>} : vector<128x384xbf16>, vector<384x128xbf16>, vector<128x128xf32> -> vector<128x128xf32>
    %c0_3 = arith.constant 0 : index
    %c0_4 = arith.constant 0 : index
    %3 = vector.load %arg3[%c0_3, %c0_4] : memref<128x128xf32, #tpu.memory_space<vmem>>, vector<128x128xf32>
    tpu.vector_store %arg3[%c0_3, %c0_4], %2 {strides = array<i32>} : memref<128x128xf32, #tpu.memory_space<vmem>>, vector<128x128xf32>,
    %cst_5 = arith.constant dense<0.000000e+00> : vector<128xf32>
    %4 = vector.multi_reduction <add>, %2, %cst_5 [0] : vector<128x128xf32> to vector<128xf32>
    %5 = vector.shape_cast %4 : vector<128xf32> to vector<1x128xf32>
    %6 = arith.mulf %2, %2 : vector<128x128xf32>
    %cst_6 = arith.constant dense<0.000000e+00> : vector<128xf32>
    %7 = vector.multi_reduction <add>, %6, %cst_6 [0] : vector<128x128xf32> to vector<128xf32>
    %8 = vector.shape_cast %7 : vector<128xf32> to vector<1x128xf32>
    %9 = tpu.iota {dimensions = array<i32: 0>} : vector<8x128xi32>
    %c0_i32 = arith.constant 0 : i32
    %10 = vector.broadcast %c0_i32 : i32 to vector<8x128xi32>
    %11 = arith.cmpi eq, %9, %10 : vector<8x128xi32>
    %c1_i32 = arith.constant 1 : i32
    %12 = vector.broadcast %c1_i32 : i32 to vector<8x128xi32>
    %13 = arith.cmpi eq, %9, %12 : vector<8x128xi32>
    %cst_7 = arith.constant 0.000000e+00 : f32
    %14 = vector.shape_cast %8 : vector<1x128xf32> to vector<1x128xf32>
    %15 = vector.broadcast %14 : vector<1x128xf32> to vector<8x128xf32>
    %16 = vector.broadcast %cst_7 : f32 to vector<8x128xf32>
    %17 = arith.select %13, %15, %16 : vector<8x128xi1>, vector<8x128xf32>
    %18 = vector.shape_cast %5 : vector<1x128xf32> to vector<1x128xf32>
    %19 = vector.broadcast %18 : vector<1x128xf32> to vector<8x128xf32>
    %20 = arith.select %11, %19, %17 : vector<8x128xi1>, vector<8x128xf32>
    %c0_8 = arith.constant 0 : index
    %c0_9 = arith.constant 0 : index
    %21 = vector.load %arg4[%c0_8, %c0_9] : memref<8x128xf32, #tpu.memory_space<vmem>>, vector<8x128xf32>
    tpu.vector_store %arg4[%c0_8, %c0_9], %20 {strides = array<i32>} : memref<8x128xf32, #tpu.memory_space<vmem>>, vector<8x128xf32>,
    return
  }
  func.func @transform_0(%arg0: i32) -> (i32, i32) {
    %c0_i32 = arith.constant 0 : i32
    %c0_i32_0 = arith.constant 0 : i32
    return %arg0, %c0_i32 : i32, i32
  }
  func.func @transform_1(%arg0: i32) -> (i32, i32) {
    %c0_i32 = arith.constant 0 : i32
    %c0_i32_0 = arith.constant 0 : i32
    %c0_i32_1 = arith.constant 0 : i32
    return %c0_i32, %c0_i32_0 : i32, i32
  }
  func.func @transform_2(%arg0: i32) -> (i32, i32) {
    %c0_i32 = arith.constant 0 : i32
    %c0_i32_0 = arith.constant 0 : i32
    return %arg0, %c0_i32 : i32, i32
  }
  func.func @transform_3(%arg0: i32) -> (i32, i32) {
    %c0_i32 = arith.constant 0 : i32
    %c0_i32_0 = arith.constant 0 : i32
    return %arg0, %c0_i32 : i32, i32
  }
}

module attributes {stable_mosaic.version = 11 : i64} {
  func.func @_bn_relu_kernel(%arg0: i32, %arg1: memref<128x128xf32, #tpu.memory_space<vmem>>, %arg2: memref<1x128xf32, #tpu.memory_space<vmem>>, %arg3: memref<1x128xf32, #tpu.memory_space<vmem>>, %arg4: memref<128x128xbf16, #tpu.memory_space<vmem>>) attributes {dimension_semantics = [#tpu.dimension_semantics<parallel>], iteration_bounds = array<i64: 1>, scalar_prefetch = 0 : i64, scratch_operands = 0 : i64, tpu.core_type = #tpu.core_type<tc>, window_params = [{transform_indices = @transform_0, window_bounds = array<i64: 128, 128>}, {pipeline_mode = #tpu.pipeline_mode<synchronous>, transform_indices = @transform_1, window_bounds = array<i64: 1, 128>}, {pipeline_mode = #tpu.pipeline_mode<synchronous>, transform_indices = @transform_2, window_bounds = array<i64: 1, 128>}, {transform_indices = @transform_3, window_bounds = array<i64: 128, 128>}]} {
    %c0 = arith.constant 0 : index
    %c0_0 = arith.constant 0 : index
    %0 = vector.load %arg1[%c0, %c0_0] : memref<128x128xf32, #tpu.memory_space<vmem>>, vector<128x128xf32>
    %c0_1 = arith.constant 0 : index
    %c0_2 = arith.constant 0 : index
    %1 = vector.load %arg2[%c0_1, %c0_2] : memref<1x128xf32, #tpu.memory_space<vmem>>, vector<1x128xf32>
    %2 = vector.broadcast %1 : vector<1x128xf32> to vector<128x128xf32>
    %3 = arith.mulf %0, %2 : vector<128x128xf32>
    %c0_3 = arith.constant 0 : index
    %c0_4 = arith.constant 0 : index
    %4 = vector.load %arg3[%c0_3, %c0_4] : memref<1x128xf32, #tpu.memory_space<vmem>>, vector<1x128xf32>
    %5 = vector.broadcast %4 : vector<1x128xf32> to vector<128x128xf32>
    %6 = arith.addf %3, %5 : vector<128x128xf32>
    %cst = arith.constant 0.000000e+00 : f32
    %7 = vector.broadcast %cst : f32 to vector<128x128xf32>
    %8 = arith.maximumf %6, %7 : vector<128x128xf32>
    %9 = arith.truncf %8 : vector<128x128xf32> to vector<128x128xbf16>
    %c0_5 = arith.constant 0 : index
    %c0_6 = arith.constant 0 : index
    %10 = vector.load %arg4[%c0_5, %c0_6] : memref<128x128xbf16, #tpu.memory_space<vmem>>, vector<128x128xbf16>
    tpu.vector_store %arg4[%c0_5, %c0_6], %9 {strides = array<i32>} : memref<128x128xbf16, #tpu.memory_space<vmem>>, vector<128x128xbf16>,
    return
  }
  func.func @transform_0(%arg0: i32) -> (i32, i32) {
    %c0_i32 = arith.constant 0 : i32
    %c0_i32_0 = arith.constant 0 : i32
    return %arg0, %c0_i32 : i32, i32
  }
  func.func @transform_1(%arg0: i32) -> (i32, i32) {
    %c0_i32 = arith.constant 0 : i32
    %c0_i32_0 = arith.constant 0 : i32
    %c0_i32_1 = arith.constant 0 : i32
    return %c0_i32, %c0_i32_0 : i32, i32
  }
  func.func @transform_2(%arg0: i32) -> (i32, i32) {
    %c0_i32 = arith.constant 0 : i32
    %c0_i32_0 = arith.constant 0 : i32
    %c0_i32_1 = arith.constant 0 : i32
    return %c0_i32, %c0_i32_0 : i32, i32
  }
  func.func @transform_3(%arg0: i32) -> (i32, i32) {
    %c0_i32 = arith.constant 0 : i32
    %c0_i32_0 = arith.constant 0 : i32
    return %arg0, %c0_i32 : i32, i32
  }
}

module attributes {stable_mosaic.version = 11 : i64} {
  func.func @_matmul_stats_kernel(%arg0: i32, %arg1: memref<256x256xbf16, #tpu.memory_space<vmem>>, %arg2: memref<256x128xbf16, #tpu.memory_space<vmem>>, %arg3: memref<256x128xf32, #tpu.memory_space<vmem>>, %arg4: memref<8x128xf32, #tpu.memory_space<vmem>>) attributes {dimension_semantics = [#tpu.dimension_semantics<parallel>], iteration_bounds = array<i64: 2>, scalar_prefetch = 0 : i64, scratch_operands = 0 : i64, tpu.core_type = #tpu.core_type<tc>, window_params = [{transform_indices = @transform_0, window_bounds = array<i64: 256, 256>}, {pipeline_mode = #tpu.pipeline_mode<synchronous>, transform_indices = @transform_1, window_bounds = array<i64: 256, 128>}, {transform_indices = @transform_2, window_bounds = array<i64: 256, 128>}, {transform_indices = @transform_3, window_bounds = array<i64: 8, 128>}]} {
    %c0 = arith.constant 0 : index
    %c0_0 = arith.constant 0 : index
    %0 = vector.load %arg1[%c0, %c0_0] : memref<256x256xbf16, #tpu.memory_space<vmem>>, vector<256x256xbf16>
    %c0_1 = arith.constant 0 : index
    %c0_2 = arith.constant 0 : index
    %1 = vector.load %arg2[%c0_1, %c0_2] : memref<256x128xbf16, #tpu.memory_space<vmem>>, vector<256x128xbf16>
    %cst = arith.constant dense<0.000000e+00> : vector<256x128xf32>
    %2 = tpu.matmul %0, %1, %cst {dimension_numbers = #tpu.dot_dimension_numbers<[1], [0], [0], [1], [0, 0, 1, 1], [], []>} : vector<256x256xbf16>, vector<256x128xbf16>, vector<256x128xf32> -> vector<256x128xf32>
    %c0_3 = arith.constant 0 : index
    %c0_4 = arith.constant 0 : index
    %3 = vector.load %arg3[%c0_3, %c0_4] : memref<256x128xf32, #tpu.memory_space<vmem>>, vector<256x128xf32>
    tpu.vector_store %arg3[%c0_3, %c0_4], %2 {strides = array<i32>} : memref<256x128xf32, #tpu.memory_space<vmem>>, vector<256x128xf32>,
    %cst_5 = arith.constant dense<0.000000e+00> : vector<128xf32>
    %4 = vector.multi_reduction <add>, %2, %cst_5 [0] : vector<256x128xf32> to vector<128xf32>
    %5 = vector.shape_cast %4 : vector<128xf32> to vector<1x128xf32>
    %6 = arith.mulf %2, %2 : vector<256x128xf32>
    %cst_6 = arith.constant dense<0.000000e+00> : vector<128xf32>
    %7 = vector.multi_reduction <add>, %6, %cst_6 [0] : vector<256x128xf32> to vector<128xf32>
    %8 = vector.shape_cast %7 : vector<128xf32> to vector<1x128xf32>
    %9 = tpu.iota {dimensions = array<i32: 0>} : vector<8x128xi32>
    %c0_i32 = arith.constant 0 : i32
    %10 = vector.broadcast %c0_i32 : i32 to vector<8x128xi32>
    %11 = arith.cmpi eq, %9, %10 : vector<8x128xi32>
    %c1_i32 = arith.constant 1 : i32
    %12 = vector.broadcast %c1_i32 : i32 to vector<8x128xi32>
    %13 = arith.cmpi eq, %9, %12 : vector<8x128xi32>
    %cst_7 = arith.constant 0.000000e+00 : f32
    %14 = vector.shape_cast %8 : vector<1x128xf32> to vector<1x128xf32>
    %15 = vector.broadcast %14 : vector<1x128xf32> to vector<8x128xf32>
    %16 = vector.broadcast %cst_7 : f32 to vector<8x128xf32>
    %17 = arith.select %13, %15, %16 : vector<8x128xi1>, vector<8x128xf32>
    %18 = vector.shape_cast %5 : vector<1x128xf32> to vector<1x128xf32>
    %19 = vector.broadcast %18 : vector<1x128xf32> to vector<8x128xf32>
    %20 = arith.select %11, %19, %17 : vector<8x128xi1>, vector<8x128xf32>
    %c0_8 = arith.constant 0 : index
    %c0_9 = arith.constant 0 : index
    %21 = vector.load %arg4[%c0_8, %c0_9] : memref<8x128xf32, #tpu.memory_space<vmem>>, vector<8x128xf32>
    tpu.vector_store %arg4[%c0_8, %c0_9], %20 {strides = array<i32>} : memref<8x128xf32, #tpu.memory_space<vmem>>, vector<8x128xf32>,
    return
  }
  func.func @transform_0(%arg0: i32) -> (i32, i32) {
    %c0_i32 = arith.constant 0 : i32
    %c0_i32_0 = arith.constant 0 : i32
    return %arg0, %c0_i32 : i32, i32
  }
  func.func @transform_1(%arg0: i32) -> (i32, i32) {
    %c0_i32 = arith.constant 0 : i32
    %c0_i32_0 = arith.constant 0 : i32
    %c0_i32_1 = arith.constant 0 : i32
    return %c0_i32, %c0_i32_0 : i32, i32
  }
  func.func @transform_2(%arg0: i32) -> (i32, i32) {
    %c0_i32 = arith.constant 0 : i32
    %c0_i32_0 = arith.constant 0 : i32
    return %arg0, %c0_i32 : i32, i32
  }
  func.func @transform_3(%arg0: i32) -> (i32, i32) {
    %c0_i32 = arith.constant 0 : i32
    %c0_i32_0 = arith.constant 0 : i32
    return %arg0, %c0_i32 : i32, i32
  }
}

module attributes {stable_mosaic.version = 11 : i64} {
  func.func @_bn_relu_kernel(%arg0: i32, %arg1: memref<256x128xf32, #tpu.memory_space<vmem>>, %arg2: memref<1x128xf32, #tpu.memory_space<vmem>>, %arg3: memref<1x128xf32, #tpu.memory_space<vmem>>, %arg4: memref<256x128xbf16, #tpu.memory_space<vmem>>) attributes {dimension_semantics = [#tpu.dimension_semantics<parallel>], iteration_bounds = array<i64: 2>, scalar_prefetch = 0 : i64, scratch_operands = 0 : i64, tpu.core_type = #tpu.core_type<tc>, window_params = [{transform_indices = @transform_0, window_bounds = array<i64: 256, 128>}, {pipeline_mode = #tpu.pipeline_mode<synchronous>, transform_indices = @transform_1, window_bounds = array<i64: 1, 128>}, {pipeline_mode = #tpu.pipeline_mode<synchronous>, transform_indices = @transform_2, window_bounds = array<i64: 1, 128>}, {transform_indices = @transform_3, window_bounds = array<i64: 256, 128>}]} {
    %c0 = arith.constant 0 : index
    %c0_0 = arith.constant 0 : index
    %0 = vector.load %arg1[%c0, %c0_0] : memref<256x128xf32, #tpu.memory_space<vmem>>, vector<256x128xf32>
    %c0_1 = arith.constant 0 : index
    %c0_2 = arith.constant 0 : index
    %1 = vector.load %arg2[%c0_1, %c0_2] : memref<1x128xf32, #tpu.memory_space<vmem>>, vector<1x128xf32>
    %2 = vector.broadcast %1 : vector<1x128xf32> to vector<256x128xf32>
    %3 = arith.mulf %0, %2 : vector<256x128xf32>
    %c0_3 = arith.constant 0 : index
    %c0_4 = arith.constant 0 : index
    %4 = vector.load %arg3[%c0_3, %c0_4] : memref<1x128xf32, #tpu.memory_space<vmem>>, vector<1x128xf32>
    %5 = vector.broadcast %4 : vector<1x128xf32> to vector<256x128xf32>
    %6 = arith.addf %3, %5 : vector<256x128xf32>
    %cst = arith.constant 0.000000e+00 : f32
    %7 = vector.broadcast %cst : f32 to vector<256x128xf32>
    %8 = arith.maximumf %6, %7 : vector<256x128xf32>
    %9 = arith.truncf %8 : vector<256x128xf32> to vector<256x128xbf16>
    %c0_5 = arith.constant 0 : index
    %c0_6 = arith.constant 0 : index
    %10 = vector.load %arg4[%c0_5, %c0_6] : memref<256x128xbf16, #tpu.memory_space<vmem>>, vector<256x128xbf16>
    tpu.vector_store %arg4[%c0_5, %c0_6], %9 {strides = array<i32>} : memref<256x128xbf16, #tpu.memory_space<vmem>>, vector<256x128xbf16>,
    return
  }
  func.func @transform_0(%arg0: i32) -> (i32, i32) {
    %c0_i32 = arith.constant 0 : i32
    %c0_i32_0 = arith.constant 0 : i32
    return %arg0, %c0_i32 : i32, i32
  }
  func.func @transform_1(%arg0: i32) -> (i32, i32) {
    %c0_i32 = arith.constant 0 : i32
    %c0_i32_0 = arith.constant 0 : i32
    %c0_i32_1 = arith.constant 0 : i32
    return %c0_i32, %c0_i32_0 : i32, i32
  }
  func.func @transform_2(%arg0: i32) -> (i32, i32) {
    %c0_i32 = arith.constant 0 : i32
    %c0_i32_0 = arith.constant 0 : i32
    %c0_i32_1 = arith.constant 0 : i32
    return %c0_i32, %c0_i32_0 : i32, i32
  }
  func.func @transform_3(%arg0: i32) -> (i32, i32) {
    %c0_i32 = arith.constant 0 : i32
    %c0_i32_0 = arith.constant 0 : i32
    return %arg0, %c0_i32 : i32, i32
  }
}

module attributes {stable_mosaic.version = 11 : i64} {
  func.func @_matmul_act_kernel(%arg0: i32, %arg1: memref<512x128xbf16, #tpu.memory_space<vmem>>, %arg2: memref<128x128xbf16, #tpu.memory_space<vmem>>, %arg3: memref<512x128xf32, #tpu.memory_space<vmem>>) attributes {dimension_semantics = [#tpu.dimension_semantics<parallel>], iteration_bounds = array<i64: 4>, scalar_prefetch = 0 : i64, scratch_operands = 0 : i64, tpu.core_type = #tpu.core_type<tc>, window_params = [{transform_indices = @transform_0, window_bounds = array<i64: 512, 128>}, {pipeline_mode = #tpu.pipeline_mode<synchronous>, transform_indices = @transform_1, window_bounds = array<i64: 128, 128>}, {transform_indices = @transform_2, window_bounds = array<i64: 512, 128>}]} {
    %c0 = arith.constant 0 : index
    %c0_0 = arith.constant 0 : index
    %0 = vector.load %arg1[%c0, %c0_0] : memref<512x128xbf16, #tpu.memory_space<vmem>>, vector<512x128xbf16>
    %c0_1 = arith.constant 0 : index
    %c0_2 = arith.constant 0 : index
    %1 = vector.load %arg2[%c0_1, %c0_2] : memref<128x128xbf16, #tpu.memory_space<vmem>>, vector<128x128xbf16>
    %cst = arith.constant dense<0.000000e+00> : vector<512x128xf32>
    %2 = tpu.matmul %0, %1, %cst {dimension_numbers = #tpu.dot_dimension_numbers<[1], [0], [0], [1], [0, 0, 1, 1], [], []>} : vector<512x128xbf16>, vector<128x128xbf16>, vector<512x128xf32> -> vector<512x128xf32>
    %3 = math.tanh %2 : vector<512x128xf32>
    %c0_3 = arith.constant 0 : index
    %c0_4 = arith.constant 0 : index
    %4 = vector.load %arg3[%c0_3, %c0_4] : memref<512x128xf32, #tpu.memory_space<vmem>>, vector<512x128xf32>
    tpu.vector_store %arg3[%c0_3, %c0_4], %3 {strides = array<i32>} : memref<512x128xf32, #tpu.memory_space<vmem>>, vector<512x128xf32>,
    return
  }
  func.func @transform_0(%arg0: i32) -> (i32, i32) {
    %c0_i32 = arith.constant 0 : i32
    %c0_i32_0 = arith.constant 0 : i32
    return %arg0, %c0_i32 : i32, i32
  }
  func.func @transform_1(%arg0: i32) -> (i32, i32) {
    %c0_i32 = arith.constant 0 : i32
    %c0_i32_0 = arith.constant 0 : i32
    %c0_i32_1 = arith.constant 0 : i32
    return %c0_i32, %c0_i32_0 : i32, i32
  }
  func.func @transform_2(%arg0: i32) -> (i32, i32) {
    %c0_i32 = arith.constant 0 : i32
    %c0_i32_0 = arith.constant 0 : i32
    return %arg0, %c0_i32 : i32, i32
  }
}

</mosaic_0001>

<bundles_post_ra>
// kernel: tile.48
= control target key start
LH: loop header
LB: loop body
LE: loop exit
PB: predicated region body
PF: predicated region fallthrough
CT: control target
= control target key end

     0   :  { %s28_s0 = inlined_call_operand.vmem [shape: f32[64], index: 0, kind: input, shape index: {}]   ;;  %s29_s1 = inlined_call_operand.vmem [shape: f32[16,64], index: 1, kind: output, shape index: {}]  }
   0x1   :  { %v4_v0 = vld [vmem:[%s28_s0] ss:$0 sm:$0xff] }
   0x2   :  { %5 = vst [vmem:[%s29_s1] sm:$0xff] %v4_v0  ;;  %8 = vst [vmem:[%s29_s1 + $0x8] sm:$0xff] %v4_v0 }

// kernel: generator_forward.10
= control target key start
LH: loop header
LB: loop body
LE: loop exit
PB: predicated region body
PF: predicated region fallthrough
CT: control target
= control target key end

     0   :  { %8 = vsyncpa [#allocation3], 0  ;;  %s280_s12 = smov [#allocation2]   ;;  %s345_s0 = inlined_call_operand.hbm [shape: f32[16,1024], index: 0, kind: input, shape index: {}]   ;;  %s346_s1 = inlined_call_operand.vmem [shape: f32[1,1024], index: 1, kind: input, shape index: {}]   ;;  %s347_s2 = inlined_call_operand.vmem [shape: f32[1,1024], index: 2, kind: input, shape index: {}]   ;;  %s348_s3 = inlined_call_operand.vmem [shape: bf16[16,1024], index: 3, kind: output, shape index: {}]  }
   0x1   :  { %s14_s13 = sshll.u32 %s280_s12, 4  ;;  %s256_s16 = scalar_lea.hbm %s345_s0, 2048  ;;  %s15_s13 = int_to_ptr.vmem [resolvable:$true] %s14_s13 }
   0x2   :  { %p257_p0 = scmp.ne.s32.totalorder %s345_s0, %s256_s16  ;;  %p260_p1 = scmp.lt.u32.totalorder %s256_s16, %s345_s0 }
   0x4   :  { %p262_p2 = pnand %p260_p1, %p257_p0 }
   0x6   :  { %265 = shalt.err (!%p262_p2)
}
   0x7   :  { %s266_s21 = scalar_lea.vmem %s15_s13, 2048  ;;  %p271_p4 = scmp.lt.s32.totalorder %s15_s13, %s15_s13 }
   0x8   :  { %p267_p3 = scmp.ne.s32.totalorder %s15_s13, %s266_s21  ;;  %p272_p5 = scmp.lt.s32.totalorder %s266_s21, %s266_s21 }
   0xa   :  { %p273_p6 = por %p272_p5, %p271_p4 }
   0xc   :  { %p274_p7 = pnand %p273_p6, %p267_p3 }
   0xe   :  { %277 = shalt.err (!%p274_p7)
}
   0xf   :  { %s281_s22 = smov 1024   ;;  %s282_s23 = smov 64  }
  0x10   :  { %20 = dma.hbm_to_vmem [thread:$0]  %s345_s0, 2048, %s15_s13, [#allocation3], %s281_s22, %s281_s22, %s282_s23  }
  0x11   :  { %278 = dma.done.wait [#allocation3], 2048  }
  0x12   :  { %279 = vsyncadd [#allocation3], 4294965248  ;;  %v46_v0 = vlaneseq  ;;  %v28_v7 = vld [vmem:[#allocation2] sm:$0xff]  ;;  %v29_v8 = vld [vmem:[#allocation2 + $0x8] sm:$0xff] }
  0x13   :  { %v44_v9 = vld [vmem:[%s346_s1] sm:$0xff]  ;;  %v30_v16 = vld [vmem:[#allocation2 + $0x10] sm:$0xff]  ;;  %v31_v17 = vld [vmem:[#allocation2 + $0x18] sm:$0xff] }
  0x14   :  { %v47_v1 = vshrl.u32 %v46_v0, 7  ;;  %v102_v15 = vld [vmem:[%s347_s2] sm:$0xff]  ;;  %v33_v29 = vld [vmem:[#allocation2 + $0x28] sm:$0xff]  ;;  %v34_v38 = vld [vmem:[#allocation2 + $0x30] sm:$0xff] }
  0x15   :  { %v32_v28 = vld [vmem:[#allocation2 + $0x20] sm:$0xff]  ;;  %v35_v39 = vld [vmem:[#allocation2 + $0x38] sm:$0xff]  ;;  %v37_v49 = vld [vmem:[#allocation2 + $0x48] sm:$0xff] }
  0x16   :  { %v48_v2 = vsub.s32 0, %v47_v1  ;;  %v52_v3 = vsub.s32 1, %v47_v1  ;;  %v56_v4 = vsub.s32 2, %v47_v1  ;;  %v60_v5 = vsub.s32 3, %v47_v1  ;;  %v36_v48 = vld [vmem:[#allocation2 + $0x40] sm:$0xff]  ;;  %v38_v54 = vld [vmem:[#allocation2 + $0x50] sm:$0xff] }
  0x17   :  { %v64_v6 = vsub.s32 4, %v47_v1  ;;  %v68_v10 = vsub.s32 5, %v47_v1  ;;  %v72_v11 = vsub.s32 6, %v47_v1  ;;  %v76_v12 = vsub.s32 7, %v47_v1  ;;  %v39_v55 = vld [vmem:[#allocation2 + $0x58] sm:$0xff]  ;;  %v40_v60 = vld [vmem:[#allocation2 + $0x60] sm:$0xff] }
  0x18   :  { %v49_v13 = vrot.slane %v44_v9, %v48_v2  ;;  %v53_v14 = vrot.slane %v44_v9, %v52_v3  ;;  %v57_v18 = vrot.slane %v44_v9, %v56_v4  ;;  %v61_v19 = vrot.slane %v44_v9, %v60_v5 }
  0x19   :  { %v107_v20 = vrot.slane %v102_v15, %v48_v2  ;;  %v111_v21 = vrot.slane %v102_v15, %v52_v3  ;;  %v115_v22 = vrot.slane %v102_v15, %v56_v4  ;;  %v119_v23 = vrot.slane %v102_v15, %v60_v5  ;;  %v41_v5 = vld [vmem:[#allocation2 + $0x68] sm:$0xff] }
  0x1a   :  { %v86_v24 = vmul.f32 %v49_v13, %v28_v7  ;;  %v87_v25 = vmul.f32 %v53_v14, %v29_v8  ;;  %v88_v26 = vmul.f32 %v57_v18, %v30_v16  ;;  %v89_v27 = vmul.f32 %v61_v19, %v31_v17 }
  0x1b   :  { %v65_v30 = vrot.slane %v44_v9, %v64_v6  ;;  %v69_v31 = vrot.slane %v44_v9, %v68_v10  ;;  %v123_v32 = vrot.slane %v102_v15, %v64_v6  ;;  %v127_v33 = vrot.slane %v102_v15, %v68_v10  ;;  %v42_v10 = vld [vmem:[#allocation2 + $0x70] sm:$0xff] }
  0x1c   :  { %v144_v34 = vadd.f32 %v107_v20, %v86_v24  ;;  %v145_v35 = vadd.f32 %v111_v21, %v87_v25  ;;  %v146_v36 = vadd.f32 %v115_v22, %v88_v26  ;;  %v147_v37 = vadd.f32 %v119_v23, %v89_v27 }
  0x1d   :  { %v90_v40 = vmul.f32 %v65_v30, %v32_v28  ;;  %v91_v41 = vmul.f32 %v69_v31, %v33_v29  ;;  %v73_v42 = vrot.slane %v44_v9, %v72_v11  ;;  %v77_v43 = vrot.slane %v44_v9, %v76_v12 }
  0x1e   :  { %v160_v44 = vmax.f32 %v144_v34, 0.0  ;;  %v161_v45 = vmax.f32 %v145_v35, 0.0  ;;  %v162_v46 = vmax.f32 %v146_v36, 0.0  ;;  %v163_v47 = vmax.f32 %v147_v37, 0.0 }
  0x1f   :  { %v148_v50 = vadd.f32 %v123_v32, %v90_v40  ;;  %v149_v51 = vadd.f32 %v127_v33, %v91_v41  ;;  %v92_v52 = vmul.f32 %v73_v42, %v34_v38  ;;  %v93_v53 = vmul.f32 %v77_v43, %v35_v39 }
  0x20   :  { %v245_v56 = vpack.c.bf16 %v161_v45, %v160_v44  ;;  %v246_v57 = vpack.c.bf16 %v163_v47, %v162_v46  ;;  %v131_v58 = vrot.slane %v102_v15, %v72_v11  ;;  %v135_v59 = vrot.slane %v102_v15, %v76_v12  ;;  %v43_v15 = vld [vmem:[#allocation2 + $0x78] sm:$0xff] }
  0x21   :  { %v164_v61 = vmax.f32 %v148_v50, 0.0  ;;  %v165_v62 = vmax.f32 %v149_v51, 0.0  ;;  %v94_v63 = vmul.f32 %v49_v13, %v36_v48  ;;  %v95_v0 = vmul.f32 %v53_v14, %v37_v49 }
  0x22   :  { %224 = vst [vmem:[%s348_s3] sm:$0xff] %v245_v56  ;;  %225 = vst [vmem:[%s348_s3 + $0x8] sm:$0xff] %v246_v57  ;;  %v150_v1 = vadd.f32 %v131_v58, %v92_v52  ;;  %v151_v2 = vadd.f32 %v135_v59, %v93_v53  ;;  %v96_v3 = vmul.f32 %v57_v18, %v38_v54 }
  0x23   :  { %v97_v4 = vmul.f32 %v61_v19, %v39_v55  ;;  %v247_v6 = vpack.c.bf16 %v165_v62, %v164_v61  ;;  %v152_v7 = vadd.f32 %v107_v20, %v94_v63  ;;  %v153_v8 = vadd.f32 %v111_v21, %v95_v0 }
  0x24   :  { %v98_v9 = vmul.f32 %v65_v30, %v40_v60  ;;  %v166_v11 = vmax.f32 %v150_v1, 0.0  ;;  %v167_v12 = vmax.f32 %v151_v2, 0.0  ;;  %v154_v13 = vadd.f32 %v115_v22, %v96_v3 }
  0x25   :  { %v155_v14 = vadd.f32 %v119_v23, %v97_v4  ;;  %226 = vst [vmem:[%s348_s3 + $0x10] sm:$0xff] %v247_v6  ;;  %v168_v16 = vmax.f32 %v152_v7, 0.0  ;;  %v169_v17 = vmax.f32 %v153_v8, 0.0  ;;  %v99_v24 = vmul.f32 %v69_v31, %v41_v5 }
  0x26   :  { %v156_v18 = vadd.f32 %v123_v32, %v98_v9  ;;  %v248_v19 = vpack.c.bf16 %v167_v12, %v166_v11  ;;  %v170_v25 = vmax.f32 %v154_v13, 0.0  ;;  %v100_v20 = vmul.f32 %v73_v42, %v42_v10 }
  0x27   :  { %v171_v26 = vmax.f32 %v155_v14, 0.0  ;;  %v249_v21 = vpack.c.bf16 %v169_v17, %v168_v16  ;;  %v157_v27 = vadd.f32 %v127_v33, %v99_v24  ;;  %v101_v29 = vmul.f32 %v77_v43, %v43_v15 }
  0x28   :  { %v172_v28 = vmax.f32 %v156_v18, 0.0  ;;  %227 = vst [vmem:[%s348_s3 + $0x18] sm:$0xff] %v248_v19  ;;  %v158_v23 = vadd.f32 %v131_v58, %v100_v20 }
  0x29   :  { %v250_v22 = vpack.c.bf16 %v171_v26, %v170_v25  ;;  %228 = vst [vmem:[%s348_s3 + $0x20] sm:$0xff] %v249_v21  ;;  %v173_v30 = vmax.f32 %v157_v27, 0.0  ;;  %v159_v31 = vadd.f32 %v135_v59, %v101_v29 }
  0x2a   :  { %v174_v32 = vmax.f32 %v158_v23, 0.0 }
  0x2b   :  { %229 = vst [vmem:[%s348_s3 + $0x28] sm:$0xff] %v250_v22  ;;  %v251_v33 = vpack.c.bf16 %v173_v30, %v172_v28  ;;  %v175_v34 = vmax.f32 %v159_v31, 0.0 }
  0x2d   :  { %230 = vst [vmem:[%s348_s3 + $0x30] sm:$0xff] %v251_v33  ;;  %v252_v35 = vpack.c.bf16 %v175_v34, %v174_v32 }
  0x2f   :  { %231 = vst [vmem:[%s348_s3 + $0x38] sm:$0xff] %v252_v35 }
  0x30   :  { %236 = vsyncpa [#allocation3], 1 }

// kernel: generator_forward.9
= control target key start
LH: loop header
LB: loop body
LE: loop exit
PB: predicated region body
PF: predicated region fallthrough
CT: control target
= control target key end

     0   :  { %9 = vsyncpa [#allocation3], 0  ;;  %s1118_s0 = inlined_call_operand.hbm [shape: bf16[16,128], index: 0, kind: input, shape index: {}]   ;;  %s1119_s1 = inlined_call_operand.hbm [shape: bf16[128,1024], index: 1, kind: input, shape index: {}]   ;;  %s1120_s2 = inlined_call_operand.hbm [shape: f32[16,1024], index: 2, kind: output, shape index: {0}]   ;;  %s1121_s3 = inlined_call_operand.hbm [shape: f32[8,1024], index: 3, kind: output, shape index: {1}]  }
   0x1   :  { %10 = vsyncpa [#allocation6], 0 }
   0x2   :  { %11 = vsyncpa [#allocation4], 0 }
   0x3   :  { %12 = vsyncpa [#allocation9], 0  ;;  %s984_s12 = smov [#allocation2]   ;;  %s888_s16 = scalar_lea.hbm %s1118_s0, 128 }
   0x4   :  { %s18_s13 = sshll.u32 %s984_s12, 4  ;;  %p889_p0 = scmp.ne.s32.totalorder %s1118_s0, %s888_s16  ;;  %s19_s13 = int_to_ptr.vmem [resolvable:$true] %s18_s13 }
   0x5   :  { %p892_p1 = scmp.lt.u32.totalorder %s888_s16, %s1118_s0 }
   0x7   :  { %p894_p2 = pnand %p892_p1, %p889_p0 }
   0x9   :  { %897 = shalt.err (!%p894_p2)
}
   0xa   :  { %s898_s21 = scalar_lea.vmem %s19_s13, 128  ;;  %p903_p4 = scmp.lt.s32.totalorder %s19_s13, %s19_s13 }
   0xb   :  { %p899_p3 = scmp.ne.s32.totalorder %s19_s13, %s898_s21  ;;  %p904_p5 = scmp.lt.s32.totalorder %s898_s21, %s898_s21 }
   0xd   :  { %p905_p6 = por %p904_p5, %p903_p4 }
   0xf   :  { %p906_p7 = pnand %p905_p6, %p899_p3 }
  0x11   :  { %909 = shalt.err (!%p906_p7)
}
  0x12   :  { %s985_s22 = smov 64   ;;  %s986_s23 = smov 4  }
  0x13   :  { %24 = dma.hbm_to_vmem [thread:$0]  %s1118_s0, 128, %s19_s13, [#allocation3], %s985_s22, %s985_s22, %s986_s23  }
  0x14   :  { %s987_s26 = smov [#allocation5]   ;;  %s910_s30 = scalar_lea.hbm %s1119_s1, 8192 }
  0x15   :  { %s30_s27 = sshll.u32 %s987_s26, 4  ;;  %p911_p8 = scmp.ne.s32.totalorder %s1119_s1, %s910_s30  ;;  %s31_s27 = int_to_ptr.vmem [resolvable:$true] %s30_s27 }
  0x16   :  { %p914_p9 = scmp.lt.u32.totalorder %s910_s30, %s1119_s1 }
  0x18   :  { %p916_p10 = pnand %p914_p9, %p911_p8 }
  0x1a   :  { %919 = shalt.err (!%p916_p10)
}
  0x1b   :  { %s920_s8 = scalar_lea.vmem %s31_s27, 8192  ;;  %p925_p12 = scmp.lt.s32.totalorder %s31_s27, %s31_s27 }
  0x1c   :  { %p921_p11 = scmp.ne.s32.totalorder %s31_s27, %s920_s8  ;;  %p926_p13 = scmp.lt.s32.totalorder %s920_s8, %s920_s8 }
  0x1e   :  { %p927_p0 = por %p926_p13, %p925_p12 }
  0x20   :  { %p928_p1 = pnand %p927_p0, %p921_p11 }
  0x22   :  { %931 = shalt.err (!%p928_p1)
}
  0x23   :  { %s988_s0 = smov 512   ;;  %s989_s9 = smov 32  }
  0x24   :  { %36 = dma.hbm_to_vmem [thread:$0]  %s1119_s1, 8192, %s31_s27, [#allocation6], %s988_s0, %s988_s0, %s989_s9  }
  0x25   :  { %976 = dma.done.wait [#allocation3], 128  }
  0x26   :  { %977 = vsyncadd [#allocation3], 4294967168 }
  0x27   :  { %978 = dma.done.wait [#allocation6], 8192  }
  0x28   :  { %979 = vsyncadd [#allocation6], 4294959104  ;;  %v990_v0 = vmov 0   ;;  %v46_v1 = vld [vmem:[#allocation5] sm:$0xff]  ;;  %v47_v3 = vld [vmem:[#allocation5 + $0x8] sm:$0xff]  ;;  %s991_s1 = smov [#allocation7]  }
  0x29   :  { %468 = vmatprep.mubr.bf16.mxu0 %v990_v0  ;;  %511 = vmatprep.mubr.bf16.mxu1 %v990_v0  ;;  %v50_v2 = vld [vmem:[#allocation5 + $0x20] sm:$0xff]  ;;  %v51_v5 = vld [vmem:[#allocation5 + $0x28] sm:$0xff]  ;;  %v48_v63 = vld [vmem:[#allocation5 + $0x10] sm:$0xff]  ;;  %s785_s12 = sshll.u32 %s991_s1, 4  ;;  %s1070_s12 = int_to_ptr.vmem [resolvable:$true] %s785_s12 }
  0x2a   :  { %v814_v4 = vcombine.high %v46_v1, %v50_v2  ;;  %v813_v6 = vcombine.low %v46_v1, %v50_v2  ;;  %v54_v7 = vld [vmem:[#allocation5 + $0x40] sm:$0xff]  ;;  %v816_v9 = vcombine.high %v47_v3, %v51_v5  ;;  %v815_v10 = vcombine.low %v47_v3, %v51_v5  ;;  %v55_v12 = vld [vmem:[#allocation5 + $0x48] sm:$0xff]  ;;  %v52_v1 = vld [vmem:[#allocation5 + $0x30] sm:$0xff]  ;;  %s932_s13 = scalar_lea.vmem %s1070_s12, 2048  ;;  %p937_p3 = scmp.lt.s32.totalorder %s1070_s12, %s1070_s12 }
  0x2b   :  { %v58_v8 = vld [vmem:[#allocation5 + $0x60] sm:$0xff]  ;;  %v59_v13 = vld [vmem:[#allocation5 + $0x68] sm:$0xff]  ;;  %v49_v2 = vld [vmem:[#allocation5 + $0x18] sm:$0xff]  ;;  %p933_p2 = scmp.ne.s32.totalorder %s1070_s12, %s932_s13  ;;  %p938_p4 = scmp.lt.s32.totalorder %s932_s13, %s932_s13 }
  0x2c   :  { %v822_v11 = vcombine.high %v54_v7, %v58_v8  ;;  %v62_v14 = vld [vmem:[#allocation5 + $0x80] sm:$0xff]  ;;  %436 = vmatprep.subr.bf16.mxu0 %v814_v4  ;;  %v824_v15 = vcombine.high %v55_v12, %v59_v13  ;;  %v63_v17 = vld [vmem:[#allocation5 + $0x88] sm:$0xff]  ;;  %479 = vmatprep.subr.bf16.mxu1 %v816_v9  ;;  %v821_v19 = vcombine.low %v54_v7, %v58_v8  ;;  %v53_v3 = vld [vmem:[#allocation5 + $0x38] sm:$0xff] }
  0x2d   :  { %v66_v16 = vld [vmem:[#allocation5 + $0xa0] sm:$0xff]  ;;  %v67_v18 = vld [vmem:[#allocation5 + $0xa8] sm:$0xff]  ;;  %437 = vmatpush1.bf16.msra.mxu0 %v813_v6  ;;  %480 = vmatpush1.bf16.msra.mxu1 %v815_v10  ;;  %v823_v20 = vcombine.low %v55_v12, %v59_v13  ;;  %v818_v6 = vcombine.high %v48_v63, %v52_v1  ;;  %v820_v7 = vcombine.high %v49_v2, %v53_v3  ;;  %v56_v8 = vld [vmem:[#allocation5 + $0x50] sm:$0xff]  ;;  %p939_p5 = por %p938_p4, %p937_p3 }
  0x2e   :  { %438 = vmatprep.subr.bf16.mxu0 %v822_v11  ;;  %v830_v21 = vcombine.high %v62_v14, %v66_v16  ;;  %481 = vmatprep.subr.bf16.mxu1 %v824_v15  ;;  %v832_v22 = vcombine.high %v63_v17, %v67_v18  ;;  %v70_v23 = vld [vmem:[#allocation5 + $0xc0] sm:$0xff]  ;;  %v71_v25 = vld [vmem:[#allocation5 + $0xc8] sm:$0xff]  ;;  %v829_v27 = vcombine.low %v62_v14, %v66_v16  ;;  %v60_v9 = vld [vmem:[#allocation5 + $0x70] sm:$0xff] }
  0x2f   :  { %v74_v24 = vld [vmem:[#allocation5 + $0xe0] sm:$0xff]  ;;  %v75_v26 = vld [vmem:[#allocation5 + $0xe8] sm:$0xff]  ;;  %v831_v28 = vcombine.low %v63_v17, %v67_v18  ;;  %v1042_v10 = vld [vmem:[#allocation2] sm:$0xff]   ;;  %v817_v13 = vcombine.low %v48_v63, %v52_v1  ;;  %v819_v14 = vcombine.low %v49_v2, %v53_v3  ;;  %v826_v15 = vcombine.high %v56_v8, %v60_v9  ;;  %p940_p6 = pnand %p939_p5, %p933_p2 }
  0x30   :  { %v838_v29 = vcombine.high %v70_v23, %v74_v24  ;;  %v840_v30 = vcombine.high %v71_v25, %v75_v26  ;;  %v78_v31 = vld [vmem:[#allocation5 + $0x100] sm:$0xff]  ;;  %v79_v33 = vld [vmem:[#allocation5 + $0x108] sm:$0xff]  ;;  %v837_v35 = vcombine.low %v70_v23, %v74_v24  ;;  %v839_v36 = vcombine.low %v71_v25, %v75_v26  ;;  %v57_v11 = vld [vmem:[#allocation5 + $0x58] sm:$0xff] }
  0x31   :  { %439 = vmatpush1.bf16.msra.mxu0 %v821_v19  ;;  %482 = vmatpush1.bf16.msra.mxu1 %v823_v20  ;;  %v82_v32 = vld [vmem:[#allocation5 + $0x120] sm:$0xff]  ;;  %v83_v34 = vld [vmem:[#allocation5 + $0x128] sm:$0xff]  ;;  %v61_v12 = vld [vmem:[#allocation5 + $0x78] sm:$0xff]  ;;  %v752_v3 = vlaneseq }
  0x32   :  { %440 = vmatprep.subr.bf16.mxu0 %v830_v21  ;;  %483 = vmatprep.subr.bf16.mxu1 %v832_v22  ;;  %v846_v37 = vcombine.high %v78_v31, %v82_v32  ;;  %v848_v38 = vcombine.high %v79_v33, %v83_v34  ;;  %v86_v39 = vld [vmem:[#allocation5 + $0x140] sm:$0xff]  ;;  %v87_v41 = vld [vmem:[#allocation5 + $0x148] sm:$0xff]  ;;  %v845_v43 = vcombine.low %v78_v31, %v82_v32  ;;  %v64_v17 = vld [vmem:[#allocation5 + $0x90] sm:$0xff] }
  0x33   :  { %v90_v40 = vld [vmem:[#allocation5 + $0x160] sm:$0xff]  ;;  %v91_v42 = vld [vmem:[#allocation5 + $0x168] sm:$0xff]  ;;  %v847_v44 = vcombine.low %v79_v33, %v83_v34  ;;  %v828_v16 = vcombine.high %v57_v11, %v61_v12  ;;  %v68_v18 = vld [vmem:[#allocation5 + $0xb0] sm:$0xff]  ;;  %v825_v21 = vcombine.low %v56_v8, %v60_v9  ;;  %v827_v22 = vcombine.low %v57_v11, %v61_v12 }
  0x34   :  { %v854_v45 = vcombine.high %v86_v39, %v90_v40  ;;  %v856_v46 = vcombine.high %v87_v41, %v91_v42  ;;  %v94_v47 = vld [vmem:[#allocation5 + $0x180] sm:$0xff]  ;;  %v95_v49 = vld [vmem:[#allocation5 + $0x188] sm:$0xff]  ;;  %v853_v51 = vcombine.low %v86_v39, %v90_v40  ;;  %v855_v52 = vcombine.low %v87_v41, %v91_v42  ;;  %v65_v19 = vld [vmem:[#allocation5 + $0x98] sm:$0xff] }
  0x35   :  { %441 = vmatpush1.bf16.msra.mxu0 %v829_v27  ;;  %484 = vmatpush1.bf16.msra.mxu1 %v831_v28  ;;  %v98_v48 = vld [vmem:[#allocation5 + $0x1a0] sm:$0xff]  ;;  %v99_v50 = vld [vmem:[#allocation5 + $0x1a8] sm:$0xff]  ;;  %v69_v20 = vld [vmem:[#allocation5 + $0xb8] sm:$0xff]  ;;  %v834_v23 = vcombine.high %v64_v17, %v68_v18  ;;  %v1050_v12 = vshrl.u32 %v752_v3, 7 }
  0x36   :  { %442 = vmatprep.subr.bf16.mxu0 %v838_v29  ;;  %485 = vmatprep.subr.bf16.mxu1 %v840_v30  ;;  %v862_v53 = vcombine.high %v94_v47, %v98_v48  ;;  %v864_v54 = vcombine.high %v95_v49, %v99_v50  ;;  %v102_v55 = vld [vmem:[#allocation5 + $0x1c0] sm:$0xff]  ;;  %v103_v57 = vld [vmem:[#allocation5 + $0x1c8] sm:$0xff]  ;;  %v861_v59 = vcombine.low %v94_v47, %v98_v48  ;;  %v72_v25 = vld [vmem:[#allocation5 + $0xd0] sm:$0xff] }
  0x37   :  { %v106_v56 = vld [vmem:[#allocation5 + $0x1e0] sm:$0xff]  ;;  %v107_v58 = vld [vmem:[#allocation5 + $0x1e8] sm:$0xff]  ;;  %v863_v60 = vcombine.low %v95_v49, %v99_v50  ;;  %v836_v24 = vcombine.high %v65_v19, %v69_v20  ;;  %v76_v26 = vld [vmem:[#allocation5 + $0xf0] sm:$0xff]  ;;  %v833_v29 = vcombine.low %v64_v17, %v68_v18  ;;  %v835_v30 = vcombine.low %v65_v19, %v69_v20 }
  0x38   :  { %v870_v61 = vcombine.high %v102_v55, %v106_v56  ;;  %v872_v62 = vcombine.high %v103_v57, %v107_v58  ;;  %v869_v4 = vcombine.low %v102_v55, %v106_v56  ;;  %v871_v5 = vcombine.low %v103_v57, %v107_v58  ;;  %v73_v27 = vld [vmem:[#allocation5 + $0xd8] sm:$0xff]  ;;  %v80_v33 = vld [vmem:[#allocation5 + $0x110] sm:$0xff] }
  0x39   :  { %443 = vmatpush1.bf16.msra.mxu0 %v837_v35  ;;  %486 = vmatpush1.bf16.msra.mxu1 %v839_v36  ;;  %v77_v28 = vld [vmem:[#allocation5 + $0xf8] sm:$0xff]  ;;  %v842_v31 = vcombine.high %v72_v25, %v76_v26  ;;  %v84_v34 = vld [vmem:[#allocation5 + $0x130] sm:$0xff]  ;;  %vm755_vm0 = vcmp.eq.s32.totalorder %v1050_v12, 1  ;;  %vm754_vm1 = vcmp.eq.s32.totalorder %v1050_v12, 0 }
  0x3a   :  { %444 = vmatprep.subr.bf16.mxu0 %v846_v37  ;;  %487 = vmatprep.subr.bf16.mxu1 %v848_v38  ;;  %v844_v32 = vcombine.high %v73_v27, %v77_v28  ;;  %v81_v35 = vld [vmem:[#allocation5 + $0x118] sm:$0xff]  ;;  %v841_v37 = vcombine.low %v72_v25, %v76_v26  ;;  %v843_v38 = vcombine.low %v73_v27, %v77_v28  ;;  %v88_v40 = vld [vmem:[#allocation5 + $0x150] sm:$0xff] }
  0x3b   :  { %v85_v36 = vld [vmem:[#allocation5 + $0x138] sm:$0xff]  ;;  %v850_v39 = vcombine.high %v80_v33, %v84_v34  ;;  %v92_v41 = vld [vmem:[#allocation5 + $0x170] sm:$0xff] }
  0x3c   :  { %v89_v42 = vld [vmem:[#allocation5 + $0x158] sm:$0xff]  ;;  %v96_v48 = vld [vmem:[#allocation5 + $0x190] sm:$0xff] }
  0x3d   :  { %445 = vmatpush1.bf16.msra.mxu0 %v845_v43  ;;  %488 = vmatpush1.bf16.msra.mxu1 %v847_v44  ;;  %v93_v43 = vld [vmem:[#allocation5 + $0x178] sm:$0xff]  ;;  %v849_v44 = vcombine.low %v80_v33, %v84_v34  ;;  %v100_v49 = vld [vmem:[#allocation5 + $0x1b0] sm:$0xff] }
  0x3e   :  { %446 = vmatprep.subr.bf16.mxu0 %v854_v45  ;;  %489 = vmatprep.subr.bf16.mxu1 %v856_v46  ;;  %v851_v45 = vcombine.low %v81_v35, %v85_v36  ;;  %v858_v46 = vcombine.high %v88_v40, %v92_v41  ;;  %v860_v47 = vcombine.high %v89_v42, %v93_v43  ;;  %v97_v50 = vld [vmem:[#allocation5 + $0x198] sm:$0xff]  ;;  %v104_v56 = vld [vmem:[#allocation5 + $0x1d0] sm:$0xff] }
  0x3f   :  { %v108_v57 = vld [vmem:[#allocation5 + $0x1f0] sm:$0xff]  ;;  %v105_v58 = vld [vmem:[#allocation5 + $0x1d8] sm:$0xff] }
  0x40   :  { %v873_v1 = vcombine.low %v104_v56, %v108_v57 }
  0x41   :  { %447 = vmatpush1.bf16.msra.mxu0 %v853_v51  ;;  %490 = vmatpush1.bf16.msra.mxu1 %v855_v52  ;;  %v101_v51 = vld [vmem:[#allocation5 + $0x1b8] sm:$0xff]  ;;  %v857_v52 = vcombine.low %v88_v40, %v92_v41 }
  0x42   :  { %448 = vmatprep.subr.bf16.mxu0 %v862_v53  ;;  %491 = vmatprep.subr.bf16.mxu1 %v864_v54  ;;  %v859_v53 = vcombine.low %v89_v42, %v93_v43  ;;  %v866_v54 = vcombine.high %v96_v48, %v100_v49  ;;  %v868_v55 = vcombine.high %v97_v50, %v101_v51 }
  0x45   :  { %449 = vmatpush1.bf16.msra.mxu0 %v861_v59  ;;  %492 = vmatpush1.bf16.msra.mxu1 %v863_v60  ;;  %v109_v59 = vld [vmem:[#allocation5 + $0x1f8] sm:$0xff]  ;;  %v865_v60 = vcombine.low %v96_v48, %v100_v49 }
  0x46   :  { %450 = vmatprep.subr.bf16.mxu0 %v870_v61  ;;  %493 = vmatprep.subr.bf16.mxu1 %v872_v62  ;;  %v867_v61 = vcombine.low %v97_v50, %v101_v51  ;;  %v874_v62 = vcombine.high %v104_v56, %v108_v57  ;;  %v876_v63 = vcombine.high %v105_v58, %v109_v59 }
  0x47   :  { %v875_v2 = vcombine.low %v105_v58, %v109_v59 }
  0x49   :  { %451 = vmatpush1.bf16.msra.mxu0 %v869_v4  ;;  %494 = vmatpush1.bf16.msra.mxu1 %v871_v5 }
  0x4a   :  { %522 = vmatprep.subr.bf16.mxu0 %v818_v6  ;;  %565 = vmatprep.subr.bf16.mxu1 %v820_v7 }
  0x4c   :  { %469 = vmatmul.mubr.bf16.vlgmr.msra.gmra.mrb[0].mxu0 %v1042_v10  ;;  %512 = vmatmul.mubr.bf16.vlgmr.msra.gmra.mrb[0].mxu1 %v1042_v10 }
  0x4d   :  { %523 = vmatpush1.bf16.msra.mxu0 %v817_v13  ;;  %566 = vmatpush1.bf16.msra.mxu1 %v819_v14 }
  0x4e   :  { %524 = vmatprep.subr.bf16.mxu0 %v826_v15  ;;  %567 = vmatprep.subr.bf16.mxu1 %v828_v16 }
  0x4f   :  { %554 = vmatprep.mubr.bf16.mxu0 %v990_v0  ;;  %597 = vmatprep.mubr.bf16.mxu1 %v990_v0  ;;  %v852_v0 = vcombine.high %v81_v35, %v85_v36 }
  0x51   :  { %525 = vmatpush1.bf16.msra.mxu0 %v825_v21  ;;  %568 = vmatpush1.bf16.msra.mxu1 %v827_v22 }
  0x52   :  { %526 = vmatprep.subr.bf16.mxu0 %v834_v23  ;;  %569 = vmatprep.subr.bf16.mxu1 %v836_v24 }
  0x55   :  { %527 = vmatpush1.bf16.msra.mxu0 %v833_v29  ;;  %570 = vmatpush1.bf16.msra.mxu1 %v835_v30 }
  0x56   :  { %528 = vmatprep.subr.bf16.mxu0 %v842_v31  ;;  %571 = vmatprep.subr.bf16.mxu1 %v844_v32 }
  0x59   :  { %529 = vmatpush1.bf16.msra.mxu0 %v841_v37  ;;  %572 = vmatpush1.bf16.msra.mxu1 %v843_v38 }
  0x5a   :  { %530 = vmatprep.subr.bf16.mxu0 %v850_v39  ;;  %573 = vmatprep.subr.bf16.mxu1 %v852_v0 }
  0x5d   :  { %531 = vmatpush1.bf16.msra.mxu0 %v849_v44  ;;  %574 = vmatpush1.bf16.msra.mxu1 %v851_v45 }
  0x5e   :  { %532 = vmatprep.subr.bf16.mxu0 %v858_v46  ;;  %575 = vmatprep.subr.bf16.mxu1 %v860_v47 }
  0x61   :  { %533 = vmatpush1.bf16.msra.mxu0 %v857_v52  ;;  %576 = vmatpush1.bf16.msra.mxu1 %v859_v53 }
  0x62   :  { %534 = vmatprep.subr.bf16.mxu0 %v866_v54  ;;  %577 = vmatprep.subr.bf16.mxu1 %v868_v55 }
  0x65   :  { %535 = vmatpush1.bf16.msra.mxu0 %v865_v60  ;;  %578 = vmatpush1.bf16.msra.mxu1 %v867_v61 }
  0x66   :  { %536 = vmatprep.subr.bf16.mxu0 %v874_v62  ;;  %579 = vmatprep.subr.bf16.mxu1 %v876_v63 }
  0x69   :  { %537 = vmatpush1.bf16.msra.mxu0 %v873_v1  ;;  %580 = vmatpush1.bf16.msra.mxu1 %v875_v2 }
  0x6c   :  { %555 = vmatmul.mubr.bf16.vlgmr.msra.gmra.mrb[4].mxu0 %v1042_v10  ;;  %598 = vmatmul.mubr.bf16.vlgmr.msra.gmra.mrb[4].mxu1 %v1042_v10 }
 0x11f   :  { %v470_v4 = vpop.f32.mrb[0].mxu0  ;;  %v513_v6 = vpop.f32.mrb[0].mxu1 }
 0x120   :  { %608 = vst [vmem:[#allocation7] sm:$0xff] %v470_v4  ;;  %v680_v5 = vmul.f32 %v470_v4, %v470_v4  ;;  %v472_v7 = vpop.f32.mrb[1].mxu0  ;;  %610 = vst [vmem:[#allocation7 + $0x10] sm:$0xff] %v513_v6  ;;  %v682_v8 = vmul.f32 %v513_v6, %v513_v6  ;;  %v515_v9 = vpop.f32.mrb[1].mxu1 }
 0x121   :  { %609 = vst [vmem:[#allocation7 + $0x8] sm:$0xff] %v472_v7  ;;  %v474_v11 = vpop.f32.mrb[2].mxu0  ;;  %v681_v13 = vmul.f32 %v472_v7, %v472_v7  ;;  %611 = vst [vmem:[#allocation7 + $0x18] sm:$0xff] %v515_v9  ;;  %v683_v14 = vmul.f32 %v515_v9, %v515_v9  ;;  %v517_v10 = vpop.f32.mrb[2].mxu1 }
 0x122   :  { %616 = vst [vmem:[#allocation7 + $0x40] sm:$0xff] %v474_v11  ;;  %v624_v15 = vadd.f32 %v474_v11, %v470_v4  ;;  %v688_v16 = vmul.f32 %v474_v11, %v474_v11  ;;  %v476_v17 = vpop.f32.mrb[3].mxu0  ;;  %618 = vst [vmem:[#allocation7 + $0x50] sm:$0xff] %v517_v10  ;;  %v638_v18 = vadd.f32 %v517_v10, %v513_v6  ;;  %v519_v22 = vpop.f32.mrb[3].mxu1 }
 0x123   :  { %v690_v19 = vmul.f32 %v517_v10, %v517_v10  ;;  %617 = vst [vmem:[#allocation7 + $0x48] sm:$0xff] %v476_v17  ;;  %v631_v20 = vadd.f32 %v476_v17, %v472_v7  ;;  %v689_v21 = vmul.f32 %v476_v17, %v476_v17  ;;  %619 = vst [vmem:[#allocation7 + $0x58] sm:$0xff] %v519_v22 }
 0x124   :  { %v625_v23 = vrot.slane %v624_v15, 4  ;;  %v696_v24 = vadd.f32 %v688_v16, %v680_v5  ;;  %v645_v25 = vadd.f32 %v519_v22, %v515_v9  ;;  %v691_v26 = vmul.f32 %v519_v22, %v519_v22 }
 0x125   :  { %v639_v27 = vrot.slane %v638_v18, 4  ;;  %v710_v28 = vadd.f32 %v690_v19, %v682_v8  ;;  %v632_v29 = vrot.slane %v631_v20, 4  ;;  %v703_v30 = vadd.f32 %v689_v21, %v681_v13 }
 0x126   :  { %v626_v31 = vadd.f32 %v625_v23, %v624_v15  ;;  %v697_v32 = vrot.slane %v696_v24, 4  ;;  %v646_v33 = vrot.slane %v645_v25, 4  ;;  %v717_v34 = vadd.f32 %v691_v26, %v683_v14 }
 0x127   :  { %v640_v35 = vadd.f32 %v639_v27, %v638_v18  ;;  %v711_v36 = vrot.slane %v710_v28, 4  ;;  %v633_v37 = vadd.f32 %v632_v29, %v631_v20  ;;  %v704_v38 = vrot.slane %v703_v30, 4 }
 0x128   :  { %v627_v39 = vrot.slane %v626_v31, 2  ;;  %v698_v0 = vadd.f32 %v697_v32, %v696_v24  ;;  %v647_v40 = vadd.f32 %v646_v33, %v645_v25  ;;  %v718_v41 = vrot.slane %v717_v34, 4 }
 0x129   :  { %v641_v42 = vrot.slane %v640_v35, 2  ;;  %v712_v43 = vadd.f32 %v711_v36, %v710_v28  ;;  %v634_v44 = vrot.slane %v633_v37, 2  ;;  %v705_v45 = vadd.f32 %v704_v38, %v703_v30 }
 0x12a   :  { %v628_v46 = vadd.f32 %v627_v39, %v626_v31  ;;  %v699_v47 = vrot.slane %v698_v0, 2  ;;  %v648_v48 = vrot.slane %v647_v40, 2  ;;  %v719_v49 = vadd.f32 %v718_v41, %v717_v34 }
 0x12b   :  { %v642_v50 = vadd.f32 %v641_v42, %v640_v35  ;;  %v713_v51 = vrot.slane %v712_v43, 2  ;;  %v635_v52 = vadd.f32 %v634_v44, %v633_v37  ;;  %v706_v53 = vrot.slane %v705_v45, 2 }
 0x12c   :  { %v700_v54 = vadd.f32 %v699_v47, %v698_v0  ;;  %v649_v55 = vadd.f32 %v648_v48, %v647_v40  ;;  %v720_v56 = vrot.slane %v719_v49, 2  ;;  %v629_v57 = vrot.slane %v628_v46, 1 }
 0x12d   :  { %v714_v58 = vadd.f32 %v713_v51, %v712_v43  ;;  %v707_v59 = vadd.f32 %v706_v53, %v705_v45  ;;  %v643_v61 = vrot.slane %v642_v50, 1  ;;  %v636_v62 = vrot.slane %v635_v52, 1 }
 0x12e   :  { %v701_v60 = vrot.slane %v700_v54, 1  ;;  %v721_v63 = vadd.f32 %v720_v56, %v719_v49  ;;  %v650_v3 = vrot.slane %v649_v55, 1  ;;  %v630_v6 = vadd.f32 %v629_v57, %v628_v46 }
 0x12f   :  { %v715_v1 = vrot.slane %v714_v58, 1  ;;  %v708_v2 = vrot.slane %v707_v59, 1  ;;  %v644_v11 = vadd.f32 %v643_v61, %v642_v50  ;;  %v637_v13 = vadd.f32 %v636_v62, %v635_v52 }
 0x130   :  { %v702_v4 = vadd.f32 %v701_v60, %v700_v54  ;;  %v722_v5 = vrot.slane %v721_v63, 1  ;;  %v651_v17 = vadd.f32 %v650_v3, %v649_v55 }
 0x131   :  { %v716_v7 = vadd.f32 %v715_v1, %v714_v58  ;;  %v709_v8 = vadd.f32 %v708_v2, %v707_v59 }
 0x132   :  { %v756_v9 = vsel %vm755_vm0, %v702_v4, 0.0  ;;  %v723_v14 = vadd.f32 %v722_v5, %v721_v63 }
 0x133   :  { %v764_v15 = vsel %vm754_vm1, %v630_v6, %v756_v9  ;;  %v758_v16 = vsel %vm755_vm0, %v716_v7, 0.0  ;;  %v757_v10 = vsel %vm755_vm0, %v709_v8, 0.0 }
 0x134   :  { %772 = vst [vmem:[#allocation8] sm:$0xff] %v764_v15  ;;  %v766_v18 = vsel %vm754_vm1, %v644_v11, %v758_v16  ;;  %v765_v19 = vsel %vm754_vm1, %v637_v13, %v757_v10  ;;  %v759_v20 = vsel %vm755_vm0, %v723_v14, 0.0 }
 0x135   :  { %774 = vst [vmem:[#allocation8 + $0x10] sm:$0xff] %v766_v18  ;;  %773 = vst [vmem:[#allocation8 + $0x8] sm:$0xff] %v765_v19  ;;  %v767_v21 = vsel %vm754_vm1, %v651_v17, %v759_v20 }
 0x136   :  { %775 = vst [vmem:[#allocation8 + $0x18] sm:$0xff] %v767_v21 }
 0x13f   :  { %v556_v22 = vpop.f32.mrb[4].mxu0  ;;  %v599_v23 = vpop.f32.mrb[4].mxu1 }
 0x140   :  { %612 = vst [vmem:[#allocation7 + $0x20] sm:$0xff] %v556_v22  ;;  %v558_v24 = vpop.f32.mrb[5].mxu0  ;;  %v684_v25 = vmul.f32 %v556_v22, %v556_v22  ;;  %614 = vst [vmem:[#allocation7 + $0x30] sm:$0xff] %v599_v23  ;;  %v686_v26 = vmul.f32 %v599_v23, %v599_v23  ;;  %v601_v27 = vpop.f32.mrb[5].mxu1 }
 0x141   :  { %613 = vst [vmem:[#allocation7 + $0x28] sm:$0xff] %v558_v24  ;;  %v560_v28 = vpop.f32.mrb[6].mxu0  ;;  %v685_v29 = vmul.f32 %v558_v24, %v558_v24  ;;  %615 = vst [vmem:[#allocation7 + $0x38] sm:$0xff] %v601_v27  ;;  %v687_v30 = vmul.f32 %v601_v27, %v601_v27  ;;  %v603_v33 = vpop.f32.mrb[6].mxu1 }
 0x142   :  { %620 = vst [vmem:[#allocation7 + $0x60] sm:$0xff] %v560_v28  ;;  %v652_v31 = vadd.f32 %v560_v28, %v556_v22  ;;  %v692_v32 = vmul.f32 %v560_v28, %v560_v28  ;;  %v562_v34 = vpop.f32.mrb[7].mxu0  ;;  %622 = vst [vmem:[#allocation7 + $0x70] sm:$0xff] %v603_v33  ;;  %v666_v35 = vadd.f32 %v603_v33, %v599_v23  ;;  %v605_v39 = vpop.f32.mrb[7].mxu1 }
 0x143   :  { %v694_v36 = vmul.f32 %v603_v33, %v603_v33  ;;  %621 = vst [vmem:[#allocation7 + $0x68] sm:$0xff] %v562_v34  ;;  %v659_v37 = vadd.f32 %v562_v34, %v558_v24  ;;  %v693_v38 = vmul.f32 %v562_v34, %v562_v34  ;;  %623 = vst [vmem:[#allocation7 + $0x78] sm:$0xff] %v605_v39 }
 0x144   :  { %v653_v0 = vrot.slane %v652_v31, 4  ;;  %v724_v40 = vadd.f32 %v692_v32, %v684_v25  ;;  %v673_v41 = vadd.f32 %v605_v39, %v601_v27  ;;  %v695_v42 = vmul.f32 %v605_v39, %v605_v39 }
 0x145   :  { %v667_v43 = vrot.slane %v666_v35, 4  ;;  %v738_v44 = vadd.f32 %v694_v36, %v686_v26  ;;  %v660_v45 = vrot.slane %v659_v37, 4  ;;  %v731_v46 = vadd.f32 %v693_v38, %v685_v29 }
 0x146   :  { %943 = shalt.err (!%p940_p6)
}
 0x147   :  { %s944_s16 = scalar_lea.hbm %s1120_s2, 2048 }
 0x148   :  { %p945_p7 = scmp.ne.s32.totalorder %s1120_s2, %s944_s16  ;;  %p948_p8 = scmp.lt.u32.totalorder %s944_s16, %s1120_s2 }
 0x14a   :  { %p950_p9 = pnand %p948_p8, %p945_p7 }
 0x14c   :  { %953 = shalt.err (!%p950_p9)
}
 0x14d   :  { %s992_s21 = smov 1024   ;;  %v654_v47 = vadd.f32 %v653_v0, %v652_v31  ;;  %v725_v48 = vrot.slane %v724_v40, 4  ;;  %v674_v49 = vrot.slane %v673_v41, 4  ;;  %v745_v50 = vadd.f32 %v695_v42, %v687_v30 }
 0x14e   :  { %791 = dma.vmem_to_hbm [thread:$0]  %s1070_s12, 2048, %s1120_s2, [#allocation4], %s992_s21, %s992_s21, %s985_s22   ;;  %v668_v51 = vadd.f32 %v667_v43, %v666_v35  ;;  %v739_v52 = vrot.slane %v738_v44, 4  ;;  %v661_v53 = vadd.f32 %v660_v45, %v659_v37  ;;  %v732_v54 = vrot.slane %v731_v46, 4 }
 0x14f   :  { %v655_v55 = vrot.slane %v654_v47, 2  ;;  %v726_v56 = vadd.f32 %v725_v48, %v724_v40  ;;  %v675_v57 = vadd.f32 %v674_v49, %v673_v41  ;;  %v746_v58 = vrot.slane %v745_v50, 4  ;;  %s993_s2 = smov [#allocation8]  }
 0x150   :  { %v669_v59 = vrot.slane %v668_v51, 2  ;;  %v740_v60 = vadd.f32 %v739_v52, %v738_v44  ;;  %v662_v61 = vrot.slane %v661_v53, 2  ;;  %v733_v62 = vadd.f32 %v732_v54, %v731_v46  ;;  %s798_s22 = sshll.u32 %s993_s2, 4  ;;  %s799_s22 = int_to_ptr.vmem [resolvable:$true] %s798_s22 }
 0x151   :  { %v656_v63 = vadd.f32 %v655_v55, %v654_v47  ;;  %v727_v1 = vrot.slane %v726_v56, 2  ;;  %v676_v2 = vrot.slane %v675_v57, 2  ;;  %v747_v3 = vadd.f32 %v746_v58, %v745_v50  ;;  %s954_s25 = scalar_lea.vmem %s799_s22, 1024  ;;  %p959_p11 = scmp.lt.s32.totalorder %s799_s22, %s799_s22 }
 0x152   :  { %v670_v4 = vadd.f32 %v669_v59, %v668_v51  ;;  %v741_v5 = vrot.slane %v740_v60, 2  ;;  %v663_v6 = vadd.f32 %v662_v61, %v661_v53  ;;  %v734_v7 = vrot.slane %v733_v62, 2  ;;  %p955_p10 = scmp.ne.s32.totalorder %s799_s22, %s954_s25  ;;  %p960_p12 = scmp.lt.s32.totalorder %s954_s25, %s954_s25 }
 0x153   :  { %v728_v8 = vadd.f32 %v727_v1, %v726_v56  ;;  %v677_v9 = vadd.f32 %v676_v2, %v675_v57  ;;  %v748_v11 = vrot.slane %v747_v3, 2  ;;  %v657_v13 = vrot.slane %v656_v63, 1 }
 0x154   :  { %v742_v14 = vadd.f32 %v741_v5, %v740_v60  ;;  %v735_v15 = vadd.f32 %v734_v7, %v733_v62  ;;  %v671_v10 = vrot.slane %v670_v4, 1  ;;  %v664_v17 = vrot.slane %v663_v6, 1  ;;  %p961_p13 = por %p960_p12, %p959_p11 }
 0x155   :  { %v729_v16 = vrot.slane %v728_v8, 1  ;;  %v749_v18 = vadd.f32 %v748_v11, %v747_v3  ;;  %v678_v21 = vrot.slane %v677_v9, 1  ;;  %v658_v24 = vadd.f32 %v657_v13, %v656_v63 }
 0x156   :  { %v743_v19 = vrot.slane %v742_v14, 1  ;;  %v736_v20 = vrot.slane %v735_v15, 1  ;;  %v672_v28 = vadd.f32 %v671_v10, %v670_v4  ;;  %v665_v29 = vadd.f32 %v664_v17, %v663_v6  ;;  %p962_p0 = pnand %p961_p13, %p955_p10 }
 0x157   :  { %v730_v22 = vadd.f32 %v729_v16, %v728_v8  ;;  %v750_v23 = vrot.slane %v749_v18, 1  ;;  %v679_v34 = vadd.f32 %v678_v21, %v677_v9 }
 0x158   :  { %v744_v25 = vadd.f32 %v743_v19, %v742_v14  ;;  %v737_v26 = vadd.f32 %v736_v20, %v735_v15 }
 0x159   :  { %v760_v27 = vsel %vm755_vm0, %v730_v22, 0.0  ;;  %v751_v30 = vadd.f32 %v750_v23, %v749_v18 }
 0x15a   :  { %v768_v31 = vsel %vm754_vm1, %v658_v24, %v760_v27  ;;  %v762_v32 = vsel %vm755_vm0, %v744_v25, 0.0  ;;  %v761_v33 = vsel %vm755_vm0, %v737_v26, 0.0 }
 0x15b   :  { %776 = vst [vmem:[#allocation8 + $0x20] sm:$0xff] %v768_v31  ;;  %v770_v35 = vsel %vm754_vm1, %v672_v28, %v762_v32  ;;  %v769_v36 = vsel %vm754_vm1, %v665_v29, %v761_v33  ;;  %v763_v37 = vsel %vm755_vm0, %v751_v30, 0.0 }
 0x15c   :  { %778 = vst [vmem:[#allocation8 + $0x30] sm:$0xff] %v770_v35  ;;  %777 = vst [vmem:[#allocation8 + $0x28] sm:$0xff] %v769_v36  ;;  %v771_v38 = vsel %vm754_vm1, %v679_v34, %v763_v37 }
 0x15d   :  { %779 = vst [vmem:[#allocation8 + $0x38] sm:$0xff] %v771_v38 }
 0x15e   :  { %965 = shalt.err (!%p962_p0)
}
 0x15f   :  { %s966_s28 = scalar_lea.hbm %s1121_s3, 1024 }
 0x160   :  { %p967_p1 = scmp.ne.s32.totalorder %s1121_s3, %s966_s28  ;;  %p970_p2 = scmp.lt.u32.totalorder %s966_s28, %s1121_s3 }
 0x162   :  { %p972_p3 = pnand %p970_p2, %p967_p1 }
 0x164   :  { %975 = shalt.err (!%p972_p3)
}
 0x165   :  { %801 = dma.vmem_to_hbm [thread:$0]  %s799_s22, 1024, %s1121_s3, [#allocation9]  }
 0x166   :  { %980 = dma.done.wait [#allocation4], 2048  }
 0x167   :  { %981 = vsyncadd [#allocation4], 4294965248 }
 0x168   :  { %982 = dma.done.wait [#allocation9], 1024  }
 0x169   :  { %983 = vsyncadd [#allocation9], 4294966272 }
 0x16a   :  { %808 = vsyncpa [#allocation3], 1 }
 0x16b   :  { %809 = vsyncpa [#allocation6], 1 }
 0x16c   :  { %810 = vsyncpa [#allocation4], 1 }
 0x16d   :  { %811 = vsyncpa [#allocation9], 1 }

// kernel: tile.58
= control target key start
LH: loop header
LB: loop body
LE: loop exit
PB: predicated region body
PF: predicated region fallthrough
CT: control target
= control target key end

     0   :  { %s22_s0 = inlined_call_operand.vmem [shape: f32[32], index: 0, kind: input, shape index: {}]   ;;  %s23_s1 = inlined_call_operand.vmem [shape: f32[4,32], index: 1, kind: output, shape index: {}]  }
   0x1   :  { %v4_v0 = vld [vmem:[%s22_s0] ss:$0 sm:$0xff] }
   0x2   :  { %5 = vst [vmem:[%s23_s1] sm:$0xf] %v4_v0 }

// kernel: generator_forward.11
= control target key start
LH: loop header
LB: loop body
LE: loop exit
PB: predicated region body
PF: predicated region fallthrough
CT: control target
= control target key end

     0   :  { %9 = vsyncpa [#allocation3], 0  ;;  %s1014_s0 = inlined_call_operand.hbm [shape: bf16[32,640], index: 0, kind: input, shape index: {}]   ;;  %s1015_s1 = inlined_call_operand.hbm [shape: bf16[640,128], index: 1, kind: input, shape index: {}]   ;;  %s1016_s2 = inlined_call_operand.hbm [shape: f32[32,128], index: 2, kind: output, shape index: {0}]   ;;  %s1017_s3 = inlined_call_operand.hbm [shape: f32[8,128], index: 3, kind: output, shape index: {1}]  }
   0x1   :  { %10 = vsyncpa [#allocation6], 0 }
   0x2   :  { %11 = vsyncpa [#allocation4], 0 }
   0x3   :  { %12 = vsyncpa [#allocation9], 0  ;;  %s936_s12 = smov [#allocation2]   ;;  %s840_s16 = scalar_lea.hbm %s1014_s0, 1280 }
   0x4   :  { %s18_s13 = sshll.u32 %s936_s12, 4  ;;  %p841_p0 = scmp.ne.s32.totalorder %s1014_s0, %s840_s16  ;;  %s19_s13 = int_to_ptr.vmem [resolvable:$true] %s18_s13 }
   0x5   :  { %p844_p1 = scmp.lt.u32.totalorder %s840_s16, %s1014_s0 }
   0x7   :  { %p846_p2 = pnand %p844_p1, %p841_p0 }
   0x9   :  { %849 = shalt.err (!%p846_p2)
}
   0xa   :  { %s850_s21 = scalar_lea.vmem %s19_s13, 1280  ;;  %p855_p4 = scmp.lt.s32.totalorder %s19_s13, %s19_s13 }
   0xb   :  { %p851_p3 = scmp.ne.s32.totalorder %s19_s13, %s850_s21  ;;  %p856_p5 = scmp.lt.s32.totalorder %s850_s21, %s850_s21 }
   0xd   :  { %p857_p6 = por %p856_p5, %p855_p4 }
   0xf   :  { %p858_p7 = pnand %p857_p6, %p851_p3 }
  0x11   :  { %861 = shalt.err (!%p858_p7)
}
  0x12   :  { %s937_s22 = smov 320   ;;  %s938_s23 = smov 20  }
  0x13   :  { %24 = dma.hbm_to_vmem [thread:$0]  %s1014_s0, 1280, %s19_s13, [#allocation3], %s937_s22, %s937_s22, %s938_s23  }
  0x14   :  { %s939_s26 = smov [#allocation5]   ;;  %s862_s30 = scalar_lea.hbm %s1015_s1, 5120 }
  0x15   :  { %s30_s27 = sshll.u32 %s939_s26, 4  ;;  %p863_p8 = scmp.ne.s32.totalorder %s1015_s1, %s862_s30  ;;  %s31_s27 = int_to_ptr.vmem [resolvable:$true] %s30_s27 }
  0x16   :  { %p866_p9 = scmp.lt.u32.totalorder %s862_s30, %s1015_s1 }
  0x18   :  { %p868_p10 = pnand %p866_p9, %p863_p8 }
  0x1a   :  { %871 = shalt.err (!%p868_p10)
}
  0x1b   :  { %s872_s8 = scalar_lea.vmem %s31_s27, 5120  ;;  %p877_p12 = scmp.lt.s32.totalorder %s31_s27, %s31_s27 }
  0x1c   :  { %p873_p11 = scmp.ne.s32.totalorder %s31_s27, %s872_s8  ;;  %p878_p13 = scmp.lt.s32.totalorder %s872_s8, %s872_s8 }
  0x1e   :  { %p879_p0 = por %p878_p13, %p877_p12 }
  0x20   :  { %p880_p1 = pnand %p879_p0, %p873_p11 }
  0x22   :  { %883 = shalt.err (!%p880_p1)
}
  0x23   :  { %s940_s0 = smov 64   ;;  %s941_s9 = smov 4  }
  0x24   :  { %36 = dma.hbm_to_vmem [thread:$0]  %s1015_s1, 5120, %s31_s27, [#allocation6], %s940_s0, %s940_s0, %s941_s9  }
  0x25   :  { %928 = dma.done.wait [#allocation3], 1280  }
  0x26   :  { %929 = vsyncadd [#allocation3], 4294966016 }
  0x27   :  { %930 = dma.done.wait [#allocation6], 5120  }
  0x28   :  { %931 = vsyncadd [#allocation6], 4294962176  ;;  %v786_v0 = vld [vmem:[#allocation5 + $0x40] sm:$0xff]   ;;  %v790_v4 = vld [vmem:[#allocation5 + $0x48] sm:$0xff]   ;;  %s942_s1 = smov [#allocation7]  }
  0x29   :  { %v787_v1 = vld [vmem:[#allocation5 + $0xc0] sm:$0xff]   ;;  %690 = vmatprep.subr.bf16.mxu0 %v786_v0  ;;  %v791_v5 = vld [vmem:[#allocation5 + $0xc8] sm:$0xff]   ;;  %v794_v8 = vld [vmem:[#allocation5 + $0x50] sm:$0xff]   ;;  %s613_s12 = sshll.u32 %s942_s1, 4  ;;  %s614_s12 = int_to_ptr.vmem [resolvable:$true] %s613_s12 }
  0x2a   :  { %v788_v2 = vld [vmem:[#allocation5] sm:$0xff]   ;;  %718 = vmatprep.subr.bf16.mxu1 %v787_v1  ;;  %v792_v6 = vld [vmem:[#allocation5 + $0x8] sm:$0xff]   ;;  %v795_v9 = vld [vmem:[#allocation5 + $0xd0] sm:$0xff]   ;;  %s884_s13 = scalar_lea.vmem %s614_s12, 512  ;;  %p889_p3 = scmp.lt.s32.totalorder %s614_s12, %s614_s12 }
  0x2b   :  { %v789_v3 = vld [vmem:[#allocation5 + $0x80] sm:$0xff]   ;;  %691 = vmatpush3.bf16.msra.mxu0 %v788_v2  ;;  %v793_v7 = vld [vmem:[#allocation5 + $0x88] sm:$0xff]   ;;  %v796_v10 = vld [vmem:[#allocation5 + $0x10] sm:$0xff]   ;;  %p885_p2 = scmp.ne.s32.totalorder %s614_s12, %s884_s13  ;;  %p890_p4 = scmp.lt.s32.totalorder %s884_s13, %s884_s13 }
  0x2c   :  { %719 = vmatpush3.bf16.msra.mxu1 %v789_v3  ;;  %692 = vmatprep.subr.bf16.mxu0 %v790_v4  ;;  %v797_v11 = vld [vmem:[#allocation5 + $0x90] sm:$0xff]   ;;  %v798_v12 = vld [vmem:[#allocation5 + $0x58] sm:$0xff]   ;;  %v802_v16 = vld [vmem:[#allocation5 + $0x60] sm:$0xff]  }
  0x2d   :  { %720 = vmatprep.subr.bf16.mxu1 %v791_v5  ;;  %v799_v13 = vld [vmem:[#allocation5 + $0xd8] sm:$0xff]   ;;  %v803_v17 = vld [vmem:[#allocation5 + $0xe0] sm:$0xff]   ;;  %v806_v20 = vld [vmem:[#allocation5 + $0x68] sm:$0xff]   ;;  %p891_p5 = por %p890_p4, %p889_p3 }
  0x2e   :  { %v800_v14 = vld [vmem:[#allocation5 + $0x18] sm:$0xff]   ;;  %v804_v18 = vld [vmem:[#allocation5 + $0x20] sm:$0xff]   ;;  %v807_v21 = vld [vmem:[#allocation5 + $0xe8] sm:$0xff]  }
  0x2f   :  { %693 = vmatpush3.bf16.msra.mxu0 %v792_v6  ;;  %v801_v15 = vld [vmem:[#allocation5 + $0x98] sm:$0xff]   ;;  %v805_v19 = vld [vmem:[#allocation5 + $0xa0] sm:$0xff]   ;;  %v808_v22 = vld [vmem:[#allocation5 + $0x28] sm:$0xff]   ;;  %p892_p6 = pnand %p891_p5, %p885_p2 }
  0x30   :  { %721 = vmatpush3.bf16.msra.mxu1 %v793_v7  ;;  %694 = vmatprep.subr.bf16.mxu0 %v794_v8  ;;  %v809_v23 = vld [vmem:[#allocation5 + $0xa8] sm:$0xff]   ;;  %v810_v24 = vld [vmem:[#allocation5 + $0x70] sm:$0xff]   ;;  %v814_v28 = vld [vmem:[#allocation5 + $0x78] sm:$0xff]  }
  0x31   :  { %722 = vmatprep.subr.bf16.mxu1 %v795_v9  ;;  %v811_v25 = vld [vmem:[#allocation5 + $0xf0] sm:$0xff]   ;;  %v815_v29 = vld [vmem:[#allocation5 + $0xf8] sm:$0xff]   ;;  %v824_v36 = vld [vmem:[#allocation5 + $0x100] sm:$0xff]  }
  0x32   :  { %v812_v26 = vld [vmem:[#allocation5 + $0x30] sm:$0xff]   ;;  %v816_v30 = vld [vmem:[#allocation5 + $0x38] sm:$0xff]   ;;  %v825_v37 = vld [vmem:[#allocation5 + $0x108] sm:$0xff]  }
  0x33   :  { %695 = vmatpush3.bf16.msra.mxu0 %v796_v10  ;;  %v813_v27 = vld [vmem:[#allocation5 + $0xb0] sm:$0xff]   ;;  %v817_v31 = vld [vmem:[#allocation5 + $0xb8] sm:$0xff]   ;;  %v828_v45 = vld [vmem:[#allocation5 + $0x120] sm:$0xff]  }
  0x34   :  { %723 = vmatpush3.bf16.msra.mxu1 %v797_v11  ;;  %696 = vmatprep.subr.bf16.mxu0 %v798_v12  ;;  %v818_v32 = vld [vmem:[#allocation2] ss:$20 sps:$4 sm:$0xff]   ;;  %v820_v33 = vld [vmem:[#allocation2 + $0x4] ss:$20 sps:$4 sm:$0xff]   ;;  %v821_v34 = vld [vmem:[#allocation2 + $0x8] ss:$20 sps:$4 sm:$0xff]  }
  0x35   :  { %724 = vmatprep.subr.bf16.mxu1 %v799_v13  ;;  %v823_v35 = vld [vmem:[#allocation2 + $0xc] ss:$20 sps:$4 sm:$0xff]   ;;  %460 = vmatprep.mubr.bf16.mxu0 %v820_v33  ;;  %v831_v40 = vld [vmem:[#allocation2 + $0x34] ss:$20 sps:$4 sm:$0xff]   ;;  %v835_v43 = vld [vmem:[#allocation2 + $0x30] ss:$20 sps:$4 sm:$0xff]  }
  0x36   :  { %509 = vmatprep.mubr.bf16.mxu1 %v823_v35  ;;  %v826_v38 = vld [vmem:[#allocation5 + $0x110] sm:$0xff]   ;;  %v827_v41 = vld [vmem:[#allocation5 + $0x118] sm:$0xff]   ;;  %v833_v46 = vld [vmem:[#allocation5 + $0x128] sm:$0xff]  }
  0x37   :  { %697 = vmatpush3.bf16.msra.mxu0 %v800_v14  ;;  %v829_v39 = vld [vmem:[#allocation2 + $0x2c] ss:$20 sps:$4 sm:$0xff]   ;;  %v834_v42 = vld [vmem:[#allocation2 + $0x28] ss:$20 sps:$4 sm:$0xff]   ;;  %v838_v44 = vld [vmem:[#allocation2 + $0x10] ss:$20 sps:$4 sm:$0xff]  }
  0x38   :  { %725 = vmatpush3.bf16.msra.mxu1 %v801_v15  ;;  %698 = vmatprep.subr.bf16.mxu0 %v802_v16  ;;  %v836_v47 = vld [vmem:[#allocation5 + $0x130] sm:$0xff]   ;;  %v837_v48 = vld [vmem:[#allocation5 + $0x138] sm:$0xff]  }
  0x39   :  { %726 = vmatprep.subr.bf16.mxu1 %v803_v17  ;;  %v839_v49 = vld [vmem:[#allocation2 + $0x38] ss:$20 sps:$4 sm:$0xff]  }
  0x3b   :  { %699 = vmatpush3.bf16.msra.mxu0 %v804_v18 }
  0x3c   :  { %727 = vmatpush3.bf16.msra.mxu1 %v805_v19  ;;  %700 = vmatprep.subr.bf16.mxu0 %v806_v20 }
  0x3d   :  { %728 = vmatprep.subr.bf16.mxu1 %v807_v21 }
  0x3f   :  { %701 = vmatpush3.bf16.msra.mxu0 %v808_v22 }
  0x40   :  { %729 = vmatpush3.bf16.msra.mxu1 %v809_v23  ;;  %702 = vmatprep.subr.bf16.mxu0 %v810_v24 }
  0x41   :  { %730 = vmatprep.subr.bf16.mxu1 %v811_v25 }
  0x43   :  { %703 = vmatpush3.bf16.msra.mxu0 %v812_v26 }
  0x44   :  { %731 = vmatpush3.bf16.msra.mxu1 %v813_v27  ;;  %704 = vmatprep.subr.bf16.mxu0 %v814_v28 }
  0x45   :  { %732 = vmatprep.subr.bf16.mxu1 %v815_v29 }
  0x47   :  { %705 = vmatpush3.bf16.msra.mxu0 %v816_v30 }
  0x48   :  { %733 = vmatpush3.bf16.msra.mxu1 %v817_v31  ;;  %756 = vmatprep.subr.bf16.mxu0 %v824_v36 }
  0x4a   :  { %461 = vmatmul.mubr.bf16.vlgmr.msra.gmra.mrb[0].mxu0 %v818_v32 }
  0x4b   :  { %510 = vmatmul.mubr.bf16.vlgmr.msra.gmra.mrb[0].mxu1 %v821_v34  ;;  %757 = vmatpush3.bf16.msra.mxu0 %v824_v36 }
  0x4c   :  { %758 = vmatprep.subr.bf16.mxu0 %v825_v37  ;;  %468 = vmatprep.mubr.bf16.mxu0 %v829_v39 }
  0x4d   :  { %517 = vmatprep.mubr.bf16.mxu1 %v831_v40 }
  0x4f   :  { %759 = vmatpush3.bf16.msra.mxu0 %v825_v37 }
  0x50   :  { %760 = vmatprep.subr.bf16.mxu0 %v826_v38 }
  0x52   :  { %469 = vmatmul.mubr.bf16.gmra.mrb[4].mxu0 %v834_v42 }
  0x53   :  { %518 = vmatmul.mubr.bf16.gmra.mrb[4].mxu1 %v835_v43  ;;  %761 = vmatpush3.bf16.msra.mxu0 %v826_v38 }
  0x54   :  { %762 = vmatprep.subr.bf16.mxu0 %v827_v41  ;;  %772 = vmatprep.mubr.bf16.mxu0 %v838_v44 }
  0x57   :  { %763 = vmatpush3.bf16.msra.mxu0 %v827_v41 }
  0x58   :  { %764 = vmatprep.subr.bf16.mxu0 %v828_v45 }
  0x5b   :  { %765 = vmatpush3.bf16.msra.mxu0 %v828_v45 }
  0x5c   :  { %766 = vmatprep.subr.bf16.mxu0 %v833_v46 }
  0x5f   :  { %767 = vmatpush3.bf16.msra.mxu0 %v833_v46 }
  0x60   :  { %768 = vmatprep.subr.bf16.mxu0 %v836_v47 }
  0x63   :  { %769 = vmatpush3.bf16.msra.mxu0 %v836_v47 }
  0x64   :  { %770 = vmatprep.subr.bf16.mxu0 %v837_v48 }
  0x67   :  { %771 = vmatpush3.bf16.msra.mxu0 %v837_v48 }
  0x6a   :  { %773 = vmatmul.mubr.bf16.vlgmr.msra.gmra.mrb[8].mxu0 %v839_v49 }
 0x11d   :  { %v706_v50 = vpop.f32.mrb[0].mxu0 }
 0x11e   :  { %v734_v51 = vpop.f32.mrb[0].mxu1  ;;  %v707_v52 = vpop.f32.mrb[1].mxu0 }
 0x11f   :  { %v708_v53 = vadd.f32 %v707_v52, %v706_v50  ;;  %v735_v54 = vpop.f32.mrb[1].mxu1  ;;  %v709_v55 = vpop.f32.mrb[2].mxu0 }
 0x120   :  { %v736_v56 = vadd.f32 %v735_v54, %v734_v51  ;;  %v737_v57 = vpop.f32.mrb[2].mxu1  ;;  %v710_v58 = vpop.f32.mrb[3].mxu0 }
 0x121   :  { %v711_v59 = vadd.f32 %v710_v58, %v709_v55  ;;  %v738_v60 = vpop.f32.mrb[3].mxu1 }
 0x122   :  { %v739_v61 = vadd.f32 %v738_v60, %v737_v57  ;;  %v512_v62 = vadd.f32 %v736_v56, %v708_v53 }
 0x124   :  { %v515_v63 = vadd.f32 %v739_v61, %v711_v59 }
 0x125   :  { %v712_v0 = vpop.f32.mrb[4].mxu0 }
 0x126   :  { %v740_v1 = vpop.f32.mrb[4].mxu1  ;;  %v713_v2 = vpop.f32.mrb[5].mxu0 }
 0x127   :  { %v714_v3 = vadd.f32 %v713_v2, %v712_v0  ;;  %v741_v4 = vpop.f32.mrb[5].mxu1  ;;  %v715_v5 = vpop.f32.mrb[6].mxu0 }
 0x128   :  { %v742_v6 = vadd.f32 %v741_v4, %v740_v1  ;;  %v743_v7 = vpop.f32.mrb[6].mxu1  ;;  %v716_v8 = vpop.f32.mrb[7].mxu0 }
 0x129   :  { %v717_v9 = vadd.f32 %v716_v8, %v715_v5  ;;  %v744_v10 = vpop.f32.mrb[7].mxu1 }
 0x12a   :  { %v745_v11 = vadd.f32 %v744_v10, %v743_v7  ;;  %v520_v12 = vadd.f32 %v742_v6, %v714_v3 }
 0x12c   :  { %v523_v13 = vadd.f32 %v745_v11, %v717_v9 }
 0x13d   :  { %v774_v14 = vpop.f32.mrb[8].mxu0 }
 0x13e   :  { %v569_v15 = vadd.f32 %v774_v14, %v520_v12  ;;  %v560_v16 = vpop.f32.mrb[9].mxu0 }
 0x13f   :  { %v561_v17 = vadd.f32 %v560_v16, %v512_v62  ;;  %v775_v18 = vpop.f32.mrb[10].mxu0 }
 0x140   :  { %577 = vst [vmem:[#allocation7 + $0x10] sm:$0xff] %v569_v15  ;;  %v572_v19 = vadd.f32 %v775_v18, %v523_v13  ;;  %v563_v20 = vpop.f32.mrb[11].mxu0 }
 0x141   :  { %575 = vst [vmem:[#allocation7] sm:$0xff] %v561_v17  ;;  %v564_v21 = vadd.f32 %v563_v20, %v515_v63  ;;  %v588_v22 = vmul.f32 %v561_v17, %v561_v17 }
 0x142   :  { %578 = vst [vmem:[#allocation7 + $0x18] sm:$0xff] %v572_v19 }
 0x143   :  { %576 = vst [vmem:[#allocation7 + $0x8] sm:$0xff] %v564_v21  ;;  %v579_v23 = vadd.f32 %v564_v21, %v561_v17  ;;  %v589_v24 = vmul.f32 %v564_v21, %v564_v21 }
 0x144   :  { %895 = shalt.err (!%p892_p6)
}
 0x145   :  { %s896_s16 = scalar_lea.hbm %s1016_s2, 512 }
 0x146   :  { %p897_p7 = scmp.ne.s32.totalorder %s1016_s2, %s896_s16  ;;  %p900_p8 = scmp.lt.u32.totalorder %s896_s16, %s1016_s2 }
 0x148   :  { %p902_p9 = pnand %p900_p8, %p897_p7 }
 0x14a   :  { %905 = shalt.err (!%p902_p9)
}
 0x14b   :  { %s943_s21 = smov 128   ;;  %s944_s22 = smov 8   ;;  %v590_v25 = vmul.f32 %v569_v15, %v569_v15  ;;  %v580_v26 = vadd.f32 %v579_v23, %v569_v15  ;;  %v592_v27 = vadd.f32 %v589_v24, %v588_v22  ;;  %v591_v28 = vmul.f32 %v572_v19, %v572_v19 }
 0x14c   :  { %619 = dma.vmem_to_hbm [thread:$0]  %s614_s12, 512, %s1016_s2, [#allocation4], %s943_s21, %s943_s21, %s944_s22   ;;  %v601_v35 = vlaneseq }
 0x14d   :  { %v581_v29 = vadd.f32 %v580_v26, %v572_v19  ;;  %v593_v30 = vadd.f32 %v592_v27, %v590_v25  ;;  %s945_s2 = smov [#allocation8]  }
 0x14e   :  { %v602_v40 = vshrl.u32 %v601_v35, 7  ;;  %s626_s25 = sshll.u32 %s945_s2, 4  ;;  %s627_s25 = int_to_ptr.vmem [resolvable:$true] %s626_s25 }
 0x14f   :  { %v582_v31 = vrot.slane %v581_v29, 4  ;;  %v594_v32 = vadd.f32 %v593_v30, %v591_v28  ;;  %s906_s26 = scalar_lea.vmem %s627_s25, 128  ;;  %p911_p11 = scmp.lt.s32.totalorder %s627_s25, %s627_s25 }
 0x150   :  { %vm604_vm0 = vcmp.eq.s32.totalorder %v602_v40, 1  ;;  %vm603_vm1 = vcmp.eq.s32.totalorder %v602_v40, 0  ;;  %p907_p10 = scmp.ne.s32.totalorder %s627_s25, %s906_s26  ;;  %p912_p12 = scmp.lt.s32.totalorder %s906_s26, %s906_s26 }
 0x151   :  { %v583_v33 = vadd.f32 %v582_v31, %v581_v29  ;;  %v595_v34 = vrot.slane %v594_v32, 4 }
 0x152   :  { %p913_p13 = por %p912_p12, %p911_p11 }
 0x153   :  { %v584_v36 = vrot.slane %v583_v33, 2  ;;  %v596_v37 = vadd.f32 %v595_v34, %v594_v32 }
 0x154   :  { %p914_p0 = pnand %p913_p13, %p907_p10 }
 0x155   :  { %v585_v38 = vadd.f32 %v584_v36, %v583_v33  ;;  %v597_v39 = vrot.slane %v596_v37, 2 }
 0x157   :  { %v598_v41 = vadd.f32 %v597_v39, %v596_v37  ;;  %v586_v42 = vrot.slane %v585_v38, 1 }
 0x159   :  { %v599_v43 = vrot.slane %v598_v41, 1  ;;  %v587_v45 = vadd.f32 %v586_v42, %v585_v38 }
 0x15b   :  { %v600_v44 = vadd.f32 %v599_v43, %v598_v41 }
 0x15d   :  { %v605_v46 = vsel %vm604_vm0, %v600_v44, 0.0 }
 0x15e   :  { %v606_v47 = vsel %vm603_vm1, %v587_v45, %v605_v46 }
 0x15f   :  { %607 = vst [vmem:[#allocation8] sm:$0xff] %v606_v47 }
 0x160   :  { %917 = shalt.err (!%p914_p0)
}
 0x161   :  { %s918_s29 = scalar_lea.hbm %s1017_s3, 128 }
 0x162   :  { %p919_p1 = scmp.ne.s32.totalorder %s1017_s3, %s918_s29  ;;  %p922_p2 = scmp.lt.u32.totalorder %s918_s29, %s1017_s3 }
 0x164   :  { %p924_p3 = pnand %p922_p2, %p919_p1 }
 0x166   :  { %927 = shalt.err (!%p924_p3)
}
 0x167   :  { %629 = dma.vmem_to_hbm [thread:$0]  %s627_s25, 128, %s1017_s3, [#allocation9]  }
 0x168   :  { %932 = dma.done.wait [#allocation4], 512  }
 0x169   :  { %933 = vsyncadd [#allocation4], 4294966784 }
 0x16a   :  { %934 = dma.done.wait [#allocation9], 128  }
 0x16b   :  { %935 = vsyncadd [#allocation9], 4294967168 }
 0x16c   :  { %636 = vsyncpa [#allocation3], 1 }
 0x16d   :  { %637 = vsyncpa [#allocation6], 1 }
 0x16e   :  { %638 = vsyncpa [#allocation4], 1 }
 0x16f   :  { %639 = vsyncpa [#allocation9], 1 }

// kernel: generator_forward.12
= control target key start
LH: loop header
LB: loop body
LE: loop exit
PB: predicated region body
PF: predicated region fallthrough
CT: control target
= control target key end

     0   :  { %8 = vsyncpa [#allocation3], 0  ;;  %s131_s12 = smov [#allocation2]   ;;  %s178_s0 = inlined_call_operand.hbm [shape: f32[32,128], index: 0, kind: input, shape index: {}]   ;;  %s179_s1 = inlined_call_operand.vmem [shape: f32[1,128], index: 1, kind: input, shape index: {}]   ;;  %s180_s2 = inlined_call_operand.vmem [shape: f32[1,128], index: 2, kind: input, shape index: {}]   ;;  %s181_s3 = inlined_call_operand.vmem [shape: bf16[32,128], index: 3, kind: output, shape index: {}]  }
   0x1   :  { %s14_s13 = sshll.u32 %s131_s12, 4  ;;  %s107_s16 = scalar_lea.hbm %s178_s0, 512  ;;  %s15_s13 = int_to_ptr.vmem [resolvable:$true] %s14_s13 }
   0x2   :  { %p108_p0 = scmp.ne.s32.totalorder %s178_s0, %s107_s16  ;;  %p111_p1 = scmp.lt.u32.totalorder %s107_s16, %s178_s0 }
   0x4   :  { %p113_p2 = pnand %p111_p1, %p108_p0 }
   0x6   :  { %116 = shalt.err (!%p113_p2)
}
   0x7   :  { %s117_s21 = scalar_lea.vmem %s15_s13, 512  ;;  %p122_p4 = scmp.lt.s32.totalorder %s15_s13, %s15_s13 }
   0x8   :  { %p118_p3 = scmp.ne.s32.totalorder %s15_s13, %s117_s21  ;;  %p123_p5 = scmp.lt.s32.totalorder %s117_s21, %s117_s21 }
   0xa   :  { %p124_p6 = por %p123_p5, %p122_p4 }
   0xc   :  { %p125_p7 = pnand %p124_p6, %p118_p3 }
   0xe   :  { %128 = shalt.err (!%p125_p7)
}
   0xf   :  { %s132_s22 = smov 128   ;;  %s133_s23 = smov 8  }
  0x10   :  { %20 = dma.hbm_to_vmem [thread:$0]  %s178_s0, 512, %s15_s13, [#allocation3], %s132_s22, %s132_s22, %s133_s23  }
  0x11   :  { %129 = dma.done.wait [#allocation3], 512  }
  0x12   :  { %130 = vsyncadd [#allocation3], 4294966784  ;;  %v28_v0 = vld [vmem:[#allocation2] sm:$0xff]  ;;  %v29_v1 = vld [vmem:[#allocation2 + $0x8] sm:$0xff] }
  0x13   :  { %v83_v2 = vld [vmem:[%s179_s1] ss:$0 sm:$0xff]  ;;  %v30_v6 = vld [vmem:[#allocation2 + $0x10] sm:$0xff]  ;;  %v31_v7 = vld [vmem:[#allocation2 + $0x18] sm:$0xff] }
  0x14   :  { %v39_v3 = vmul.f32 %v83_v2, %v28_v0  ;;  %v40_v4 = vmul.f32 %v83_v2, %v29_v1  ;;  %v84_v5 = vld [vmem:[%s180_s2] ss:$0 sm:$0xff]  ;;  %v41_v8 = vmul.f32 %v83_v2, %v30_v6  ;;  %v42_v9 = vmul.f32 %v83_v2, %v31_v7 }
  0x16   :  { %v50_v10 = vadd.f32 %v84_v5, %v39_v3  ;;  %v51_v11 = vadd.f32 %v84_v5, %v40_v4  ;;  %v52_v12 = vadd.f32 %v84_v5, %v41_v8  ;;  %v53_v13 = vadd.f32 %v84_v5, %v42_v9 }
  0x18   :  { %v54_v14 = vmax.f32 %v50_v10, 0.0  ;;  %v55_v15 = vmax.f32 %v51_v11, 0.0  ;;  %v56_v16 = vmax.f32 %v52_v12, 0.0  ;;  %v57_v17 = vmax.f32 %v53_v13, 0.0 }
  0x1a   :  { %v96_v18 = vpack.c.bf16 %v55_v15, %v54_v14  ;;  %v101_v19 = vpack.c.bf16 %v57_v17, %v56_v16 }
  0x1c   :  { %97 = vst [vmem:[%s181_s3] sm:$0xff] %v96_v18   ;;  %103 = vst [vmem:[%s181_s3 + $0x8] sm:$0xff] %v101_v19  }
  0x1d   :  { %82 = vsyncpa [#allocation3], 1 }

// kernel: generator_forward.13
= control target key start
LH: loop header
LB: loop body
LE: loop exit
PB: predicated region body
PF: predicated region fallthrough
CT: control target
= control target key end

     0   :  { %9 = vsyncpa [#allocation3], 0  ;;  %s1109_s0 = inlined_call_operand.hbm [shape: bf16[128,384], index: 0, kind: input, shape index: {}]   ;;  %s1110_s1 = inlined_call_operand.hbm [shape: bf16[384,128], index: 1, kind: input, shape index: {}]   ;;  %s1111_s2 = inlined_call_operand.hbm [shape: f32[128,128], index: 2, kind: output, shape index: {0}]   ;;  %s1112_s3 = inlined_call_operand.hbm [shape: f32[8,128], index: 3, kind: output, shape index: {1}]  }
   0x1   :  { %10 = vsyncpa [#allocation6], 0 }
   0x2   :  { %11 = vsyncpa [#allocation4], 0 }
   0x3   :  { %12 = vsyncpa [#allocation9], 0  ;;  %s1025_s12 = smov [#allocation2]   ;;  %s929_s16 = scalar_lea.hbm %s1109_s0, 3072 }
   0x4   :  { %s18_s13 = sshll.u32 %s1025_s12, 4  ;;  %p930_p0 = scmp.ne.s32.totalorder %s1109_s0, %s929_s16  ;;  %s19_s13 = int_to_ptr.vmem [resolvable:$true] %s18_s13 }
   0x5   :  { %p933_p1 = scmp.lt.u32.totalorder %s929_s16, %s1109_s0 }
   0x7   :  { %p935_p2 = pnand %p933_p1, %p930_p0 }
   0x9   :  { %938 = shalt.err (!%p935_p2)
}
   0xa   :  { %s939_s21 = scalar_lea.vmem %s19_s13, 3072  ;;  %p944_p4 = scmp.lt.s32.totalorder %s19_s13, %s19_s13 }
   0xb   :  { %p940_p3 = scmp.ne.s32.totalorder %s19_s13, %s939_s21  ;;  %p945_p5 = scmp.lt.s32.totalorder %s939_s21, %s939_s21 }
   0xd   :  { %p946_p6 = por %p945_p5, %p944_p4 }
   0xf   :  { %p947_p7 = pnand %p946_p6, %p940_p3 }
  0x11   :  { %950 = shalt.err (!%p947_p7)
}
  0x12   :  { %s1026_s22 = smov 192   ;;  %s1027_s23 = smov 12  }
  0x13   :  { %24 = dma.hbm_to_vmem [thread:$0]  %s1109_s0, 3072, %s19_s13, [#allocation3], %s1026_s22, %s1026_s22, %s1027_s23  }
  0x14   :  { %s1028_s26 = smov [#allocation5]   ;;  %s951_s30 = scalar_lea.hbm %s1110_s1, 3072 }
  0x15   :  { %s30_s27 = sshll.u32 %s1028_s26, 4  ;;  %p952_p8 = scmp.ne.s32.totalorder %s1110_s1, %s951_s30  ;;  %s31_s27 = int_to_ptr.vmem [resolvable:$true] %s30_s27 }
  0x16   :  { %p955_p9 = scmp.lt.u32.totalorder %s951_s30, %s1110_s1 }
  0x18   :  { %p957_p10 = pnand %p955_p9, %p952_p8 }
  0x1a   :  { %960 = shalt.err (!%p957_p10)
}
  0x1b   :  { %s961_s8 = scalar_lea.vmem %s31_s27, 3072  ;;  %p966_p12 = scmp.lt.s32.totalorder %s31_s27, %s31_s27 }
  0x1c   :  { %p962_p11 = scmp.ne.s32.totalorder %s31_s27, %s961_s8  ;;  %p967_p13 = scmp.lt.s32.totalorder %s961_s8, %s961_s8 }
  0x1e   :  { %p968_p0 = por %p967_p13, %p966_p12 }
  0x20   :  { %p969_p1 = pnand %p968_p0, %p962_p11 }
  0x22   :  { %972 = shalt.err (!%p969_p1)
}
  0x23   :  { %s1029_s0 = smov 64   ;;  %s1030_s9 = smov 4  }
  0x24   :  { %36 = dma.hbm_to_vmem [thread:$0]  %s1110_s1, 3072, %s31_s27, [#allocation6], %s1029_s0, %s1029_s0, %s1030_s9  }
  0x25   :  { %1017 = dma.done.wait [#allocation3], 3072  }
  0x26   :  { %1018 = vsyncadd [#allocation3], 4294964224 }
  0x27   :  { %1019 = dma.done.wait [#allocation6], 3072  }
  0x28   :  { %1020 = vsyncadd [#allocation6], 4294964224  ;;  %v873_v0 = vld [vmem:[#allocation5 + $0x40] sm:$0xff]   ;;  %v876_v3 = vld [vmem:[#allocation5 + $0x48] sm:$0xff]   ;;  %s1031_s1 = smov [#allocation7]  }
  0x29   :  { %v874_v1 = vld [vmem:[#allocation5] sm:$0xff]   ;;  %751 = vmatprep.subr.bf16.mxu0 %v873_v0  ;;  %v877_v4 = vld [vmem:[#allocation5 + $0x8] sm:$0xff]   ;;  %v879_v6 = vld [vmem:[#allocation5 + $0x50] sm:$0xff]   ;;  %s676_s12 = sshll.u32 %s1031_s1, 4  ;;  %s677_s12 = int_to_ptr.vmem [resolvable:$true] %s676_s12 }
  0x2a   :  { %v875_v2 = vld [vmem:[#allocation5 + $0x80] sm:$0xff]   ;;  %752 = vmatpush3.bf16.msra.mxu0 %v874_v1  ;;  %v878_v5 = vld [vmem:[#allocation5 + $0x88] sm:$0xff]   ;;  %v880_v7 = vld [vmem:[#allocation5 + $0x10] sm:$0xff]   ;;  %s973_s13 = scalar_lea.vmem %s677_s12, 2048  ;;  %p978_p3 = scmp.lt.s32.totalorder %s677_s12, %s677_s12 }
  0x2b   :  { %831 = vmatprep.subr.bf16.mxu1 %v875_v2  ;;  %753 = vmatprep.subr.bf16.mxu0 %v876_v3  ;;  %v881_v8 = vld [vmem:[#allocation5 + $0x90] sm:$0xff]   ;;  %v882_v9 = vld [vmem:[#allocation5 + $0x58] sm:$0xff]   ;;  %v885_v12 = vld [vmem:[#allocation5 + $0x60] sm:$0xff]   ;;  %p974_p2 = scmp.ne.s32.totalorder %s677_s12, %s973_s13  ;;  %p979_p4 = scmp.lt.s32.totalorder %s973_s13, %s973_s13 }
  0x2c   :  { %832 = vmatpush3.bf16.msra.mxu1 %v875_v2  ;;  %v883_v10 = vld [vmem:[#allocation5 + $0x18] sm:$0xff]   ;;  %v887_v13 = vld [vmem:[#allocation5 + $0xa0] sm:$0xff]   ;;  %v888_v15 = vld [vmem:[#allocation5 + $0x68] sm:$0xff]  }
  0x2d   :  { %833 = vmatprep.subr.bf16.mxu1 %v878_v5  ;;  %v884_v11 = vld [vmem:[#allocation5 + $0x98] sm:$0xff]   ;;  %v886_v14 = vld [vmem:[#allocation5 + $0x20] sm:$0xff]   ;;  %v890_v16 = vld [vmem:[#allocation5 + $0xa8] sm:$0xff]   ;;  %p980_p5 = por %p979_p4, %p978_p3 }
  0x2e   :  { %754 = vmatpush3.bf16.msra.mxu0 %v877_v4  ;;  %v889_v17 = vld [vmem:[#allocation5 + $0x28] sm:$0xff]   ;;  %v891_v18 = vld [vmem:[#allocation5 + $0x70] sm:$0xff]   ;;  %v894_v21 = vld [vmem:[#allocation5 + $0x78] sm:$0xff]  }
  0x2f   :  { %755 = vmatprep.subr.bf16.mxu0 %v879_v6  ;;  %v892_v19 = vld [vmem:[#allocation5 + $0x30] sm:$0xff]   ;;  %v896_v22 = vld [vmem:[#allocation5 + $0xb8] sm:$0xff]   ;;  %v897_v26 = vld [vmem:[#allocation2] ss:$12 sps:$4 sm:$0xff]   ;;  %p981_p6 = pnand %p980_p5, %p974_p2 }
  0x30   :  { %834 = vmatpush3.bf16.msra.mxu1 %v878_v5  ;;  %v893_v20 = vld [vmem:[#allocation5 + $0xb0] sm:$0xff]   ;;  %v895_v25 = vld [vmem:[#allocation5 + $0x38] sm:$0xff]   ;;  %v901_v28 = vld [vmem:[#allocation2 + $0x20] ss:$12 sps:$4 sm:$0xff]  }
  0x31   :  { %835 = vmatprep.subr.bf16.mxu1 %v881_v8  ;;  %v899_v23 = vld [vmem:[#allocation2 + $0x4] ss:$12 sps:$4 sm:$0xff]   ;;  %v900_v24 = vld [vmem:[#allocation2 + $0x8] ss:$12 sps:$4 sm:$0xff]   ;;  %v910_v35 = vld [vmem:[#allocation2 + $0x4c] ss:$12 sps:$4 sm:$0xff]  }
  0x32   :  { %756 = vmatpush3.bf16.msra.mxu0 %v880_v7  ;;  %428 = vmatprep.mubr.bf16.mxu0 %v899_v23  ;;  %v902_v27 = vld [vmem:[#allocation2 + $0x1c] ss:$12 sps:$4 sm:$0xff]   ;;  %v908_v29 = vld [vmem:[#allocation2 + $0x38] ss:$12 sps:$4 sm:$0xff]   ;;  %v905_v31 = vld [vmem:[#allocation2 + $0x34] ss:$12 sps:$4 sm:$0xff]  }
  0x33   :  { %757 = vmatprep.subr.bf16.mxu0 %v882_v9  ;;  %847 = vmatprep.mubr.bf16.mxu1 %v900_v24  ;;  %v904_v30 = vld [vmem:[#allocation2 + $0x18] ss:$12 sps:$4 sm:$0xff]   ;;  %v909_v32 = vld [vmem:[#allocation2 + $0x50] ss:$12 sps:$4 sm:$0xff]   ;;  %v916_v33 = vld [vmem:[#allocation2 + $0x68] ss:$12 sps:$4 sm:$0xff]  }
  0x34   :  { %836 = vmatpush3.bf16.msra.mxu1 %v881_v8  ;;  %v907_v34 = vld [vmem:[#allocation2 + $0x30] ss:$12 sps:$4 sm:$0xff]   ;;  %v917_v36 = vld [vmem:[#allocation2 + $0x80] ss:$12 sps:$4 sm:$0xff]   ;;  %v924_v37 = vld [vmem:[#allocation2 + $0x98] ss:$12 sps:$4 sm:$0xff]  }
  0x35   :  { %837 = vmatprep.subr.bf16.mxu1 %v884_v11  ;;  %v912_v38 = vld [vmem:[#allocation2 + $0x48] ss:$12 sps:$4 sm:$0xff]   ;;  %v913_v39 = vld [vmem:[#allocation2 + $0x64] ss:$12 sps:$4 sm:$0xff]   ;;  %v915_v41 = vld [vmem:[#allocation2 + $0x60] ss:$12 sps:$4 sm:$0xff]  }
  0x36   :  { %758 = vmatpush3.bf16.msra.mxu0 %v883_v10  ;;  %v925_v40 = vld [vmem:[#allocation2 + $0xb0] ss:$12 sps:$4 sm:$0xff]   ;;  %v920_v43 = vld [vmem:[#allocation2 + $0x78] ss:$12 sps:$4 sm:$0xff]   ;;  %v921_v44 = vld [vmem:[#allocation2 + $0x94] ss:$12 sps:$4 sm:$0xff]  }
  0x37   :  { %759 = vmatprep.subr.bf16.mxu0 %v885_v12  ;;  %v918_v42 = vld [vmem:[#allocation2 + $0x7c] ss:$12 sps:$4 sm:$0xff]   ;;  %v926_v46 = vld [vmem:[#allocation2 + $0xac] ss:$12 sps:$4 sm:$0xff]  }
  0x38   :  { %838 = vmatpush3.bf16.msra.mxu1 %v884_v11  ;;  %v923_v45 = vld [vmem:[#allocation2 + $0x90] ss:$12 sps:$4 sm:$0xff]   ;;  %v928_v47 = vld [vmem:[#allocation2 + $0xa8] ss:$12 sps:$4 sm:$0xff]  }
  0x39   :  { %839 = vmatprep.subr.bf16.mxu1 %v887_v13 }
  0x3a   :  { %760 = vmatpush3.bf16.msra.mxu0 %v886_v14 }
  0x3b   :  { %761 = vmatprep.subr.bf16.mxu0 %v888_v15 }
  0x3c   :  { %840 = vmatpush3.bf16.msra.mxu1 %v887_v13 }
  0x3d   :  { %841 = vmatprep.subr.bf16.mxu1 %v890_v16 }
  0x3e   :  { %762 = vmatpush3.bf16.msra.mxu0 %v889_v17 }
  0x3f   :  { %763 = vmatprep.subr.bf16.mxu0 %v891_v18 }
  0x40   :  { %842 = vmatpush3.bf16.msra.mxu1 %v890_v16 }
  0x41   :  { %843 = vmatprep.subr.bf16.mxu1 %v893_v20 }
  0x42   :  { %764 = vmatpush3.bf16.msra.mxu0 %v892_v19 }
  0x43   :  { %765 = vmatprep.subr.bf16.mxu0 %v894_v21 }
  0x44   :  { %844 = vmatpush3.bf16.msra.mxu1 %v893_v20 }
  0x45   :  { %845 = vmatprep.subr.bf16.mxu1 %v896_v22 }
  0x46   :  { %766 = vmatpush3.bf16.msra.mxu0 %v895_v25 }
  0x48   :  { %846 = vmatpush3.bf16.msra.mxu1 %v896_v22 }
  0x49   :  { %429 = vmatmul.mubr.bf16.vlgmr.msra.gmra.mrb[0].mxu0 %v897_v26 }
  0x4a   :  { %436 = vmatprep.mubr.bf16.mxu0 %v902_v27 }
  0x4b   :  { %848 = vmatmul.mubr.bf16.vlgmr.msra.gmra.mrb[0].mxu1 %v901_v28 }
  0x4c   :  { %851 = vmatprep.mubr.bf16.mxu1 %v908_v29 }
  0x51   :  { %437 = vmatmul.mubr.bf16.gmra.mrb[4].mxu0 %v904_v30 }
  0x52   :  { %444 = vmatprep.mubr.bf16.mxu0 %v905_v31 }
  0x53   :  { %852 = vmatmul.mubr.bf16.gmra.mrb[4].mxu1 %v909_v32 }
  0x54   :  { %855 = vmatprep.mubr.bf16.mxu1 %v916_v33 }
  0x59   :  { %445 = vmatmul.mubr.bf16.gmra.mrb[8].mxu0 %v907_v34 }
  0x5a   :  { %452 = vmatprep.mubr.bf16.mxu0 %v910_v35 }
  0x5b   :  { %856 = vmatmul.mubr.bf16.gmra.mrb[8].mxu1 %v917_v36 }
  0x5c   :  { %859 = vmatprep.mubr.bf16.mxu1 %v924_v37 }
  0x61   :  { %453 = vmatmul.mubr.bf16.gmra.mrb[12].mxu0 %v912_v38 }
  0x62   :  { %460 = vmatprep.mubr.bf16.mxu0 %v913_v39 }
  0x63   :  { %860 = vmatmul.mubr.bf16.gmra.mrb[12].mxu1 %v925_v40 }
  0x69   :  { %461 = vmatmul.mubr.bf16.gmra.mrb[16].mxu0 %v915_v41 }
  0x6a   :  { %468 = vmatprep.mubr.bf16.mxu0 %v918_v42 }
  0x71   :  { %469 = vmatmul.mubr.bf16.gmra.mrb[20].mxu0 %v920_v43 }
  0x72   :  { %476 = vmatprep.mubr.bf16.mxu0 %v921_v44 }
  0x79   :  { %477 = vmatmul.mubr.bf16.gmra.mrb[24].mxu0 %v923_v45 }
  0x7a   :  { %484 = vmatprep.mubr.bf16.mxu0 %v926_v46 }
  0x81   :  { %485 = vmatmul.mubr.bf16.gmra.mrb[28].mxu0 %v928_v47 }
 0x11c   :  { %v767_v48 = vpop.f32.mrb[0].mxu0 }
 0x11d   :  { %v768_v49 = vpop.f32.mrb[1].mxu0 }
 0x11e   :  { %v769_v50 = vadd.f32 %v768_v49, %v767_v48  ;;  %v770_v51 = vpop.f32.mrb[2].mxu0  ;;  %v849_v52 = vpop.f32.mrb[0].mxu1 }
 0x11f   :  { %v771_v53 = vpop.f32.mrb[3].mxu0  ;;  %v527_v54 = vpop.f32.mrb[1].mxu1 }
 0x120   :  { %v772_v55 = vadd.f32 %v771_v53, %v770_v51  ;;  %v528_v56 = vadd.f32 %v769_v50, %v527_v54  ;;  %v850_v57 = vpop.f32.mrb[2].mxu1 }
 0x121   :  { %v530_v58 = vpop.f32.mrb[3].mxu1 }
 0x122   :  { %590 = vst [vmem:[#allocation7] sm:$0xff] %v528_v56  ;;  %v531_v59 = vadd.f32 %v772_v55, %v530_v58  ;;  %v627_v60 = vmul.f32 %v528_v56, %v528_v56 }
 0x124   :  { %591 = vst [vmem:[#allocation7 + $0x8] sm:$0xff] %v531_v59  ;;  %v606_v61 = vadd.f32 %v531_v59, %v528_v56  ;;  %v628_v62 = vmul.f32 %v531_v59, %v531_v59  ;;  %v773_v63 = vpop.f32.mrb[4].mxu0 }
 0x125   :  { %v774_v0 = vpop.f32.mrb[5].mxu0 }
 0x126   :  { %v643_v1 = vadd.f32 %v628_v62, %v627_v60  ;;  %v775_v2 = vadd.f32 %v774_v0, %v773_v63  ;;  %v776_v3 = vpop.f32.mrb[6].mxu0  ;;  %v853_v4 = vpop.f32.mrb[4].mxu1 }
 0x127   :  { %v777_v5 = vpop.f32.mrb[7].mxu0  ;;  %v543_v6 = vpop.f32.mrb[5].mxu1 }
 0x128   :  { %v536_v7 = vadd.f32 %v849_v52, %v775_v2  ;;  %v778_v8 = vadd.f32 %v777_v5, %v776_v3  ;;  %v854_v9 = vpop.f32.mrb[6].mxu1 }
 0x129   :  { %v546_v10 = vpop.f32.mrb[7].mxu1 }
 0x12a   :  { %592 = vst [vmem:[#allocation7 + $0x10] sm:$0xff] %v536_v7  ;;  %v607_v11 = vadd.f32 %v606_v61, %v536_v7  ;;  %v629_v12 = vmul.f32 %v536_v7, %v536_v7  ;;  %v539_v13 = vadd.f32 %v850_v57, %v778_v8 }
 0x12c   :  { %v644_v14 = vadd.f32 %v643_v1, %v629_v12  ;;  %593 = vst [vmem:[#allocation7 + $0x18] sm:$0xff] %v539_v13  ;;  %v630_v15 = vmul.f32 %v539_v13, %v539_v13  ;;  %v779_v16 = vpop.f32.mrb[8].mxu0  ;;  %v608_v17 = vadd.f32 %v607_v11, %v539_v13 }
 0x12d   :  { %v780_v18 = vpop.f32.mrb[9].mxu0 }
 0x12e   :  { %v781_v19 = vadd.f32 %v780_v18, %v779_v16  ;;  %v782_v20 = vpop.f32.mrb[10].mxu0  ;;  %v645_v21 = vadd.f32 %v644_v14, %v630_v15  ;;  %v857_v22 = vpop.f32.mrb[8].mxu1 }
 0x12f   :  { %v783_v23 = vpop.f32.mrb[11].mxu0  ;;  %v559_v24 = vpop.f32.mrb[9].mxu1 }
 0x130   :  { %v784_v25 = vadd.f32 %v783_v23, %v782_v20  ;;  %v544_v26 = vadd.f32 %v781_v19, %v543_v6  ;;  %v858_v27 = vpop.f32.mrb[10].mxu1 }
 0x131   :  { %v562_v28 = vpop.f32.mrb[11].mxu1 }
 0x132   :  { %594 = vst [vmem:[#allocation7 + $0x20] sm:$0xff] %v544_v26  ;;  %v609_v29 = vadd.f32 %v608_v17, %v544_v26  ;;  %v631_v30 = vmul.f32 %v544_v26, %v544_v26  ;;  %v547_v31 = vadd.f32 %v784_v25, %v546_v10 }
 0x134   :  { %v646_v32 = vadd.f32 %v645_v21, %v631_v30  ;;  %595 = vst [vmem:[#allocation7 + $0x28] sm:$0xff] %v547_v31  ;;  %v610_v33 = vadd.f32 %v609_v29, %v547_v31  ;;  %v632_v34 = vmul.f32 %v547_v31, %v547_v31  ;;  %v785_v35 = vpop.f32.mrb[12].mxu0 }
 0x135   :  { %v786_v36 = vpop.f32.mrb[13].mxu0 }
 0x136   :  { %v647_v37 = vadd.f32 %v646_v32, %v632_v34  ;;  %v787_v38 = vadd.f32 %v786_v36, %v785_v35  ;;  %v788_v39 = vpop.f32.mrb[14].mxu0  ;;  %v1079_v40 = vpop.f32.mrb[12].mxu1 }
 0x137   :  { %v789_v41 = vpop.f32.mrb[15].mxu0  ;;  %v575_v42 = vpop.f32.mrb[13].mxu1 }
 0x138   :  { %v552_v43 = vadd.f32 %v853_v4, %v787_v38  ;;  %v790_v44 = vadd.f32 %v789_v41, %v788_v39  ;;  %v1081_v45 = vpop.f32.mrb[14].mxu1 }
 0x139   :  { %v578_v46 = vpop.f32.mrb[15].mxu1 }
 0x13a   :  { %596 = vst [vmem:[#allocation7 + $0x30] sm:$0xff] %v552_v43  ;;  %v611_v47 = vadd.f32 %v610_v33, %v552_v43  ;;  %v633_v48 = vmul.f32 %v552_v43, %v552_v43  ;;  %v555_v49 = vadd.f32 %v854_v9, %v790_v44 }
 0x13c   :  { %v648_v50 = vadd.f32 %v647_v37, %v633_v48  ;;  %597 = vst [vmem:[#allocation7 + $0x38] sm:$0xff] %v555_v49  ;;  %v634_v51 = vmul.f32 %v555_v49, %v555_v49  ;;  %v791_v52 = vpop.f32.mrb[16].mxu0  ;;  %v612_v53 = vadd.f32 %v611_v47, %v555_v49 }
 0x13d   :  { %v792_v54 = vpop.f32.mrb[17].mxu0 }
 0x13e   :  { %v793_v55 = vadd.f32 %v792_v54, %v791_v52  ;;  %v794_v56 = vpop.f32.mrb[18].mxu0  ;;  %v649_v57 = vadd.f32 %v648_v50, %v634_v51 }
 0x13f   :  { %v795_v58 = vpop.f32.mrb[19].mxu0 }
 0x140   :  { %v796_v59 = vadd.f32 %v795_v58, %v794_v56  ;;  %v560_v60 = vadd.f32 %v793_v55, %v559_v24 }
 0x142   :  { %598 = vst [vmem:[#allocation7 + $0x40] sm:$0xff] %v560_v60  ;;  %v613_v61 = vadd.f32 %v612_v53, %v560_v60  ;;  %v635_v62 = vmul.f32 %v560_v60, %v560_v60  ;;  %v563_v63 = vadd.f32 %v796_v59, %v562_v28 }
 0x144   :  { %v650_v0 = vadd.f32 %v649_v57, %v635_v62  ;;  %599 = vst [vmem:[#allocation7 + $0x48] sm:$0xff] %v563_v63  ;;  %v614_v1 = vadd.f32 %v613_v61, %v563_v63  ;;  %v636_v2 = vmul.f32 %v563_v63, %v563_v63  ;;  %v797_v3 = vpop.f32.mrb[20].mxu0 }
 0x145   :  { %v798_v4 = vpop.f32.mrb[21].mxu0 }
 0x146   :  { %v651_v5 = vadd.f32 %v650_v0, %v636_v2  ;;  %v799_v6 = vadd.f32 %v798_v4, %v797_v3  ;;  %v800_v7 = vpop.f32.mrb[22].mxu0 }
 0x147   :  { %v801_v8 = vpop.f32.mrb[23].mxu0 }
 0x148   :  { %v568_v9 = vadd.f32 %v857_v22, %v799_v6  ;;  %v802_v10 = vadd.f32 %v801_v8, %v800_v7 }
 0x14a   :  { %600 = vst [vmem:[#allocation7 + $0x50] sm:$0xff] %v568_v9  ;;  %v615_v11 = vadd.f32 %v614_v1, %v568_v9  ;;  %v637_v12 = vmul.f32 %v568_v9, %v568_v9  ;;  %v571_v13 = vadd.f32 %v858_v27, %v802_v10 }
 0x14c   :  { %v652_v14 = vadd.f32 %v651_v5, %v637_v12  ;;  %601 = vst [vmem:[#allocation7 + $0x58] sm:$0xff] %v571_v13  ;;  %v638_v15 = vmul.f32 %v571_v13, %v571_v13  ;;  %v803_v16 = vpop.f32.mrb[24].mxu0  ;;  %v616_v17 = vadd.f32 %v615_v11, %v571_v13 }
 0x14d   :  { %v804_v18 = vpop.f32.mrb[25].mxu0 }
 0x14e   :  { %v805_v19 = vadd.f32 %v804_v18, %v803_v16  ;;  %v806_v20 = vpop.f32.mrb[26].mxu0  ;;  %v653_v21 = vadd.f32 %v652_v14, %v638_v15 }
 0x14f   :  { %v807_v23 = vpop.f32.mrb[27].mxu0 }
 0x150   :  { %v808_v24 = vadd.f32 %v807_v23, %v806_v20  ;;  %v576_v25 = vadd.f32 %v805_v19, %v575_v42 }
 0x152   :  { %602 = vst [vmem:[#allocation7 + $0x60] sm:$0xff] %v576_v25  ;;  %v617_v26 = vadd.f32 %v616_v17, %v576_v25  ;;  %v639_v22 = vmul.f32 %v576_v25, %v576_v25  ;;  %v579_v28 = vadd.f32 %v808_v24, %v578_v46 }
 0x154   :  { %v654_v29 = vadd.f32 %v653_v21, %v639_v22  ;;  %603 = vst [vmem:[#allocation7 + $0x68] sm:$0xff] %v579_v28  ;;  %v618_v30 = vadd.f32 %v617_v26, %v579_v28  ;;  %v640_v27 = vmul.f32 %v579_v28, %v579_v28  ;;  %v809_v31 = vpop.f32.mrb[28].mxu0 }
 0x155   :  { %v810_v32 = vpop.f32.mrb[29].mxu0 }
 0x156   :  { %v655_v33 = vadd.f32 %v654_v29, %v640_v27  ;;  %v811_v34 = vadd.f32 %v810_v32, %v809_v31  ;;  %v812_v35 = vpop.f32.mrb[30].mxu0 }
 0x157   :  { %v813_v36 = vpop.f32.mrb[31].mxu0 }
 0x158   :  { %v584_v37 = vadd.f32 %v1079_v40, %v811_v34  ;;  %v814_v38 = vadd.f32 %v813_v36, %v812_v35 }
 0x15a   :  { %604 = vst [vmem:[#allocation7 + $0x70] sm:$0xff] %v584_v37  ;;  %v619_v39 = vadd.f32 %v618_v30, %v584_v37  ;;  %v641_v41 = vmul.f32 %v584_v37, %v584_v37  ;;  %v587_v42 = vadd.f32 %v1081_v45, %v814_v38 }
 0x15c   :  { %v656_v43 = vadd.f32 %v655_v33, %v641_v41  ;;  %605 = vst [vmem:[#allocation7 + $0x78] sm:$0xff] %v587_v42  ;;  %v620_v44 = vadd.f32 %v619_v39, %v587_v42  ;;  %v642_v46 = vmul.f32 %v587_v42, %v587_v42 }
 0x15d   :  { %984 = shalt.err (!%p981_p6)
}
 0x15e   :  { %s985_s16 = scalar_lea.hbm %s1111_s2, 2048 }
 0x15f   :  { %p986_p7 = scmp.ne.s32.totalorder %s1111_s2, %s985_s16  ;;  %p989_p8 = scmp.lt.u32.totalorder %s985_s16, %s1111_s2 }
 0x161   :  { %p991_p9 = pnand %p989_p8, %p986_p7 }
 0x163   :  { %994 = shalt.err (!%p991_p9)
}
 0x164   :  { %s1032_s21 = smov 128   ;;  %s1033_s22 = smov 8   ;;  %v621_v40 = vrot.slane %v620_v44, 4  ;;  %v657_v45 = vadd.f32 %v656_v43, %v642_v46  ;;  %v664_v49 = vlaneseq }
 0x165   :  { %682 = dma.vmem_to_hbm [thread:$0]  %s677_s12, 2048, %s1111_s2, [#allocation4], %s1032_s21, %s1032_s21, %s1033_s22  }
 0x166   :  { %v622_v47 = vadd.f32 %v621_v40, %v620_v44  ;;  %v658_v48 = vrot.slane %v657_v45, 4  ;;  %v665_v54 = vshrl.u32 %v664_v49, 7  ;;  %s1034_s25 = smov [#allocation8]  }
 0x167   :  { %s689_s26 = sshll.u32 %s1034_s25, 4  ;;  %s690_s26 = int_to_ptr.vmem [resolvable:$true] %s689_s26 }
 0x168   :  { %v623_v50 = vrot.slane %v622_v47, 2  ;;  %v659_v51 = vadd.f32 %v658_v48, %v657_v45  ;;  %vm667_vm0 = vcmp.eq.s32.totalorder %v665_v54, 1  ;;  %vm666_vm1 = vcmp.eq.s32.totalorder %v665_v54, 0  ;;  %s995_s2 = scalar_lea.vmem %s690_s26, 128  ;;  %p1000_p11 = scmp.lt.s32.totalorder %s690_s26, %s690_s26 }
 0x169   :  { %p996_p10 = scmp.ne.s32.totalorder %s690_s26, %s995_s2  ;;  %p1001_p12 = scmp.lt.s32.totalorder %s995_s2, %s995_s2 }
 0x16a   :  { %v624_v52 = vadd.f32 %v623_v50, %v622_v47  ;;  %v660_v53 = vrot.slane %v659_v51, 2 }
 0x16b   :  { %p1002_p13 = por %p1001_p12, %p1000_p11 }
 0x16c   :  { %v661_v55 = vadd.f32 %v660_v53, %v659_v51  ;;  %v625_v56 = vrot.slane %v624_v52, 1 }
 0x16d   :  { %p1003_p0 = pnand %p1002_p13, %p996_p10 }
 0x16e   :  { %v662_v57 = vrot.slane %v661_v55, 1  ;;  %v626_v59 = vadd.f32 %v625_v56, %v624_v52 }
 0x170   :  { %v663_v58 = vadd.f32 %v662_v57, %v661_v55 }
 0x172   :  { %v668_v60 = vsel %vm667_vm0, %v663_v58, 0.0 }
 0x173   :  { %v669_v61 = vsel %vm666_vm1, %v626_v59, %v668_v60 }
 0x174   :  { %670 = vst [vmem:[#allocation8] sm:$0xff] %v669_v61 }
 0x175   :  { %1006 = shalt.err (!%p1003_p0)
}
 0x176   :  { %s1007_s29 = scalar_lea.hbm %s1112_s3, 128 }
 0x177   :  { %p1008_p1 = scmp.ne.s32.totalorder %s1112_s3, %s1007_s29  ;;  %p1011_p2 = scmp.lt.u32.totalorder %s1007_s29, %s1112_s3 }
 0x179   :  { %p1013_p3 = pnand %p1011_p2, %p1008_p1 }
 0x17b   :  { %1016 = shalt.err (!%p1013_p3)
}
 0x17c   :  { %692 = dma.vmem_to_hbm [thread:$0]  %s690_s26, 128, %s1112_s3, [#allocation9]  }
 0x17d   :  { %1021 = dma.done.wait [#allocation4], 2048  }
 0x17e   :  { %1022 = vsyncadd [#allocation4], 4294965248 }
 0x17f   :  { %1023 = dma.done.wait [#allocation9], 128  }
 0x180   :  { %1024 = vsyncadd [#allocation9], 4294967168 }
 0x181   :  { %699 = vsyncpa [#allocation3], 1 }
 0x182   :  { %700 = vsyncpa [#allocation6], 1 }
 0x183   :  { %701 = vsyncpa [#allocation4], 1 }
 0x184   :  { %702 = vsyncpa [#allocation9], 1 }

// kernel: generator_forward.14
= control target key start
LH: loop header
LB: loop body
LE: loop exit
PB: predicated region body
PF: predicated region fallthrough
CT: control target
= control target key end

     0   :  { %8 = vsyncpa [#allocation3], 0  ;;  %s299_s12 = smov [#allocation2]   ;;  %s400_s0 = inlined_call_operand.hbm [shape: f32[128,128], index: 0, kind: input, shape index: {}]   ;;  %s401_s1 = inlined_call_operand.vmem [shape: f32[1,128], index: 1, kind: input, shape index: {}]   ;;  %s402_s2 = inlined_call_operand.vmem [shape: f32[1,128], index: 2, kind: input, shape index: {}]   ;;  %s403_s3 = inlined_call_operand.vmem [shape: bf16[128,128], index: 3, kind: output, shape index: {}]  }
   0x1   :  { %s14_s13 = sshll.u32 %s299_s12, 4  ;;  %s275_s16 = scalar_lea.hbm %s400_s0, 2048  ;;  %s15_s13 = int_to_ptr.vmem [resolvable:$true] %s14_s13 }
   0x2   :  { %p276_p0 = scmp.ne.s32.totalorder %s400_s0, %s275_s16  ;;  %p279_p1 = scmp.lt.u32.totalorder %s275_s16, %s400_s0 }
   0x4   :  { %p281_p2 = pnand %p279_p1, %p276_p0 }
   0x6   :  { %284 = shalt.err (!%p281_p2)
}
   0x7   :  { %s285_s21 = scalar_lea.vmem %s15_s13, 2048  ;;  %p290_p4 = scmp.lt.s32.totalorder %s15_s13, %s15_s13 }
   0x8   :  { %p286_p3 = scmp.ne.s32.totalorder %s15_s13, %s285_s21  ;;  %p291_p5 = scmp.lt.s32.totalorder %s285_s21, %s285_s21 }
   0xa   :  { %p292_p6 = por %p291_p5, %p290_p4 }
   0xc   :  { %p293_p7 = pnand %p292_p6, %p286_p3 }
   0xe   :  { %296 = shalt.err (!%p293_p7)
}
   0xf   :  { %s300_s22 = smov 128   ;;  %s301_s23 = smov 8  }
  0x10   :  { %20 = dma.hbm_to_vmem [thread:$0]  %s400_s0, 2048, %s15_s13, [#allocation3], %s300_s22, %s300_s22, %s301_s23  }
  0x11   :  { %297 = dma.done.wait [#allocation3], 2048  }
  0x12   :  { %298 = vsyncadd [#allocation3], 4294965248  ;;  %v28_v0 = vld [vmem:[#allocation2] sm:$0xff]  ;;  %v29_v1 = vld [vmem:[#allocation2 + $0x8] sm:$0xff] }
  0x13   :  { %v337_v2 = vld [vmem:[%s401_s1] ss:$0 sm:$0xff]  ;;  %v30_v6 = vld [vmem:[#allocation2 + $0x10] sm:$0xff]  ;;  %v31_v7 = vld [vmem:[#allocation2 + $0x18] sm:$0xff] }
  0x14   :  { %v51_v3 = vmul.f32 %v337_v2, %v28_v0  ;;  %v52_v4 = vmul.f32 %v337_v2, %v29_v1  ;;  %v344_v5 = vld [vmem:[%s402_s2] ss:$0 sm:$0xff]  ;;  %v53_v8 = vmul.f32 %v337_v2, %v30_v6  ;;  %v54_v9 = vmul.f32 %v337_v2, %v31_v7  ;;  %v33_v11 = vld [vmem:[#allocation2 + $0x28] sm:$0xff]  ;;  %v34_v12 = vld [vmem:[#allocation2 + $0x30] sm:$0xff] }
  0x15   :  { %v32_v10 = vld [vmem:[#allocation2 + $0x20] sm:$0xff]  ;;  %v56_v16 = vmul.f32 %v337_v2, %v33_v11  ;;  %v35_v17 = vld [vmem:[#allocation2 + $0x38] sm:$0xff]  ;;  %v57_v20 = vmul.f32 %v337_v2, %v34_v12  ;;  %v37_v27 = vld [vmem:[#allocation2 + $0x48] sm:$0xff] }
  0x16   :  { %v74_v13 = vadd.f32 %v344_v5, %v51_v3  ;;  %v75_v14 = vadd.f32 %v344_v5, %v52_v4  ;;  %v55_v15 = vmul.f32 %v337_v2, %v32_v10  ;;  %v76_v18 = vadd.f32 %v344_v5, %v53_v8  ;;  %v36_v22 = vld [vmem:[#allocation2 + $0x40] sm:$0xff]  ;;  %v38_v32 = vld [vmem:[#allocation2 + $0x50] sm:$0xff]  ;;  %v39_v33 = vld [vmem:[#allocation2 + $0x58] sm:$0xff] }
  0x17   :  { %v77_v19 = vadd.f32 %v344_v5, %v54_v9  ;;  %v58_v21 = vmul.f32 %v337_v2, %v35_v17  ;;  %v79_v26 = vadd.f32 %v344_v5, %v56_v16  ;;  %v80_v30 = vadd.f32 %v344_v5, %v57_v20  ;;  %v40_v38 = vld [vmem:[#allocation2 + $0x60] sm:$0xff]  ;;  %v41_v39 = vld [vmem:[#allocation2 + $0x68] sm:$0xff]  ;;  %v42_v44 = vld [vmem:[#allocation2 + $0x70] sm:$0xff] }
  0x18   :  { %v90_v23 = vmax.f32 %v74_v13, 0.0  ;;  %v91_v24 = vmax.f32 %v75_v14, 0.0  ;;  %v78_v25 = vadd.f32 %v344_v5, %v55_v15  ;;  %v92_v28 = vmax.f32 %v76_v18, 0.0  ;;  %v43_v49 = vld [vmem:[#allocation2 + $0x78] sm:$0xff] }
  0x19   :  { %v93_v29 = vmax.f32 %v77_v19, 0.0  ;;  %v81_v31 = vadd.f32 %v344_v5, %v58_v21  ;;  %v95_v36 = vmax.f32 %v79_v26, 0.0  ;;  %v59_v37 = vmul.f32 %v337_v2, %v36_v22 }
  0x1a   :  { %v228_v34 = vpack.c.bf16 %v91_v24, %v90_v23  ;;  %v94_v35 = vmax.f32 %v78_v25, 0.0  ;;  %v96_v41 = vmax.f32 %v80_v30, 0.0  ;;  %v60_v43 = vmul.f32 %v337_v2, %v37_v27 }
  0x1b   :  { %v233_v40 = vpack.c.bf16 %v93_v29, %v92_v28  ;;  %v97_v42 = vmax.f32 %v81_v31, 0.0  ;;  %v82_v46 = vadd.f32 %v344_v5, %v59_v37  ;;  %v61_v47 = vmul.f32 %v337_v2, %v38_v32 }
  0x1c   :  { %229 = vst [vmem:[%s403_s3] sm:$0xff] %v228_v34   ;;  %v238_v45 = vpack.c.bf16 %v95_v36, %v94_v35  ;;  %v62_v48 = vmul.f32 %v337_v2, %v39_v33  ;;  %v83_v51 = vadd.f32 %v344_v5, %v60_v43  ;;  %v63_v52 = vmul.f32 %v337_v2, %v40_v38 }
  0x1d   :  { %265 = vst [vmem:[%s403_s3 + $0x8] sm:$0xff] %v233_v40   ;;  %v243_v50 = vpack.c.bf16 %v97_v42, %v96_v41  ;;  %v64_v53 = vmul.f32 %v337_v2, %v41_v39  ;;  %v98_v54 = vmax.f32 %v82_v46, 0.0  ;;  %v84_v55 = vadd.f32 %v344_v5, %v61_v47 }
  0x1e   :  { %266 = vst [vmem:[%s403_s3 + $0x10] sm:$0xff] %v238_v45   ;;  %v85_v56 = vadd.f32 %v344_v5, %v62_v48  ;;  %v65_v57 = vmul.f32 %v337_v2, %v42_v44  ;;  %v99_v58 = vmax.f32 %v83_v51, 0.0  ;;  %v86_v59 = vadd.f32 %v344_v5, %v63_v52 }
  0x1f   :  { %267 = vst [vmem:[%s403_s3 + $0x18] sm:$0xff] %v243_v50   ;;  %v87_v60 = vadd.f32 %v344_v5, %v64_v53  ;;  %v66_v61 = vmul.f32 %v337_v2, %v43_v49  ;;  %v100_v62 = vmax.f32 %v84_v55, 0.0 }
  0x20   :  { %v101_v63 = vmax.f32 %v85_v56, 0.0  ;;  %v88_v0 = vadd.f32 %v344_v5, %v65_v57  ;;  %v248_v1 = vpack.c.bf16 %v99_v58, %v98_v54  ;;  %v102_v3 = vmax.f32 %v86_v59, 0.0 }
  0x21   :  { %v103_v4 = vmax.f32 %v87_v60, 0.0  ;;  %v89_v6 = vadd.f32 %v344_v5, %v66_v61 }
  0x22   :  { %v253_v7 = vpack.c.bf16 %v101_v63, %v100_v62  ;;  %v104_v8 = vmax.f32 %v88_v0, 0.0  ;;  %268 = vst [vmem:[%s403_s3 + $0x20] sm:$0xff] %v248_v1  }
  0x23   :  { %v258_v9 = vpack.c.bf16 %v103_v4, %v102_v3  ;;  %v105_v10 = vmax.f32 %v89_v6, 0.0 }
  0x24   :  { %269 = vst [vmem:[%s403_s3 + $0x28] sm:$0xff] %v253_v7  }
  0x25   :  { %270 = vst [vmem:[%s403_s3 + $0x30] sm:$0xff] %v258_v9   ;;  %v263_v2 = vpack.c.bf16 %v105_v10, %v104_v8 }
  0x27   :  { %271 = vst [vmem:[%s403_s3 + $0x38] sm:$0xff] %v263_v2  }
  0x28   :  { %190 = vsyncpa [#allocation3], 1 }

// kernel: generator_forward.15
= control target key start
LH: loop header
LB: loop body
LE: loop exit
PB: predicated region body
PF: predicated region fallthrough
CT: control target
= control target key end

     0   :  { %9 = vsyncpa [#allocation3], 0  ;;  %s1916_s0 = inlined_call_operand.hbm [shape: bf16[512,256], index: 0, kind: input, shape index: {}]   ;;  %s1917_s1 = inlined_call_operand.hbm [shape: bf16[256,128], index: 1, kind: input, shape index: {}]   ;;  %s1918_s2 = inlined_call_operand.hbm [shape: f32[512,128], index: 2, kind: output, shape index: {0}]   ;;  %s1919_s3 = inlined_call_operand.hbm [shape: f32[16,128], index: 3, kind: output, shape index: {1}]  }
   0x1   :  { %11 = vsyncpa [#allocation3 + $0x1], 0 }
   0x2   :  { %12 = vsyncpa [#allocation6], 0 }
   0x3   :  { %13 = vsyncpa [#allocation4], 0 }
   0x4   :  { %15 = vsyncpa [#allocation4 + $0x1], 0 }
   0x5   :  { %16 = vsyncpa [#allocation9], 0 }
   0x6   :  { %18 = vsyncpa [#allocation9 + $0x1], 0  ;;  %s1515_s12 = smov 0   ;;  %s1517_s13 = smov 0  }
   0x7   :  { %s1519_s14 = smov 0   ;;  %s1521_s15 = smov 0  }
   0x8 LB: > { %s1536_s16 = sadd.s32 4294967295, %s1483_s15   ;;  %s992_s17 = sadd.s32 4294967294, %s1483_s15   ;;  %s1483_s15 = sphi %s1521_s15, %s1939_s15   ;;  %s1479_s14 = sphi %s1519_s14, %s1938_s14   ;;  %s1475_s13 = sphi %s1517_s13, %s1937_s13   ;;  %s1471_s12 = sphi %s1515_s12, %s1936_s12  }
   0x9   : > { %p44_p0 = scmp.ne.s32.totalorder %s1475_s13, %s1471_s12  ;;  %p1920_p1 = scmp.eq.s32.totalorder %s1536_s16, 0 }
   0xa   : > { %p95_p3 = scmp.eq.s32.totalorder %s992_s17, 1  ;;  %p993_p5 = scmp.ge.s32.totalorder %s1483_s15, 1 }
   0xb   : > { %p1545_p4 = por %p1920_p1, %p44_p0  ;;  %p128_p7 = scmp.lt.s32.totalorder %s1483_s15, 3 }
   0xc   : > { %p1550_p6 = por %p95_p3, %p44_p0  ;;  %s1485_s21 = smov [#allocation5]  }
   0xd   : > { %s1923_s18 = scalar_select %p1545_p4, 1, 0 }
   0xe   : > { %s1924_s19 = scalar_select %p1550_p6, 1, 0 }
   0xf   : > { %p1555_p8 = pnand %p993_p5, %p128_p7  ;;  %s140_s22 = sshll.u32 %s1485_s21, 4  ;;  %s1559_s22 = int_to_ptr.vmem [resolvable:$true] %s140_s22 }
  0x10   : > { %s1571_s24 = sadd.s32 1, %s1483_s15   ;;  %s31_s25 = sadd.s32 1, %s1479_s14 }
  0x11   : > { %s1925_s20 = scalar_select %p1555_p8, 1, 0 }
  0x12   : > { %p1201_p9 = pneg %p1555_p8  ;;  %s28_s26 = ssub.s32 %s1483_s15, %s1571_s24 }
  0x13   : > { %s1323_s29 = scalar_lea.hbm %s1917_s1, 2048 }
  0x14   : > { %p1566_p11 = pnand %p1201_p9, %p1920_p1  ;;  %p1324_p12 = scmp.ne.s32.totalorder %s1917_s1, %s1323_s29 }
  0x15   : > { %p1330_p5 = scmp.lt.u32.totalorder %s1323_s29, %s1917_s1 }
  0x16   : > { %p1325_p13 = pneg %p1566_p11 }
  0x18   : > { %p1326_p0 = pnand %p1325_p13, %p1324_p12 }
  0x1a   : > { %p1327_p3 = pneg %p1326_p0 }
  0x1c   : > { %p1332_p7 = pnand %p1330_p5, %p1327_p3 }
  0x1e   : > { %1335 = shalt.err (!%p1332_p7)
}
  0x1f   : > { %s1336_s7 = scalar_lea.vmem %s1559_s22, 2048  ;;  %p1344_p2 = scmp.lt.s32.totalorder %s1559_s22, %s1559_s22 }
  0x20   : > { %p1337_p9 = scmp.ne.s32.totalorder %s1559_s22, %s1336_s7  ;;  %p1345_p6 = scmp.lt.s32.totalorder %s1336_s7, %s1336_s7 }
  0x22   : > { %p1339_p10 = pnand %p1337_p9, %p1325_p13  ;;  %p1346_p4 = por %p1345_p6, %p1344_p2 }
  0x24   : > { %p1340_p1 = pneg %p1339_p10 }
  0x26   : > { %p1347_p8 = pnand %p1346_p4, %p1340_p1 }
  0x28   : > { %1350 = shalt.err (!%p1347_p8)
}
  0x29   : > { %s1486_s8 = smov 64   ;;  %s1487_s9 = smov 4  }
  0x2a   : > { %1204 = dma.hbm_to_vmem [thread:$0]  (!%p1566_p11), %s1917_s1, 2048, %s1559_s22, [#allocation6], %s1486_s8, %s1486_s8, %s1487_s9  }
  0x2b   : > { %p29_p2 = scmp.eq.s32.totalorder %s28_s26, 0  ;;  %p38_p1 = scmp.ne.s32.totalorder %s1479_s14, %s1475_s13 }
  0x2c   : > { %p39_p4 = scmp.eq.s32.totalorder %s1483_s15, 0  ;;  %p1217_p6 = scmp.lt.s32.totalorder %s1483_s15, 2 }
  0x2d   : > { %s1602_s17 = scalar_select %p29_p2, %s1479_s14, %s31_s25  }
  0x2e   : > { %p40_p8 = por %p39_p4, %p38_p1  ;;  %p1927_p10 = scmp.eq.s32.totalorder %s1536_s16, 1 }
  0x2f   : > { %s154_s27 = sand.u32 1, %s1479_s14   ;;  %s1061_s28 = sshll.u32 %s1483_s15, 12 }
  0x30   : > { %p1606_p12 = por %p1927_p10, %p38_p1  ;;  %s996_s29 = sshll.u32 %s154_s27, 8 }
  0x31   : > { %s1615_s4 = scalar_lea.hbm %s1916_s0, %s1061_s28  ;;  %s158_s22 = scalar_lea.vmem [#allocation2], %s996_s29 }
  0x32   : > { %s166_s25 = sshll.u32 %s158_s22, 4  ;;  %p1617_p11 = pnand %p1217_p6, %p40_p8  ;;  %s1621_s25 = int_to_ptr.vmem [resolvable:$true] %s166_s25 }
  0x33   : > { %s1623_s5 = scalar_lea.sflag [#allocation3], %s154_s27  ;;  %s1351_s6 = scalar_lea.hbm %s1615_s4, 4096 }
  0x34   : > { %p1352_p13 = scmp.ne.s32.totalorder %s1615_s4, %s1351_s6  ;;  %p1353_p0 = pneg %p1617_p11 }
  0x35   : > { %s1356_s9 = scalar_lea.hbm %s1916_s0, 8192  ;;  %p1357_p7 = scmp.lt.u32.totalorder %s1615_s4, %s1916_s0 }
  0x36   : > { %p1354_p3 = pnand %p1353_p0, %p1352_p13  ;;  %p1358_p9 = scmp.lt.u32.totalorder %s1356_s9, %s1351_s6 }
  0x37   : > { %p1360_p1 = scmp.lt.u32.totalorder %s1351_s6, %s1615_s4 }
  0x38   : > { %p1355_p5 = pneg %p1354_p3  ;;  %p1359_p2 = por %p1358_p9, %p1357_p7 }
  0x3a   : > { %p1361_p4 = por %p1360_p1, %p1359_p2 }
  0x3c   : > { %p1362_p6 = pnand %p1361_p4, %p1355_p5 }
  0x3e   : > { %1365 = shalt.err (!%p1362_p6)
}
  0x3f   : > { %s1366_s27 = scalar_lea.vmem %s1621_s25, 4096  ;;  %s1488_s28 = smov [#allocation2]  }
  0x40   : > { %p1367_p8 = scmp.ne.s32.totalorder %s1621_s25, %s1366_s27  ;;  %s1371_s29 = sshll.u32 %s1488_s28, 4  ;;  %s1372_s29 = int_to_ptr.vmem [resolvable:$false] %s1371_s29 }
  0x41   : > { %s1373_s23 = scalar_lea.vmem %s1372_s29, 8192  ;;  %p1374_p3 = scmp.lt.s32.totalorder %s1621_s25, %s1372_s29 }
  0x42   : > { %p1369_p10 = pnand %p1367_p8, %p1353_p0  ;;  %p1375_p7 = scmp.lt.s32.totalorder %s1373_s23, %s1366_s27 }
  0x44   : > { %p1370_p13 = pneg %p1369_p10  ;;  %p1376_p9 = por %p1375_p7, %p1374_p3 }
  0x46   : > { %p1377_p2 = pnand %p1376_p9, %p1370_p13 }
  0x48   : > { %1380 = shalt.err (!%p1377_p2)
}
  0x49   : > { %s1489_s30 = smov 128   ;;  %s1490_s22 = smov 8  }
  0x4a   : > { %1208 = dma.hbm_to_vmem [thread:$0]  (!%p1617_p11), %s1615_s4, 4096, %s1621_s25, %s1623_s5, %s1489_s30, %s1489_s30, %s1490_s22  }
  0x4b   : > { %p1930_p0 = scmp.ne.s32.totalorder %s1925_s20, 0 }
  0x4c   : > { %s1654_s6 = sand.u32 (!%p1930_p0), 1, %s1475_s13   ;;  %p1931_p5 = scmp.ne.s32.totalorder (!%p1930_p0), %s1923_s18, 0 }
  0x4d   : > { %178 = sbr.rel (%p1930_p0) target bundleno = 469 (0x1d5), region = 28  ;;  %s1001_s7 = sshll.u32 (!%p1930_p0), %s1654_s6, 8 }
  0x4e   : > { %s181_s8 = scalar_lea.sflag (!%p1930_p0), [#allocation3], %s1654_s6  ;;  %s1660_s9 = scalar_lea.vmem (!%p1930_p0), [#allocation2], %s1001_s7 }
  0x54   : > { %1454 = dma.done.wait (%p1931_p5), %s181_s8, 4096  }
  0x55   : > { %1456 = vsyncadd (%p1931_p5), %s181_s8, 4294963200  ;;  %p1932_p11 = scmp.eq.s32.totalorder %s1536_s16, 0 }
  0x57   : > { %1458 = dma.done.wait (%p1932_p11), [#allocation6], 2048   ;;  %p1933_p1 = pmov %p1932_p11 }
  0x58   : > { %v1259_v0 = vld [vmem:[#allocation5 + $0x40] sm:$0xff]   ;;  %v1261_v2 = vld [vmem:[#allocation5 + $0x48] sm:$0xff]   ;;  %v1263_v4 = vld [vmem:[#allocation5 + $0x50] sm:$0xff]   ;;  %s1706_s18 = scalar_lea.vmem [#allocation7], %s1001_s7  ;;  %s1062_s20 = sshll.u32 %s1536_s16, 12 }
  0x59   : > { %1460 = vsyncadd (%p1933_p1), [#allocation6], 4294965248  ;;  %v1260_v1 = vld [vmem:[#allocation5] sm:$0xff]   ;;  %1063 = vmatprep.subr.bf16.mxu0 %v1259_v0  ;;  %1175 = vmatprep.subr.bf16.mxu1 %v1259_v0  ;;  %v1262_v3 = vld [vmem:[#allocation5 + $0x8] sm:$0xff]   ;;  %s864_s4 = sshll.u32 %s1706_s18, 4  ;;  %s1784_s5 = scalar_lea.hbm %s1918_s2, %s1062_s20  ;;  %s1786_s4 = int_to_ptr.vmem [resolvable:$true] %s864_s4 }
  0x5a   : > { %1064 = vmatpush3.bf16.msra.mxu0 %v1260_v1  ;;  %1183 = vmatpush3.bf16.msra.mxu1 %v1260_v1  ;;  %v1264_v5 = vld [vmem:[#allocation5 + $0x10] sm:$0xff]   ;;  %v1265_v6 = vld [vmem:[#allocation5 + $0x58] sm:$0xff]   ;;  %v1267_v8 = vld [vmem:[#allocation5 + $0x60] sm:$0xff]   ;;  %s846_s10 = scalar_lea.sflag [#allocation4], %s1654_s6  ;;  %s1381_s11 = scalar_lea.vmem %s1786_s4, 4096 }
  0x5b   : > { %1065 = vmatprep.subr.bf16.mxu0 %v1261_v2  ;;  %1176 = vmatprep.subr.bf16.mxu1 %v1261_v2  ;;  %v1266_v7 = vld [vmem:[#allocation5 + $0x18] sm:$0xff]   ;;  %v1268_v9 = vld [vmem:[#allocation5 + $0x20] sm:$0xff]   ;;  %v1269_v10 = vld [vmem:[#allocation5 + $0x68] sm:$0xff]   ;;  %p1382_p4 = scmp.ne.s32.totalorder %s1786_s4, %s1381_s11  ;;  %s1491_s27 = smov [#allocation7]  }
  0x5c   : > { %v1277_v11 = vld [vmem:[%s1660_s9 + $0x4] ss:$8 sps:$4 sm:$0xff]   ;;  %v1271_v13 = vld [vmem:[#allocation5 + $0x70] sm:$0xff]   ;;  %v1273_v16 = vld [vmem:[#allocation5 + $0x78] sm:$0xff]   ;;  %s1385_s28 = sshll.u32 %s1491_s27, 4  ;;  %s1386_s28 = int_to_ptr.vmem [resolvable:$false] %s1385_s28 }
  0x5d   : > { %v1270_v12 = vld [vmem:[#allocation5 + $0x28] sm:$0xff]   ;;  %571 = vmatprep.mubr.bf16.mxu0 %v1277_v11  ;;  %v1272_v15 = vld [vmem:[#allocation5 + $0x30] sm:$0xff]   ;;  %v1274_v17 = vld [vmem:[#allocation5 + $0x38] sm:$0xff]   ;;  %p1383_p6 = pnand %p1382_p4, %p1606_p12  ;;  %s1387_s29 = scalar_lea.vmem %s1386_s28, 8192 }
  0x5e   : > { %1066 = vmatpush3.bf16.msra.mxu0 %v1262_v3  ;;  %1184 = vmatpush3.bf16.msra.mxu1 %v1262_v3  ;;  %v1289_v14 = vld [vmem:[%s1660_s9 + $0x84] ss:$8 sps:$4 sm:$0xff]   ;;  %v1275_v18 = vld [vmem:[%s1660_s9] ss:$8 sps:$4 sm:$0xff]   ;;  %v1278_v19 = vld [vmem:[%s1660_s9 + $0x14] ss:$8 sps:$4 sm:$0xff]   ;;  %p1388_p10 = scmp.lt.s32.totalorder %s1786_s4, %s1386_s28  ;;  %p1389_p13 = scmp.lt.s32.totalorder %s1387_s29, %s1381_s11 }
  0x5f   : > { %1067 = vmatprep.subr.bf16.mxu0 %v1263_v4  ;;  %1177 = vmatprep.subr.bf16.mxu1 %v1263_v4  ;;  %v1287_v20 = vld [vmem:[%s1660_s9 + $0x80] ss:$8 sps:$4 sm:$0xff]   ;;  %v1293_v21 = vld [vmem:[%s1660_s9 + $0x94] ss:$8 sps:$4 sm:$0xff]   ;;  %v1280_v22 = vld [vmem:[%s1660_s9 + $0x10] ss:$8 sps:$4 sm:$0xff]   ;;  %p1384_p8 = pneg %p1383_p6 }
  0x60   : > { %635 = vmatprep.mubr.bf16.mxu1 %v1289_v14  ;;  %v1281_v23 = vld [vmem:[%s1660_s9 + $0x24] ss:$8 sps:$4 sm:$0xff]   ;;  %v1295_v24 = vld [vmem:[%s1660_s9 + $0x90] ss:$8 sps:$4 sm:$0xff]   ;;  %v1283_v26 = vld [vmem:[%s1660_s9 + $0x20] ss:$8 sps:$4 sm:$0xff]   ;;  %p1390_p3 = por %p1389_p13, %p1388_p10 }
  0x61   : > { %v1299_v25 = vld [vmem:[%s1660_s9 + $0xa4] ss:$8 sps:$4 sm:$0xff]   ;;  %v1284_v27 = vld [vmem:[%s1660_s9 + $0x34] ss:$8 sps:$4 sm:$0xff]   ;;  %v1301_v28 = vld [vmem:[%s1660_s9 + $0xa0] ss:$8 sps:$4 sm:$0xff]  }
  0x62   : > { %1068 = vmatpush3.bf16.msra.mxu0 %v1264_v5  ;;  %1185 = vmatpush3.bf16.msra.mxu1 %v1264_v5  ;;  %v1305_v29 = vld [vmem:[%s1660_s9 + $0xb4] ss:$8 sps:$4 sm:$0xff]   ;;  %v1286_v30 = vld [vmem:[%s1660_s9 + $0x30] ss:$8 sps:$4 sm:$0xff]   ;;  %v1290_v31 = vld [vmem:[%s1660_s9 + $0x44] ss:$8 sps:$4 sm:$0xff]   ;;  %p1391_p7 = pnand %p1390_p3, %p1384_p8 }
  0x63   : > { %1069 = vmatprep.subr.bf16.mxu0 %v1265_v6  ;;  %1178 = vmatprep.subr.bf16.mxu1 %v1265_v6  ;;  %v1307_v32 = vld [vmem:[%s1660_s9 + $0xb0] ss:$8 sps:$4 sm:$0xff]   ;;  %v1311_v33 = vld [vmem:[%s1660_s9 + $0xc4] ss:$8 sps:$4 sm:$0xff]   ;;  %v1292_v34 = vld [vmem:[%s1660_s9 + $0x40] ss:$8 sps:$4 sm:$0xff]  }
  0x64   : > { %v1296_v35 = vld [vmem:[%s1660_s9 + $0x54] ss:$8 sps:$4 sm:$0xff]   ;;  %v1313_v36 = vld [vmem:[%s1660_s9 + $0xc0] ss:$8 sps:$4 sm:$0xff]   ;;  %v1298_v38 = vld [vmem:[%s1660_s9 + $0x50] ss:$8 sps:$4 sm:$0xff]  }
  0x65   : > { %v1314_v37 = vld [vmem:[%s1660_s9 + $0xd4] ss:$8 sps:$4 sm:$0xff]   ;;  %v1302_v39 = vld [vmem:[%s1660_s9 + $0x64] ss:$8 sps:$4 sm:$0xff]   ;;  %v1316_v40 = vld [vmem:[%s1660_s9 + $0xd0] ss:$8 sps:$4 sm:$0xff]  }
  0x66   : > { %1070 = vmatpush3.bf16.msra.mxu0 %v1266_v7  ;;  %1186 = vmatpush3.bf16.msra.mxu1 %v1266_v7  ;;  %v1317_v41 = vld [vmem:[%s1660_s9 + $0xe4] ss:$8 sps:$4 sm:$0xff]   ;;  %v1304_v42 = vld [vmem:[%s1660_s9 + $0x60] ss:$8 sps:$4 sm:$0xff]   ;;  %v1308_v43 = vld [vmem:[%s1660_s9 + $0x74] ss:$8 sps:$4 sm:$0xff]  }
  0x67   : > { %1071 = vmatprep.subr.bf16.mxu0 %v1267_v8  ;;  %1179 = vmatprep.subr.bf16.mxu1 %v1267_v8  ;;  %v1319_v44 = vld [vmem:[%s1660_s9 + $0xe0] ss:$8 sps:$4 sm:$0xff]   ;;  %v1320_v45 = vld [vmem:[%s1660_s9 + $0xf4] ss:$8 sps:$4 sm:$0xff]   ;;  %v1310_v46 = vld [vmem:[%s1660_s9 + $0x70] ss:$8 sps:$4 sm:$0xff]  }
  0x68   : > { %v1322_v47 = vld [vmem:[%s1660_s9 + $0xf0] ss:$8 sps:$4 sm:$0xff]  }
  0x6a   : > { %1072 = vmatpush3.bf16.msra.mxu0 %v1268_v9  ;;  %1187 = vmatpush3.bf16.msra.mxu1 %v1268_v9 }
  0x6b   : > { %1073 = vmatprep.subr.bf16.mxu0 %v1269_v10  ;;  %1180 = vmatprep.subr.bf16.mxu1 %v1269_v10 }
  0x6e   : > { %1074 = vmatpush3.bf16.msra.mxu0 %v1270_v12  ;;  %1188 = vmatpush3.bf16.msra.mxu1 %v1270_v12 }
  0x6f   : > { %1075 = vmatprep.subr.bf16.mxu0 %v1271_v13  ;;  %1181 = vmatprep.subr.bf16.mxu1 %v1271_v13 }
  0x72   : > { %1076 = vmatpush3.bf16.msra.mxu0 %v1272_v15  ;;  %1189 = vmatpush3.bf16.msra.mxu1 %v1272_v15 }
  0x73   : > { %1077 = vmatprep.subr.bf16.mxu0 %v1273_v16  ;;  %1182 = vmatprep.subr.bf16.mxu1 %v1273_v16 }
  0x76   : > { %1078 = vmatpush3.bf16.msra.mxu0 %v1274_v17  ;;  %1190 = vmatpush3.bf16.msra.mxu1 %v1274_v17 }
  0x79   : > { %572 = vmatmul.mubr.bf16.vlgmr.msra.gmra.mrb[0].mxu0 %v1275_v18  ;;  %636 = vmatmul.mubr.bf16.vlgmr.msra.gmra.mrb[0].mxu1 %v1287_v20 }
  0x7a   : > { %579 = vmatprep.mubr.bf16.mxu0 %v1278_v19  ;;  %643 = vmatprep.mubr.bf16.mxu1 %v1293_v21 }
  0x81   : > { %580 = vmatmul.mubr.bf16.gmra.mrb[4].mxu0 %v1280_v22  ;;  %644 = vmatmul.mubr.bf16.gmra.mrb[4].mxu1 %v1295_v24 }
  0x82   : > { %587 = vmatprep.mubr.bf16.mxu0 %v1281_v23  ;;  %651 = vmatprep.mubr.bf16.mxu1 %v1299_v25 }
  0x89   : > { %588 = vmatmul.mubr.bf16.gmra.mrb[8].mxu0 %v1283_v26  ;;  %652 = vmatmul.mubr.bf16.gmra.mrb[8].mxu1 %v1301_v28 }
  0x8a   : > { %595 = vmatprep.mubr.bf16.mxu0 %v1284_v27  ;;  %659 = vmatprep.mubr.bf16.mxu1 %v1305_v29 }
  0x91   : > { %596 = vmatmul.mubr.bf16.gmra.mrb[12].mxu0 %v1286_v30  ;;  %660 = vmatmul.mubr.bf16.gmra.mrb[12].mxu1 %v1307_v32 }
  0x92   : > { %603 = vmatprep.mubr.bf16.mxu0 %v1290_v31  ;;  %667 = vmatprep.mubr.bf16.mxu1 %v1311_v33 }
  0x99   : > { %604 = vmatmul.mubr.bf16.gmra.mrb[16].mxu0 %v1292_v34  ;;  %668 = vmatmul.mubr.bf16.gmra.mrb[16].mxu1 %v1313_v36 }
  0x9a   : > { %611 = vmatprep.mubr.bf16.mxu0 %v1296_v35  ;;  %675 = vmatprep.mubr.bf16.mxu1 %v1314_v37 }
  0xa1   : > { %612 = vmatmul.mubr.bf16.gmra.mrb[20].mxu0 %v1298_v38  ;;  %676 = vmatmul.mubr.bf16.gmra.mrb[20].mxu1 %v1316_v40 }
  0xa2   : > { %619 = vmatprep.mubr.bf16.mxu0 %v1302_v39  ;;  %683 = vmatprep.mubr.bf16.mxu1 %v1317_v41 }
  0xa9   : > { %620 = vmatmul.mubr.bf16.gmra.mrb[24].mxu0 %v1304_v42  ;;  %684 = vmatmul.mubr.bf16.gmra.mrb[24].mxu1 %v1319_v44 }
  0xaa   : > { %627 = vmatprep.mubr.bf16.mxu0 %v1308_v43  ;;  %691 = vmatprep.mubr.bf16.mxu1 %v1320_v45 }
  0xb1   : > { %628 = vmatmul.mubr.bf16.gmra.mrb[28].mxu0 %v1310_v46  ;;  %692 = vmatmul.mubr.bf16.gmra.mrb[28].mxu1 %v1322_v47 }
 0x14c   : > { %v1079_v48 = vpop.f32.mrb[0].mxu0  ;;  %v1127_v50 = vpop.f32.mrb[0].mxu1 }
 0x14d   : > { %v1080_v49 = vpop.f32.mrb[1].mxu0  ;;  %v1128_v53 = vpop.f32.mrb[1].mxu1 }
 0x14e   : > { %v1081_v51 = vadd.f32 %v1080_v49, %v1079_v48  ;;  %v1082_v52 = vpop.f32.mrb[2].mxu0  ;;  %v1702_v55 = vadd.f32 %v1128_v53, %v1127_v50  ;;  %v1130_v56 = vpop.f32.mrb[2].mxu1 }
 0x14f   : > { %v1083_v54 = vpop.f32.mrb[3].mxu0  ;;  %v1131_v58 = vpop.f32.mrb[3].mxu1 }
 0x150   : > { %700 = vst [vmem:[%s1706_s18] sm:$0xff] %v1081_v51  ;;  %v1084_v57 = vadd.f32 %v1083_v54, %v1082_v52  ;;  %716 = vst [vmem:[%s1706_s18 + $0x80] sm:$0xff] %v1702_v55  ;;  %v1711_v59 = vadd.f32 %v1131_v58, %v1130_v56  ;;  %v769_v60 = vmul.f32 %v1081_v51, %v1081_v51 }
 0x152   : > { %701 = vst [vmem:[%s1706_s18 + $0x8] sm:$0xff] %v1084_v57  ;;  %v732_v61 = vadd.f32 %v1084_v57, %v1081_v51  ;;  %v770_v62 = vmul.f32 %v1084_v57, %v1084_v57  ;;  %717 = vst [vmem:[%s1706_s18 + $0x88] sm:$0xff] %v1711_v59 }
 0x154   : > { %v801_v63 = vadd.f32 %v770_v62, %v769_v60  ;;  %v1085_v0 = vpop.f32.mrb[4].mxu0  ;;  %v1133_v2 = vpop.f32.mrb[4].mxu1 }
 0x155   : > { %v1086_v1 = vpop.f32.mrb[5].mxu0  ;;  %v1134_v5 = vpop.f32.mrb[5].mxu1 }
 0x156   : > { %v1087_v3 = vadd.f32 %v1086_v1, %v1085_v0  ;;  %v1088_v4 = vpop.f32.mrb[6].mxu0  ;;  %v1716_v7 = vadd.f32 %v1134_v5, %v1133_v2  ;;  %v1136_v8 = vpop.f32.mrb[6].mxu1 }
 0x157   : > { %v1089_v6 = vpop.f32.mrb[7].mxu0  ;;  %v1137_v12 = vpop.f32.mrb[7].mxu1 }
 0x158   : > { %702 = vst [vmem:[%s1706_s18 + $0x10] sm:$0xff] %v1087_v3  ;;  %v733_v9 = vadd.f32 %v1087_v3, %v732_v61  ;;  %v771_v10 = vmul.f32 %v1087_v3, %v1087_v3  ;;  %v1090_v11 = vadd.f32 %v1089_v6, %v1088_v4  ;;  %718 = vst [vmem:[%s1706_s18 + $0x90] sm:$0xff] %v1716_v7 }
 0x159   : > { %v1721_v13 = vadd.f32 %v1137_v12, %v1136_v8 }
 0x15a   : > { %v802_v14 = vadd.f32 %v801_v63, %v771_v10  ;;  %703 = vst [vmem:[%s1706_s18 + $0x18] sm:$0xff] %v1090_v11  ;;  %v734_v15 = vadd.f32 %v1090_v11, %v733_v9  ;;  %v772_v16 = vmul.f32 %v1090_v11, %v1090_v11 }
 0x15b   : > { %719 = vst [vmem:[%s1706_s18 + $0x98] sm:$0xff] %v1721_v13 }
 0x15c   : > { %v803_v17 = vadd.f32 %v802_v14, %v772_v16  ;;  %v1091_v18 = vpop.f32.mrb[8].mxu0  ;;  %v1139_v20 = vpop.f32.mrb[8].mxu1 }
 0x15d   : > { %v1092_v19 = vpop.f32.mrb[9].mxu0  ;;  %v1140_v23 = vpop.f32.mrb[9].mxu1 }
 0x15e   : > { %v1093_v21 = vadd.f32 %v1092_v19, %v1091_v18  ;;  %v1094_v22 = vpop.f32.mrb[10].mxu0  ;;  %v1726_v25 = vadd.f32 %v1140_v23, %v1139_v20  ;;  %v1142_v26 = vpop.f32.mrb[10].mxu1 }
 0x15f   : > { %v1095_v24 = vpop.f32.mrb[11].mxu0  ;;  %v1143_v30 = vpop.f32.mrb[11].mxu1 }
 0x160   : > { %704 = vst [vmem:[%s1706_s18 + $0x20] sm:$0xff] %v1093_v21  ;;  %v735_v27 = vadd.f32 %v1093_v21, %v734_v15  ;;  %v773_v28 = vmul.f32 %v1093_v21, %v1093_v21  ;;  %v1096_v29 = vadd.f32 %v1095_v24, %v1094_v22  ;;  %720 = vst [vmem:[%s1706_s18 + $0xa0] sm:$0xff] %v1726_v25 }
 0x161   : > { %v1731_v31 = vadd.f32 %v1143_v30, %v1142_v26 }
 0x162   : > { %v804_v32 = vadd.f32 %v803_v17, %v773_v28  ;;  %705 = vst [vmem:[%s1706_s18 + $0x28] sm:$0xff] %v1096_v29  ;;  %v736_v33 = vadd.f32 %v1096_v29, %v735_v27  ;;  %v774_v34 = vmul.f32 %v1096_v29, %v1096_v29 }
 0x163   : > { %721 = vst [vmem:[%s1706_s18 + $0xa8] sm:$0xff] %v1731_v31 }
 0x164   : > { %v805_v35 = vadd.f32 %v804_v32, %v774_v34  ;;  %v1097_v36 = vpop.f32.mrb[12].mxu0  ;;  %v1145_v38 = vpop.f32.mrb[12].mxu1 }
 0x165   : > { %v1098_v37 = vpop.f32.mrb[13].mxu0  ;;  %v1146_v41 = vpop.f32.mrb[13].mxu1 }
 0x166   : > { %v1099_v39 = vadd.f32 %v1098_v37, %v1097_v36  ;;  %v1100_v40 = vpop.f32.mrb[14].mxu0  ;;  %v1736_v43 = vadd.f32 %v1146_v41, %v1145_v38  ;;  %v1148_v44 = vpop.f32.mrb[14].mxu1 }
 0x167   : > { %v1101_v42 = vpop.f32.mrb[15].mxu0  ;;  %v1149_v48 = vpop.f32.mrb[15].mxu1 }
 0x168   : > { %706 = vst [vmem:[%s1706_s18 + $0x30] sm:$0xff] %v1099_v39  ;;  %v737_v45 = vadd.f32 %v1099_v39, %v736_v33  ;;  %v775_v46 = vmul.f32 %v1099_v39, %v1099_v39  ;;  %v1102_v47 = vadd.f32 %v1101_v42, %v1100_v40  ;;  %722 = vst [vmem:[%s1706_s18 + $0xb0] sm:$0xff] %v1736_v43 }
 0x169   : > { %v1741_v49 = vadd.f32 %v1149_v48, %v1148_v44 }
 0x16a   : > { %v806_v50 = vadd.f32 %v805_v35, %v775_v46  ;;  %707 = vst [vmem:[%s1706_s18 + $0x38] sm:$0xff] %v1102_v47  ;;  %v738_v51 = vadd.f32 %v1102_v47, %v737_v45  ;;  %v776_v52 = vmul.f32 %v1102_v47, %v1102_v47 }
 0x16b   : > { %723 = vst [vmem:[%s1706_s18 + $0xb8] sm:$0xff] %v1741_v49 }
 0x16c   : > { %v807_v53 = vadd.f32 %v806_v50, %v776_v52  ;;  %v1103_v54 = vpop.f32.mrb[16].mxu0  ;;  %v1151_v57 = vpop.f32.mrb[16].mxu1 }
 0x16d   : > { %v1104_v56 = vpop.f32.mrb[17].mxu0  ;;  %v1152_v61 = vpop.f32.mrb[17].mxu1 }
 0x16e   : > { %v1105_v58 = vadd.f32 %v1104_v56, %v1103_v54  ;;  %v1106_v60 = vpop.f32.mrb[18].mxu0  ;;  %v1746_v63 = vadd.f32 %v1152_v61, %v1151_v57  ;;  %v1154_v0 = vpop.f32.mrb[18].mxu1 }
 0x16f   : > { %v1107_v62 = vpop.f32.mrb[19].mxu0  ;;  %v1155_v4 = vpop.f32.mrb[19].mxu1 }
 0x170   : > { %708 = vst [vmem:[%s1706_s18 + $0x40] sm:$0xff] %v1105_v58  ;;  %v739_v1 = vadd.f32 %v1105_v58, %v738_v51  ;;  %v777_v2 = vmul.f32 %v1105_v58, %v1105_v58  ;;  %v1108_v3 = vadd.f32 %v1107_v62, %v1106_v60  ;;  %724 = vst [vmem:[%s1706_s18 + $0xc0] sm:$0xff] %v1746_v63 }
 0x171   : > { %v1751_v5 = vadd.f32 %v1155_v4, %v1154_v0 }
 0x172   : > { %v808_v6 = vadd.f32 %v807_v53, %v777_v2  ;;  %709 = vst [vmem:[%s1706_s18 + $0x48] sm:$0xff] %v1108_v3  ;;  %v740_v8 = vadd.f32 %v1108_v3, %v739_v1  ;;  %v778_v9 = vmul.f32 %v1108_v3, %v1108_v3 }
 0x173   : > { %725 = vst [vmem:[%s1706_s18 + $0xc8] sm:$0xff] %v1751_v5 }
 0x174   : > { %v809_v10 = vadd.f32 %v808_v6, %v778_v9  ;;  %v1109_v11 = vpop.f32.mrb[20].mxu0  ;;  %v1157_v14 = vpop.f32.mrb[20].mxu1 }
 0x175   : > { %v1110_v12 = vpop.f32.mrb[21].mxu0  ;;  %v1158_v17 = vpop.f32.mrb[21].mxu1 }
 0x176   : > { %v1111_v15 = vadd.f32 %v1110_v12, %v1109_v11  ;;  %v1112_v16 = vpop.f32.mrb[22].mxu0  ;;  %v1756_v19 = vadd.f32 %v1158_v17, %v1157_v14  ;;  %v1160_v20 = vpop.f32.mrb[22].mxu1 }
 0x177   : > { %v1113_v18 = vpop.f32.mrb[23].mxu0  ;;  %v1161_v24 = vpop.f32.mrb[23].mxu1 }
 0x178   : > { %710 = vst [vmem:[%s1706_s18 + $0x50] sm:$0xff] %v1111_v15  ;;  %v741_v21 = vadd.f32 %v1111_v15, %v740_v8  ;;  %v779_v22 = vmul.f32 %v1111_v15, %v1111_v15  ;;  %v1114_v23 = vadd.f32 %v1113_v18, %v1112_v16  ;;  %726 = vst [vmem:[%s1706_s18 + $0xd0] sm:$0xff] %v1756_v19 }
 0x179   : > { %v1761_v26 = vadd.f32 %v1161_v24, %v1160_v20 }
 0x17a   : > { %v810_v27 = vadd.f32 %v809_v10, %v779_v22  ;;  %711 = vst [vmem:[%s1706_s18 + $0x58] sm:$0xff] %v1114_v23  ;;  %v742_v28 = vadd.f32 %v1114_v23, %v741_v21  ;;  %v780_v29 = vmul.f32 %v1114_v23, %v1114_v23  ;;  %v785_v10 = vmul.f32 %v1702_v55, %v1702_v55 }
 0x17b   : > { %727 = vst [vmem:[%s1706_s18 + $0xd8] sm:$0xff] %v1761_v26 }
 0x17c   : > { %v811_v30 = vadd.f32 %v810_v27, %v780_v29  ;;  %v1115_v32 = vpop.f32.mrb[24].mxu0  ;;  %v1163_v34 = vpop.f32.mrb[24].mxu1 }
 0x17d   : > { %v1116_v33 = vpop.f32.mrb[25].mxu0  ;;  %v1164_v37 = vpop.f32.mrb[25].mxu1 }
 0x17e   : > { %v1117_v35 = vadd.f32 %v1116_v33, %v1115_v32  ;;  %v1118_v36 = vpop.f32.mrb[26].mxu0  ;;  %v1766_v39 = vadd.f32 %v1164_v37, %v1163_v34  ;;  %v1166_v40 = vpop.f32.mrb[26].mxu1 }
 0x17f   : > { %v1119_v38 = vpop.f32.mrb[27].mxu0  ;;  %v1167_v45 = vpop.f32.mrb[27].mxu1 }
 0x180   : > { %712 = vst [vmem:[%s1706_s18 + $0x60] sm:$0xff] %v1117_v35  ;;  %v743_v41 = vadd.f32 %v1117_v35, %v742_v28  ;;  %v781_v42 = vmul.f32 %v1117_v35, %v1117_v35  ;;  %v1120_v44 = vadd.f32 %v1119_v38, %v1118_v36  ;;  %728 = vst [vmem:[%s1706_s18 + $0xe0] sm:$0xff] %v1766_v39 }
 0x181   : > { %v1771_v46 = vadd.f32 %v1167_v45, %v1166_v40 }
 0x182   : > { %v812_v47 = vadd.f32 %v811_v30, %v781_v42  ;;  %713 = vst [vmem:[%s1706_s18 + $0x68] sm:$0xff] %v1120_v44  ;;  %v744_v48 = vadd.f32 %v1120_v44, %v743_v41  ;;  %v782_v50 = vmul.f32 %v1120_v44, %v1120_v44 }
 0x183   : > { %729 = vst [vmem:[%s1706_s18 + $0xe8] sm:$0xff] %v1771_v46 }
 0x184   : > { %v813_v51 = vadd.f32 %v812_v47, %v782_v50  ;;  %v1121_v52 = vpop.f32.mrb[28].mxu0  ;;  %v1169_v54 = vpop.f32.mrb[28].mxu1 }
 0x185   : > { %v1122_v53 = vpop.f32.mrb[29].mxu0  ;;  %v1170_v58 = vpop.f32.mrb[29].mxu1 }
 0x186   : > { %v1123_v56 = vadd.f32 %v1122_v53, %v1121_v52  ;;  %v1124_v57 = vpop.f32.mrb[30].mxu0  ;;  %v1778_v61 = vadd.f32 %v1170_v58, %v1169_v54  ;;  %v1172_v62 = vpop.f32.mrb[30].mxu1 }
 0x187   : > { %v1125_v60 = vpop.f32.mrb[31].mxu0  ;;  %v1173_v3 = vpop.f32.mrb[31].mxu1 }
 0x188   : > { %714 = vst [vmem:[%s1706_s18 + $0x70] sm:$0xff] %v1123_v56  ;;  %v745_v0 = vadd.f32 %v1123_v56, %v744_v48  ;;  %v783_v1 = vmul.f32 %v1123_v56, %v1123_v56  ;;  %v1126_v2 = vadd.f32 %v1125_v60, %v1124_v57  ;;  %730 = vst [vmem:[%s1706_s18 + $0xf0] sm:$0xff] %v1778_v61 }
 0x189   : > { %v1790_v4 = vadd.f32 %v1173_v3, %v1172_v62 }
 0x18a   : > { %v814_v6 = vadd.f32 %v813_v51, %v783_v1  ;;  %715 = vst [vmem:[%s1706_s18 + $0x78] sm:$0xff] %v1126_v2  ;;  %v746_v8 = vadd.f32 %v1126_v2, %v745_v0  ;;  %v784_v9 = vmul.f32 %v1126_v2, %v1126_v2 }
 0x18b   : > { %731 = vst [vmem:[%s1706_s18 + $0xf8] sm:$0xff] %v1790_v4 }
 0x18c   : > { %v747_v11 = vadd.f32 %v1702_v55, %v746_v8  ;;  %v815_v12 = vadd.f32 %v814_v6, %v784_v9 }
 0x18d   : > { %1394 = shalt.err (!%p1391_p7)
}
 0x18e   : > { %s1395_s23 = scalar_lea.hbm %s1784_s5, 4096  ;;  %s1399_s7 = scalar_lea.hbm %s1918_s2, 8192 }
 0x18f   : > { %p1396_p9 = scmp.ne.s32.totalorder %s1784_s5, %s1395_s23  ;;  %p1400_p5 = scmp.lt.u32.totalorder %s1784_s5, %s1918_s2 }
 0x190   : > { %p1401_p11 = scmp.lt.u32.totalorder %s1399_s7, %s1395_s23  ;;  %p1403_p4 = scmp.lt.u32.totalorder %s1395_s23, %s1784_s5 }
 0x191   : > { %p1397_p2 = pnand %p1396_p9, %p1606_p12 }
 0x192   : > { %p1402_p1 = por %p1401_p11, %p1400_p5 }
 0x193   : > { %p1398_p0 = pneg %p1397_p2 }
 0x194   : > { %p1404_p6 = por %p1403_p4, %p1402_p1 }
 0x196   : > { %p1405_p8 = pnand %p1404_p6, %p1398_p0 }
 0x198   : > { %1408 = shalt.err (!%p1405_p8)
}
 0x199   : > { %s1492_s18 = smov 128   ;;  %s1493_s20 = smov 8   ;;  %v786_v55 = vmul.f32 %v1711_v59, %v1711_v59  ;;  %v748_v14 = vadd.f32 %v1711_v59, %v747_v11  ;;  %v816_v15 = vadd.f32 %v815_v12, %v785_v10  ;;  %v787_v16 = vmul.f32 %v1716_v7, %v1716_v7 }
 0x19a   : > { %1197 = dma.vmem_to_hbm [thread:$0]  (%p1606_p12), %s1786_s4, 4096, %s1784_s5, %s846_s10, %s1492_s18, %s1492_s18, %s1493_s20   ;;  %v788_v20 = vmul.f32 %v1721_v13, %v1721_v13  ;;  %v789_v23 = vmul.f32 %v1726_v25, %v1726_v25  ;;  %v790_v59 = vmul.f32 %v1731_v31, %v1731_v31  ;;  %v793_v35 = vmul.f32 %v1746_v63, %v1746_v63 }
 0x19b   : > { %v749_v17 = vadd.f32 %v1716_v7, %v748_v14  ;;  %v817_v18 = vadd.f32 %v816_v15, %v786_v55  ;;  %v791_v7 = vmul.f32 %v1736_v43, %v1736_v43  ;;  %v794_v38 = vmul.f32 %v1751_v5, %v1751_v5  ;;  %s1004_s4 = sshll.u32 %s1654_s6, 3  ;;  %s1057_s25 = sshll.u32 %s1536_s16, 7 }
 0x19c   : > { %v795_v41 = vmul.f32 %v1756_v19, %v1756_v19  ;;  %v796_v44 = vmul.f32 %v1761_v26, %v1761_v26  ;;  %v797_v47 = vmul.f32 %v1766_v39, %v1766_v39  ;;  %v798_v50 = vmul.f32 %v1771_v46, %v1771_v46  ;;  %s215_s26 = scalar_lea.vmem [#allocation8], %s1004_s4  ;;  %s1872_s27 = scalar_lea.hbm %s1919_s3, %s1057_s25 }
 0x19d   : > { %v750_v21 = vadd.f32 %v1721_v13, %v749_v17  ;;  %v818_v22 = vadd.f32 %v817_v18, %v787_v16  ;;  %v792_v13 = vmul.f32 %v1741_v49, %v1741_v49  ;;  %v800_v54 = vmul.f32 %v1790_v4, %v1790_v4  ;;  %s880_s5 = sshll.u32 %s215_s26, 4  ;;  %s851_s28 = scalar_lea.sflag [#allocation9], %s1654_s6  ;;  %s1874_s5 = int_to_ptr.vmem [resolvable:$true] %s880_s5 }
 0x19e   : > { %v838_v60 = vlaneseq  ;;  %s1409_s16 = scalar_lea.vmem %s1874_s5, 128  ;;  %s1494_s29 = smov [#allocation8]  }
 0x19f   : > { %v819_v24 = vadd.f32 %v818_v22, %v788_v20  ;;  %v751_v27 = vadd.f32 %v1726_v25, %v750_v21  ;;  %p1410_p10 = scmp.ne.s32.totalorder %s1874_s5, %s1409_s16  ;;  %s1413_s23 = sshll.u32 %s1494_s29, 4  ;;  %s1414_s23 = int_to_ptr.vmem [resolvable:$false] %s1413_s23 }
 0x1a0   : > { %v839_v2 = vshrl.u32 %v838_v60, 7  ;;  %s1415_s30 = scalar_lea.vmem %s1414_s23, 256  ;;  %p1416_p7 = scmp.lt.s32.totalorder %s1874_s5, %s1414_s23 }
 0x1a1   : > { %v752_v28 = vadd.f32 %v1731_v31, %v751_v27  ;;  %v820_v29 = vadd.f32 %v819_v24, %v789_v23  ;;  %p1411_p13 = pnand %p1410_p10, %p1606_p12  ;;  %p1417_p9 = scmp.lt.s32.totalorder %s1415_s30, %s1409_s16 }
 0x1a2   : > { %vm841_vm0 = vcmp.eq.s32.totalorder %v839_v2, 1  ;;  %vm840_vm1 = vcmp.eq.s32.totalorder %v839_v2, 0 }
 0x1a3   : > { %v753_v30 = vadd.f32 %v1736_v43, %v752_v28  ;;  %v821_v32 = vadd.f32 %v820_v29, %v790_v59  ;;  %p1412_p3 = pneg %p1411_p13  ;;  %p1418_p2 = por %p1417_p9, %p1416_p7 }
 0x1a5   : > { %v754_v33 = vadd.f32 %v1741_v49, %v753_v30  ;;  %v822_v34 = vadd.f32 %v821_v32, %v791_v7  ;;  %p1419_p0 = pnand %p1418_p2, %p1412_p3 }
 0x1a7   : > { %v755_v25 = vadd.f32 %v1746_v63, %v754_v33  ;;  %v823_v36 = vadd.f32 %v822_v34, %v792_v13 }
 0x1a9   : > { %v824_v31 = vadd.f32 %v823_v36, %v793_v35  ;;  %v756_v37 = vadd.f32 %v1751_v5, %v755_v25 }
 0x1ab   : > { %v825_v43 = vadd.f32 %v824_v31, %v794_v38  ;;  %v757_v40 = vadd.f32 %v1756_v19, %v756_v37  ;;  %v799_v19 = vmul.f32 %v1778_v61, %v1778_v61 }
 0x1ad   : > { %v826_v49 = vadd.f32 %v825_v43, %v795_v41  ;;  %v758_v42 = vadd.f32 %v1761_v26, %v757_v40 }
 0x1af   : > { %v827_v63 = vadd.f32 %v826_v49, %v796_v44  ;;  %v759_v45 = vadd.f32 %v1766_v39, %v758_v42 }
 0x1b1   : > { %v828_v48 = vadd.f32 %v827_v63, %v797_v47  ;;  %v760_v5 = vadd.f32 %v1771_v46, %v759_v45 }
 0x1b3   : > { %v829_v51 = vadd.f32 %v828_v48, %v798_v50  ;;  %v761_v52 = vadd.f32 %v1778_v61, %v760_v5 }
 0x1b5   : > { %v830_v26 = vadd.f32 %v829_v51, %v799_v19  ;;  %v762_v53 = vadd.f32 %v1790_v4, %v761_v52 }
 0x1b7   : > { %v763_v39 = vrot.slane %v762_v53, 4  ;;  %v831_v56 = vadd.f32 %v830_v26, %v800_v54 }
 0x1b9   : > { %v764_v57 = vadd.f32 %v763_v39, %v762_v53  ;;  %v832_v58 = vrot.slane %v831_v56, 4 }
 0x1bb   : > { %v765_v62 = vrot.slane %v764_v57, 2  ;;  %v833_v46 = vadd.f32 %v832_v58, %v831_v56 }
 0x1bd   : > { %v766_v0 = vadd.f32 %v765_v62, %v764_v57  ;;  %v834_v1 = vrot.slane %v833_v46, 2 }
 0x1bf   : > { %v835_v61 = vadd.f32 %v834_v1, %v833_v46  ;;  %v767_v3 = vrot.slane %v766_v0, 1 }
 0x1c1   : > { %v836_v6 = vrot.slane %v835_v61, 1  ;;  %v768_v8 = vadd.f32 %v767_v3, %v766_v0 }
 0x1c3   : > { %v837_v4 = vadd.f32 %v836_v6, %v835_v61 }
 0x1c5   : > { %v842_v9 = vsel %vm841_vm0, %v837_v4, 0.0 }
 0x1c6   : > { %v843_v10 = vsel %vm840_vm1, %v768_v8, %v842_v9 }
 0x1c7   : > { %844 = vst [vmem:[%s215_s26] sm:$0xff] %v843_v10 }
 0x1c8   : > { %1422 = shalt.err (!%p1419_p0)
}
 0x1c9   : > { %s1423_s6 = scalar_lea.hbm %s1872_s27, 128  ;;  %s1427_s8 = scalar_lea.hbm %s1919_s3, 256 }
 0x1ca   : > { %p1424_p5 = scmp.ne.s32.totalorder %s1872_s27, %s1423_s6  ;;  %p1428_p4 = scmp.lt.u32.totalorder %s1872_s27, %s1919_s3 }
 0x1cb   : > { %p1429_p6 = scmp.lt.u32.totalorder %s1427_s8, %s1423_s6  ;;  %p1431_p10 = scmp.lt.u32.totalorder %s1423_s6, %s1872_s27 }
 0x1cc   : > { %p1425_p11 = pnand %p1424_p5, %p1606_p12 }
 0x1cd   : > { %p1430_p8 = por %p1429_p6, %p1428_p4 }
 0x1ce   : > { %p1426_p1 = pneg %p1425_p11 }
 0x1cf   : > { %p1432_p13 = por %p1431_p10, %p1430_p8 }
 0x1d1   : > { %p1433_p3 = pnand %p1432_p13, %p1426_p1 }
 0x1d3   : > { %1436 = shalt.err (!%p1433_p3)
}
 0x1d4   : > { %1198 = dma.vmem_to_hbm [thread:$0]  (%p1606_p12), %s1874_s5, 128, %s1872_s27, %s851_s28  }
 0x1d5 PF: > { %s892_s20 = sand.u32 1, %s1471_s12   ;;  %p1934_p7 = scmp.ne.s32.totalorder %s1924_s19, 0 }
 0x1d6   : > { %p1935_p9 = scmp.ge.s32.totalorder %s1483_s15, 2  ;;  %s893_s4 = scalar_lea.sflag [#allocation4], %s892_s20 }
 0x1d8   : > { %p1210_p2 = pnand %p1935_p9, %p1934_p7 }
 0x1da   : > { %1462 = dma.done.wait (!%p1210_p2), %s893_s4, 4096  }
 0x1db   : > { %1464 = vsyncadd (!%p1210_p2), %s893_s4, 4294963200  ;;  %s902_s25 = scalar_lea.sflag [#allocation9], %s892_s20 }
 0x1dc   : > { %1466 = dma.done.wait (!%p1210_p2), %s902_s25, 128  }
 0x1dd   : > { %1468 = vsyncadd (!%p1210_p2), %s902_s25, 4294967168  ;;  %p21_p12 = scmp.ge.s32.totalorder %s1571_s24, 4   ;;  %s1936_s12 = smov %s1475_s13 }
 0x1de   : > { %s1937_s13 = smov %s1479_s14  ;;  %s1938_s14 = smov %s1602_s17 }
 0x1df   : > { %s1939_s15 = smov %s1571_s24  ;;  %23 = sbr.rel (!%p21_p12) target bundleno = 8 (0x8), region = 94 }
 0x1e6   :  { %907 = vsyncpa [#allocation3], 1 }
 0x1e7   :  { %909 = vsyncpa [#allocation3 + $0x1], 1 }
 0x1e8   :  { %910 = vsyncpa [#allocation6], 1 }
 0x1e9   :  { %911 = vsyncpa [#allocation4], 1 }
 0x1ea   :  { %913 = vsyncpa [#allocation4 + $0x1], 1 }
 0x1eb   :  { %914 = vsyncpa [#allocation9], 1 }
 0x1ec   :  { %916 = vsyncpa [#allocation9 + $0x1], 1 }

// kernel: generator_forward.16
= control target key start
LH: loop header
LB: loop body
LE: loop exit
PB: predicated region body
PF: predicated region fallthrough
CT: control target
= control target key end

     0   :  { %8 = vsyncpa [#allocation3], 0  ;;  %s1103_s0 = inlined_call_operand.hbm [shape: f32[512,128], index: 0, kind: input, shape index: {}]   ;;  %s1104_s1 = inlined_call_operand.vmem [shape: f32[1,128], index: 1, kind: input, shape index: {}]   ;;  %s1105_s2 = inlined_call_operand.vmem [shape: f32[1,128], index: 2, kind: input, shape index: {}]   ;;  %s1106_s3 = inlined_call_operand.vmem [shape: bf16[512,128], index: 3, kind: output, shape index: {}]  }
   0x1   :  { %10 = vsyncpa [#allocation3 + $0x1], 0  ;;  %s867_s12 = smov 0   ;;  %s869_s13 = smov 0  }
   0x2   :  { %s871_s14 = smov 0   ;;  %s873_s15 = smov 0  }
   0x3 LB: > { %s562_s16 = sadd.s32 4294967295, %s842_s15   ;;  %s887_s17 = sadd.s32 1, %s842_s15   ;;  %s842_s15 = sphi %s873_s15, %s1113_s15   ;;  %s838_s14 = sphi %s871_s14, %s1112_s14   ;;  %s834_s13 = sphi %s869_s13, %s1111_s13   ;;  %s830_s12 = sphi %s867_s12, %s1110_s12  }
   0x4   : > { %s20_s18 = ssub.s32 %s842_s15, %s887_s17  ;;  %s23_s19 = sadd.s32 1, %s838_s14 }
   0x5   : > { %p21_p0 = scmp.eq.s32.totalorder %s20_s18, 0  ;;  %p30_p1 = scmp.ne.s32.totalorder %s838_s14, %s834_s13 }
   0x6   : > { %p31_p2 = scmp.eq.s32.totalorder %s842_s15, 0  ;;  %p36_p3 = scmp.ne.s32.totalorder %s834_s13, %s830_s12 }
   0x7   : > { %s897_s20 = scalar_select %p21_p0, %s838_s14, %s23_s19  }
   0x8   : > { %p32_p4 = por %p31_p2, %p30_p1  ;;  %p37_p5 = scmp.eq.s32.totalorder %s562_s16, 0 }
   0x9   : > { %p743_p6 = scmp.lt.s32.totalorder %s842_s15, 2  ;;  %s134_s22 = sand.u32 1, %s838_s14  }
   0xa   : > { %p902_p7 = por %p37_p5, %p36_p3  ;;  %s566_s23 = sshll.u32 %s134_s22, 8 }
   0xb   : > { %s609_s24 = sshll.u32 %s842_s15, 12  ;;  %s138_s28 = scalar_lea.vmem [#allocation2], %s566_s23 }
   0xc   : > { %s911_s27 = scalar_lea.hbm %s1103_s0, %s609_s24  ;;  %s145_s29 = sshll.u32 %s138_s28, 4  ;;  %s913_s29 = int_to_ptr.vmem [resolvable:$true] %s145_s29 }
   0xd   : > { %p915_p8 = pnand %p743_p6, %p32_p4  ;;  %s920_s4 = scalar_lea.sflag [#allocation3], %s134_s22 }
   0xe   : > { %s778_s5 = scalar_lea.hbm %s911_s27, 4096  ;;  %s783_s8 = scalar_lea.hbm %s1103_s0, 8192 }
   0xf   : > { %p779_p10 = scmp.ne.s32.totalorder %s911_s27, %s778_s5  ;;  %p780_p11 = pneg %p915_p8 }
  0x10   : > { %p784_p0 = scmp.lt.u32.totalorder %s911_s27, %s1103_s0  ;;  %p785_p1 = scmp.lt.u32.totalorder %s783_s8, %s778_s5 }
  0x11   : > { %p781_p12 = pnand %p780_p11, %p779_p10  ;;  %p787_p3 = scmp.lt.u32.totalorder %s778_s5, %s911_s27 }
  0x12   : > { %p786_p2 = por %p785_p1, %p784_p0 }
  0x13   : > { %p782_p13 = pneg %p781_p12 }
  0x14   : > { %p788_p4 = por %p787_p3, %p786_p2 }
  0x16   : > { %p789_p5 = pnand %p788_p4, %p782_p13 }
  0x18   : > { %792 = shalt.err (!%p789_p5)
}
  0x19   : > { %s793_s11 = scalar_lea.vmem %s913_s29, 4096  ;;  %s844_s12 = smov [#allocation2]  }
  0x1a   : > { %p794_p6 = scmp.ne.s32.totalorder %s913_s29, %s793_s11  ;;  %s798_s18 = sshll.u32 %s844_s12, 4  ;;  %s799_s18 = int_to_ptr.vmem [resolvable:$false] %s798_s18 }
  0x1b   : > { %s800_s19 = scalar_lea.vmem %s799_s18, 8192  ;;  %p801_p9 = scmp.lt.s32.totalorder %s913_s29, %s799_s18 }
  0x1c   : > { %p796_p10 = pnand %p794_p6, %p780_p11  ;;  %p802_p0 = scmp.lt.s32.totalorder %s800_s19, %s793_s11 }
  0x1e   : > { %p797_p12 = pneg %p796_p10  ;;  %p803_p1 = por %p802_p0, %p801_p9 }
  0x20   : > { %p804_p2 = pnand %p803_p1, %p797_p12 }
  0x22   : > { %807 = shalt.err (!%p804_p2)
}
  0x23   : > { %s845_s22 = smov 128   ;;  %s846_s23 = smov 8  }
  0x24   : > { %742 = dma.hbm_to_vmem [thread:$0]  (!%p915_p8), %s911_s27, 4096, %s913_s29, %s920_s4, %s845_s22, %s845_s22, %s846_s23  }
  0x25   : > { %p153_p11 = scmp.lt.s32.totalorder %s842_s15, 3  ;;  %p1109_p13 = scmp.ge.s32.totalorder %s842_s15, 1 }
  0x27   : > { %p154_p3 = pnand %p1109_p13, %p153_p11 }
  0x28   : > { %s159_s24 = sand.u32 (!%p154_p3), 1, %s834_s13  }
  0x29   : > { %157 = sbr.rel (%p154_p3) target bundleno = 85 (0x55), region = 32  ;;  %s570_s25 = sshll.u32 (!%p154_p3), %s159_s24, 8 }
  0x2a   : > { %s160_s26 = scalar_lea.sflag (!%p154_p3), [#allocation3], %s159_s24  ;;  %s952_s28 = scalar_lea.vmem (!%p154_p3), [#allocation2], %s570_s25 }
  0x30   : > { %825 = dma.done.wait (%p902_p7), %s160_s26, 4096  }
  0x31   : > { %827 = vsyncadd (%p902_p7), %s160_s26, 4294963200  ;;  %s571_s27 = sshll.u32 %s562_s16, 5  ;;  %v193_v0 = vld [vmem:[%s952_s28] sm:$0xff]  ;;  %v194_v1 = vld [vmem:[%s952_s28 + $0x8] sm:$0xff] }
  0x32   : > { %p188_p8 = scmp.lt.s32.totalorder %s571_s27, 63  ;;  %v967_v2 = vld [vmem:[%s1104_s1] ss:$0 sm:$0xff]  ;;  %v195_v6 = vld [vmem:[%s952_s28 + $0x10] sm:$0xff]  ;;  %v196_v7 = vld [vmem:[%s952_s28 + $0x18] sm:$0xff] }
  0x33   : > { %v232_v3 = vmul.f32 %v967_v2, %v193_v0  ;;  %v233_v4 = vmul.f32 %v967_v2, %v194_v1  ;;  %v974_v5 = vld [vmem:[%s1105_s2] ss:$0 sm:$0xff]  ;;  %v234_v8 = vmul.f32 %v967_v2, %v195_v6  ;;  %v235_v9 = vmul.f32 %v967_v2, %v196_v7  ;;  %v198_v11 = vld [vmem:[%s952_s28 + $0x28] sm:$0xff]  ;;  %v199_v12 = vld [vmem:[%s952_s28 + $0x30] sm:$0xff] }
  0x34   : > { %s1115_s27 = smov (!%p188_p8, %s571_s27), 63  ;;  %v197_v10 = vld [vmem:[%s952_s28 + $0x20] sm:$0xff]  ;;  %v237_v16 = vmul.f32 %v967_v2, %v198_v11  ;;  %v200_v17 = vld [vmem:[%s952_s28 + $0x38] sm:$0xff]  ;;  %v238_v20 = vmul.f32 %v967_v2, %v199_v12  ;;  %v202_v27 = vld [vmem:[%s952_s28 + $0x48] sm:$0xff] }
  0x35   : > { %s572_s16 = sshll.u32 %s1115_s27, 2  ;;  %v271_v13 = vadd.f32 %v974_v5, %v232_v3  ;;  %v272_v14 = vadd.f32 %v974_v5, %v233_v4  ;;  %v236_v15 = vmul.f32 %v967_v2, %v197_v10  ;;  %v273_v18 = vadd.f32 %v974_v5, %v234_v8  ;;  %v201_v22 = vld [vmem:[%s952_s28 + $0x40] sm:$0xff]  ;;  %v203_v32 = vld [vmem:[%s952_s28 + $0x50] sm:$0xff]  ;;  %v204_v33 = vld [vmem:[%s952_s28 + $0x58] sm:$0xff] }
  0x36   : > { %v274_v19 = vadd.f32 %v974_v5, %v235_v9  ;;  %v239_v21 = vmul.f32 %v967_v2, %v200_v17  ;;  %v276_v26 = vadd.f32 %v974_v5, %v237_v16  ;;  %s1000_s6 = scalar_lea.vmem %s1106_s3, %s572_s16  ;;  %v277_v30 = vadd.f32 %v974_v5, %v238_v20  ;;  %v205_v38 = vld [vmem:[%s952_s28 + $0x60] sm:$0xff]  ;;  %v206_v39 = vld [vmem:[%s952_s28 + $0x68] sm:$0xff]  ;;  %v207_v44 = vld [vmem:[%s952_s28 + $0x70] sm:$0xff] }
  0x37   : > { %v303_v23 = vmax.f32 %v271_v13, 0.0  ;;  %v304_v24 = vmax.f32 %v272_v14, 0.0  ;;  %v275_v25 = vadd.f32 %v974_v5, %v236_v15  ;;  %v305_v28 = vmax.f32 %v273_v18, 0.0  ;;  %v208_v49 = vld [vmem:[%s952_s28 + $0x78] sm:$0xff]  ;;  %v209_v54 = vld [vmem:[%s952_s28 + $0x80] sm:$0xff]  ;;  %v210_v63 = vld [vmem:[%s952_s28 + $0x88] sm:$0xff] }
  0x38   : > { %v306_v29 = vmax.f32 %v274_v19, 0.0  ;;  %v278_v31 = vadd.f32 %v974_v5, %v239_v21  ;;  %v308_v36 = vmax.f32 %v276_v26, 0.0  ;;  %v240_v37 = vmul.f32 %v967_v2, %v201_v22  ;;  %v211_v6 = vld [vmem:[%s952_s28 + $0x90] sm:$0xff]  ;;  %v212_v7 = vld [vmem:[%s952_s28 + $0x98] sm:$0xff]  ;;  %v213_v12 = vld [vmem:[%s952_s28 + $0xa0] sm:$0xff] }
  0x39   : > { %v645_v34 = vpack.c.bf16 %v304_v24, %v303_v23  ;;  %v307_v35 = vmax.f32 %v275_v25, 0.0  ;;  %v309_v41 = vmax.f32 %v277_v30, 0.0  ;;  %v241_v43 = vmul.f32 %v967_v2, %v202_v27  ;;  %v214_v13 = vld [vmem:[%s952_s28 + $0xa8] sm:$0xff]  ;;  %v215_v18 = vld [vmem:[%s952_s28 + $0xb0] sm:$0xff]  ;;  %v216_v23 = vld [vmem:[%s952_s28 + $0xb8] sm:$0xff] }
  0x3a   : > { %v650_v40 = vpack.c.bf16 %v306_v29, %v305_v28  ;;  %v310_v42 = vmax.f32 %v278_v31, 0.0  ;;  %v279_v46 = vadd.f32 %v974_v5, %v240_v37  ;;  %v242_v47 = vmul.f32 %v967_v2, %v203_v32  ;;  %v217_v28 = vld [vmem:[%s952_s28 + $0xc0] sm:$0xff]  ;;  %v218_v37 = vld [vmem:[%s952_s28 + $0xc8] sm:$0xff] }
  0x3b   : > { %646 = vst [vmem:[%s1000_s6] sm:$0xff] %v645_v34   ;;  %v655_v45 = vpack.c.bf16 %v308_v36, %v307_v35  ;;  %v243_v48 = vmul.f32 %v967_v2, %v204_v33  ;;  %v280_v51 = vadd.f32 %v974_v5, %v241_v43  ;;  %v244_v52 = vmul.f32 %v967_v2, %v205_v38  ;;  %v220_v43 = vld [vmem:[%s952_s28 + $0xd8] sm:$0xff] }
  0x3c   : > { %722 = vst [vmem:[%s1000_s6 + $0x8] sm:$0xff] %v650_v40   ;;  %v660_v50 = vpack.c.bf16 %v310_v42, %v309_v41  ;;  %v245_v53 = vmul.f32 %v967_v2, %v206_v39  ;;  %v311_v55 = vmax.f32 %v279_v46, 0.0  ;;  %v281_v56 = vadd.f32 %v974_v5, %v242_v47  ;;  %v219_v42 = vld [vmem:[%s952_s28 + $0xd0] sm:$0xff] }
  0x3d   : > { %723 = vst [vmem:[%s1000_s6 + $0x10] sm:$0xff] %v655_v45   ;;  %v282_v57 = vadd.f32 %v974_v5, %v243_v48  ;;  %v246_v58 = vmul.f32 %v967_v2, %v207_v44  ;;  %v312_v59 = vmax.f32 %v280_v51, 0.0  ;;  %v283_v60 = vadd.f32 %v974_v5, %v244_v52  ;;  %v221_v48 = vld [vmem:[%s952_s28 + $0xe0] sm:$0xff] }
  0x3e   : > { %724 = vst [vmem:[%s1000_s6 + $0x18] sm:$0xff] %v660_v50   ;;  %v284_v61 = vadd.f32 %v974_v5, %v245_v53  ;;  %v247_v62 = vmul.f32 %v967_v2, %v208_v49  ;;  %v313_v0 = vmax.f32 %v281_v56, 0.0  ;;  %v248_v4 = vmul.f32 %v967_v2, %v209_v54  ;;  %v222_v49 = vld [vmem:[%s952_s28 + $0xe8] sm:$0xff]  ;;  %v223_v54 = vld [vmem:[%s952_s28 + $0xf0] sm:$0xff] }
  0x3f   : > { %v314_v1 = vmax.f32 %v282_v57, 0.0  ;;  %v285_v3 = vadd.f32 %v974_v5, %v246_v58  ;;  %v665_v8 = vpack.c.bf16 %v312_v59, %v311_v55  ;;  %v315_v9 = vmax.f32 %v283_v60, 0.0  ;;  %v224_v59 = vld [vmem:[%s952_s28 + $0xf8] sm:$0xff] }
  0x40   : > { %v316_v10 = vmax.f32 %v284_v61, 0.0  ;;  %v286_v11 = vadd.f32 %v974_v5, %v247_v62  ;;  %v249_v16 = vmul.f32 %v967_v2, %v210_v63  ;;  %v287_v17 = vadd.f32 %v974_v5, %v248_v4 }
  0x41   : > { %v670_v14 = vpack.c.bf16 %v314_v1, %v313_v0  ;;  %v317_v15 = vmax.f32 %v285_v3, 0.0  ;;  %725 = vst [vmem:[%s1000_s6 + $0x20] sm:$0xff] %v665_v8   ;;  %v250_v21 = vmul.f32 %v967_v2, %v211_v6  ;;  %v251_v22 = vmul.f32 %v967_v2, %v212_v7 }
  0x42   : > { %v675_v19 = vpack.c.bf16 %v316_v10, %v315_v9  ;;  %v318_v20 = vmax.f32 %v286_v11, 0.0  ;;  %v288_v24 = vadd.f32 %v974_v5, %v249_v16  ;;  %v319_v25 = vmax.f32 %v287_v17, 0.0 }
  0x43   : > { %726 = vst [vmem:[%s1000_s6 + $0x28] sm:$0xff] %v670_v14   ;;  %v252_v26 = vmul.f32 %v967_v2, %v213_v12  ;;  %v253_v27 = vmul.f32 %v967_v2, %v214_v13  ;;  %v289_v30 = vadd.f32 %v974_v5, %v250_v21  ;;  %v290_v31 = vadd.f32 %v974_v5, %v251_v22 }
  0x44   : > { %727 = vst [vmem:[%s1000_s6 + $0x30] sm:$0xff] %v675_v19   ;;  %v680_v29 = vpack.c.bf16 %v318_v20, %v317_v15  ;;  %v254_v32 = vmul.f32 %v967_v2, %v215_v18  ;;  %v320_v33 = vmax.f32 %v288_v24, 0.0  ;;  %v255_v36 = vmul.f32 %v967_v2, %v216_v23 }
  0x45   : > { %v291_v34 = vadd.f32 %v974_v5, %v252_v26  ;;  %v292_v35 = vadd.f32 %v974_v5, %v253_v27  ;;  %v321_v38 = vmax.f32 %v289_v30, 0.0  ;;  %v322_v39 = vmax.f32 %v290_v31, 0.0 }
  0x46   : > { %728 = vst [vmem:[%s1000_s6 + $0x38] sm:$0xff] %v680_v29   ;;  %v293_v40 = vadd.f32 %v974_v5, %v254_v32  ;;  %v256_v41 = vmul.f32 %v967_v2, %v217_v28  ;;  %v685_v44 = vpack.c.bf16 %v320_v33, %v319_v25  ;;  %v294_v47 = vadd.f32 %v974_v5, %v255_v36 }
  0x47   : > { %v323_v45 = vmax.f32 %v291_v34, 0.0  ;;  %v324_v46 = vmax.f32 %v292_v35, 0.0  ;;  %v690_v50 = vpack.c.bf16 %v322_v39, %v321_v38  ;;  %v257_v52 = vmul.f32 %v967_v2, %v218_v37 }
  0x48   : > { %v325_v51 = vmax.f32 %v293_v40, 0.0  ;;  %v295_v53 = vadd.f32 %v974_v5, %v256_v41  ;;  %729 = vst [vmem:[%s1000_s6 + $0x40] sm:$0xff] %v685_v44   ;;  %v326_v56 = vmax.f32 %v294_v47, 0.0  ;;  %v258_v57 = vmul.f32 %v967_v2, %v219_v42 }
  0x49   : > { %v695_v55 = vpack.c.bf16 %v324_v46, %v323_v45  ;;  %v259_v58 = vmul.f32 %v967_v2, %v220_v43  ;;  %730 = vst [vmem:[%s1000_s6 + $0x48] sm:$0xff] %v690_v50   ;;  %v296_v60 = vadd.f32 %v974_v5, %v257_v52  ;;  %v260_v62 = vmul.f32 %v967_v2, %v221_v48 }
  0x4a   : > { %v327_v61 = vmax.f32 %v295_v53, 0.0  ;;  %v261_v63 = vmul.f32 %v967_v2, %v222_v49  ;;  %v700_v0 = vpack.c.bf16 %v326_v56, %v325_v51  ;;  %v297_v1 = vadd.f32 %v974_v5, %v258_v57 }
  0x4b   : > { %731 = vst [vmem:[%s1000_s6 + $0x50] sm:$0xff] %v695_v55   ;;  %v298_v3 = vadd.f32 %v974_v5, %v259_v58  ;;  %v262_v4 = vmul.f32 %v967_v2, %v223_v54  ;;  %v328_v6 = vmax.f32 %v296_v60, 0.0  ;;  %v299_v7 = vadd.f32 %v974_v5, %v260_v62 }
  0x4c   : > { %v300_v8 = vadd.f32 %v974_v5, %v261_v63  ;;  %v263_v9 = vmul.f32 %v967_v2, %v224_v59  ;;  %732 = vst [vmem:[%s1000_s6 + $0x58] sm:$0xff] %v700_v0   ;;  %v329_v10 = vmax.f32 %v297_v1, 0.0 }
  0x4d   : > { %v330_v11 = vmax.f32 %v298_v3, 0.0  ;;  %v301_v12 = vadd.f32 %v974_v5, %v262_v4  ;;  %v705_v13 = vpack.c.bf16 %v328_v6, %v327_v61  ;;  %v331_v14 = vmax.f32 %v299_v7, 0.0 }
  0x4e   : > { %v332_v15 = vmax.f32 %v300_v8, 0.0  ;;  %v302_v16 = vadd.f32 %v974_v5, %v263_v9 }
  0x4f   : > { %v710_v17 = vpack.c.bf16 %v330_v11, %v329_v10  ;;  %v333_v18 = vmax.f32 %v301_v12, 0.0  ;;  %733 = vst [vmem:[%s1000_s6 + $0x60] sm:$0xff] %v705_v13  }
  0x50   : > { %v715_v19 = vpack.c.bf16 %v332_v15, %v331_v14  ;;  %v334_v20 = vmax.f32 %v302_v16, 0.0 }
  0x51   : > { %734 = vst [vmem:[%s1000_s6 + $0x68] sm:$0xff] %v710_v17  }
  0x52   : > { %735 = vst [vmem:[%s1000_s6 + $0x70] sm:$0xff] %v715_v19   ;;  %v720_v21 = vpack.c.bf16 %v334_v20, %v333_v18 }
  0x54   : > { %736 = vst [vmem:[%s1000_s6 + $0x78] sm:$0xff] %v720_v21  }
  0x55 PF: > { %p13_p7 = scmp.ge.s32.totalorder %s887_s17, 4   ;;  %s1110_s12 = smov %s834_s13 }
  0x56   : > { %s1111_s13 = smov %s838_s14  ;;  %s1112_s14 = smov %s897_s20 }
  0x57   : > { %s1113_s15 = smov %s887_s17  ;;  %15 = sbr.rel (!%p13_p7) target bundleno = 3 (0x3), region = 72 }
  0x5e   :  { %517 = vsyncpa [#allocation3], 1 }
  0x5f   :  { %519 = vsyncpa [#allocation3 + $0x1], 1 }

// kernel: generator_forward.17
= control target key start
LH: loop header
LB: loop body
LE: loop exit
PB: predicated region body
PF: predicated region fallthrough
CT: control target
= control target key end

     0   :  { %7 = vsyncpa [#allocation3], 0  ;;  %s1889_s0 = inlined_call_operand.hbm [shape: bf16[2048,128], index: 0, kind: input, shape index: {}]   ;;  %s1890_s1 = inlined_call_operand.hbm [shape: bf16[128,128], index: 1, kind: input, shape index: {}]   ;;  %s1891_s2 = inlined_call_operand.hbm [shape: f32[2048,128], index: 2, kind: output, shape index: {}]  }
   0x1   :  { %9 = vsyncpa [#allocation3 + $0x1], 0 }
   0x2   :  { %10 = vsyncpa [#allocation6], 0 }
   0x3   :  { %11 = vsyncpa [#allocation4], 0 }
   0x4   :  { %13 = vsyncpa [#allocation4 + $0x1], 0  ;;  %s1589_s9 = smov 0   ;;  %s1591_s10 = smov 0  }
   0x5   :  { %s1593_s11 = smov 0   ;;  %s1595_s12 = smov 0  }
   0x6 LB: > { %s1610_s13 = sadd.s32 4294967295, %s1565_s12   ;;  %s1014_s14 = sadd.s32 4294967294, %s1565_s12   ;;  %s1565_s12 = sphi %s1595_s12, %s1910_s12   ;;  %s1561_s11 = sphi %s1593_s11, %s1909_s11   ;;  %s1557_s10 = sphi %s1591_s10, %s1908_s10   ;;  %s1553_s9 = sphi %s1589_s9, %s1907_s9  }
   0x7   : > { %p39_p0 = scmp.ne.s32.totalorder %s1557_s10, %s1553_s9  ;;  %p1892_p1 = scmp.eq.s32.totalorder %s1610_s13, 0 }
   0x8   : > { %p90_p3 = scmp.eq.s32.totalorder %s1014_s14, 3  ;;  %p1015_p5 = scmp.ge.s32.totalorder %s1565_s12, 1 }
   0x9   : > { %p1619_p4 = por %p1892_p1, %p39_p0  ;;  %p97_p7 = scmp.lt.s32.totalorder %s1565_s12, 5 }
   0xa   : > { %p1624_p6 = por %p90_p3, %p39_p0  ;;  %s1567_s18 = smov [#allocation5]  }
   0xb   : > { %s1895_s15 = scalar_select %p1619_p4, 1, 0 }
   0xc   : > { %s1896_s16 = scalar_select %p1624_p6, 1, 0 }
   0xd   : > { %p1629_p8 = pnand %p1015_p5, %p97_p7  ;;  %s109_s19 = sshll.u32 %s1567_s18, 4  ;;  %s110_s19 = int_to_ptr.vmem [resolvable:$true] %s109_s19 }
   0xe   : > { %s1642_s21 = sadd.s32 1, %s1565_s12   ;;  %s26_s22 = sadd.s32 1, %s1561_s11 }
   0xf   : > { %s1897_s17 = scalar_select %p1629_p8, 1, 0 }
  0x10   : > { %p1216_p9 = pneg %p1629_p8  ;;  %s23_s23 = ssub.s32 %s1565_s12, %s1642_s21 }
  0x11   : > { %s1437_s26 = scalar_lea.hbm %s1890_s1, 1024 }
  0x12   : > { %p1637_p10 = pnand %p1216_p9, %p1892_p1  ;;  %p1438_p11 = scmp.ne.s32.totalorder %s1890_s1, %s1437_s26 }
  0x13   : > { %p1444_p3 = scmp.lt.u32.totalorder %s1437_s26, %s1890_s1 }
  0x14   : > { %p1439_p12 = pneg %p1637_p10 }
  0x16   : > { %p1440_p13 = pnand %p1439_p12, %p1438_p11 }
  0x18   : > { %p1441_p0 = pneg %p1440_p13 }
  0x1a   : > { %p1446_p5 = pnand %p1444_p3, %p1441_p0 }
  0x1c   : > { %1449 = shalt.err (!%p1446_p5)
}
  0x1d   : > { %s1450_s3 = scalar_lea.vmem %s110_s19, 1024  ;;  %p1458_p2 = scmp.lt.s32.totalorder %s110_s19, %s110_s19 }
  0x1e   : > { %p1451_p7 = scmp.ne.s32.totalorder %s110_s19, %s1450_s3  ;;  %p1459_p6 = scmp.lt.s32.totalorder %s1450_s3, %s1450_s3 }
  0x20   : > { %p1453_p9 = pnand %p1451_p7, %p1439_p12  ;;  %p1460_p4 = por %p1459_p6, %p1458_p2 }
  0x22   : > { %p1454_p1 = pneg %p1453_p9 }
  0x24   : > { %p1461_p8 = pnand %p1460_p4, %p1454_p1 }
  0x26   : > { %1464 = shalt.err (!%p1461_p8)
}
  0x27   : > { %s1568_s4 = smov 64   ;;  %s1569_s5 = smov 4  }
  0x28   : > { %1219 = dma.hbm_to_vmem [thread:$0]  (!%p1637_p10), %s1890_s1, 1024, %s110_s19, [#allocation6], %s1568_s4, %s1568_s4, %s1569_s5  }
  0x29   : > { %p24_p1 = scmp.eq.s32.totalorder %s23_s23, 0  ;;  %p33_p2 = scmp.ne.s32.totalorder %s1561_s11, %s1557_s10 }
  0x2a   : > { %p34_p4 = scmp.eq.s32.totalorder %s1565_s12, 0  ;;  %p1229_p6 = scmp.lt.s32.totalorder %s1565_s12, 4 }
  0x2b   : > { %s1671_s8 = scalar_select %p24_p1, %s1561_s11, %s26_s22  }
  0x2c   : > { %p35_p8 = por %p34_p4, %p33_p2  ;;  %p1899_p11 = scmp.eq.s32.totalorder %s1610_s13, 3 }
  0x2d   : > { %s123_s18 = sand.u32 1, %s1561_s11   ;;  %s1070_s20 = sshll.u32 %s1565_s12, 12 }
  0x2e   : > { %p1675_p12 = por %p1899_p11, %p33_p2  ;;  %s1018_s24 = sshll.u32 %s123_s18, 8 }
  0x2f   : > { %s1684_s27 = scalar_lea.hbm %s1889_s0, %s1070_s20  ;;  %s127_s19 = scalar_lea.vmem [#allocation2], %s1018_s24 }
  0x30   : > { %s134_s22 = sshll.u32 %s127_s19, 4  ;;  %p1686_p10 = pnand %p1229_p6, %p35_p8  ;;  %s1690_s22 = int_to_ptr.vmem [resolvable:$true] %s134_s22 }
  0x31   : > { %s1692_s28 = scalar_lea.sflag [#allocation3], %s123_s18  ;;  %s1465_s29 = scalar_lea.hbm %s1684_s27, 4096 }
  0x32   : > { %p1466_p13 = scmp.ne.s32.totalorder %s1684_s27, %s1465_s29  ;;  %p1467_p0 = pneg %p1686_p10 }
  0x33   : > { %s1470_s6 = scalar_lea.hbm %s1889_s0, 16384  ;;  %p1471_p7 = scmp.lt.u32.totalorder %s1684_s27, %s1889_s0 }
  0x34   : > { %p1468_p3 = pnand %p1467_p0, %p1466_p13  ;;  %p1472_p9 = scmp.lt.u32.totalorder %s1470_s6, %s1465_s29 }
  0x35   : > { %p1474_p2 = scmp.lt.u32.totalorder %s1465_s29, %s1684_s27 }
  0x36   : > { %p1469_p5 = pneg %p1468_p3  ;;  %p1473_p1 = por %p1472_p9, %p1471_p7 }
  0x38   : > { %p1475_p4 = por %p1474_p2, %p1473_p1 }
  0x3a   : > { %p1476_p6 = pnand %p1475_p4, %p1469_p5 }
  0x3c   : > { %1479 = shalt.err (!%p1476_p6)
}
  0x3d   : > { %s1480_s18 = scalar_lea.vmem %s1690_s22, 4096  ;;  %s1570_s24 = smov [#allocation2]  }
  0x3e   : > { %p1481_p8 = scmp.ne.s32.totalorder %s1690_s22, %s1480_s18  ;;  %s1485_s25 = sshll.u32 %s1570_s24, 4  ;;  %s1486_s25 = int_to_ptr.vmem [resolvable:$false] %s1485_s25 }
  0x3f   : > { %s1487_s26 = scalar_lea.vmem %s1486_s25, 8192  ;;  %p1488_p3 = scmp.lt.s32.totalorder %s1690_s22, %s1486_s25 }
  0x40   : > { %p1483_p11 = pnand %p1481_p8, %p1467_p0  ;;  %p1489_p7 = scmp.lt.s32.totalorder %s1487_s26, %s1480_s18 }
  0x42   : > { %p1484_p13 = pneg %p1483_p11  ;;  %p1490_p9 = por %p1489_p7, %p1488_p3 }
  0x44   : > { %p1491_p1 = pnand %p1490_p9, %p1484_p13 }
  0x46   : > { %1494 = shalt.err (!%p1491_p1)
}
  0x47   : > { %1223 = dma.hbm_to_vmem [thread:$0]  (!%p1686_p10), %s1684_s27, 4096, %s1690_s22, %s1692_s28, %s1568_s4, %s1568_s4, %s1569_s5  }
  0x48   : > { %p1902_p0 = scmp.ne.s32.totalorder %s1897_s17, 0 }
  0x49   : > { %s1726_s19 = sand.u32 (!%p1902_p0), 1, %s1557_s10   ;;  %p1903_p5 = scmp.ne.s32.totalorder (!%p1902_p0), %s1895_s15, 0 }
  0x4a   : > { %146 = sbr.rel (%p1902_p0) target bundleno = 422 (0x1a6), region = 28  ;;  %s1022_s29 = sshll.u32 (!%p1902_p0), %s1726_s19, 8 }
  0x4b   : > { %s149_s30 = scalar_lea.sflag (!%p1902_p0), [#allocation3], %s1726_s19  ;;  %s1730_s3 = scalar_lea.vmem (!%p1902_p0), [#allocation2], %s1022_s29 }
  0x51   : > { %1540 = dma.done.wait (%p1903_p5), %s149_s30, 4096  }
  0x52   : > { %1542 = vsyncadd (%p1903_p5), %s149_s30, 4294963200  ;;  %p1904_p10 = scmp.eq.s32.totalorder %s1610_s13, 0 }
  0x54   : > { %1544 = dma.done.wait (%p1904_p10), [#allocation6], 1024   ;;  %p1905_p2 = pmov %p1904_p10 }
  0x55   : > { %v1269_v0 = vld [vmem:[#allocation5] sm:$0xff]   ;;  %v1270_v1 = vld [vmem:[#allocation5 + $0x8] sm:$0xff]   ;;  %v1271_v2 = vld [vmem:[#allocation5 + $0x10] sm:$0xff]   ;;  %s1024_s15 = sshll.u32 %s1726_s19, 9  ;;  %s1071_s4 = sshll.u32 %s1610_s13, 13 }
  0x56   : > { %1546 = vsyncadd (%p1905_p2), [#allocation6], 4294966272  ;;  %1112 = vmatprep.subr.bf16.mxu0 %v1269_v0  ;;  %1192 = vmatprep.subr.bf16.mxu1 %v1269_v0  ;;  %v1272_v3 = vld [vmem:[#allocation5 + $0x18] sm:$0xff]   ;;  %v1277_v4 = vld [vmem:[%s1730_s3] sm:$0xff]   ;;  %s1773_s17 = scalar_lea.vmem [#allocation7], %s1024_s15  ;;  %s1841_s23 = scalar_lea.hbm %s1891_s2, %s1071_s4 }
  0x57   : > { %1113 = vmatpush3.bf16.msra.mxu0 %v1269_v0  ;;  %1200 = vmatpush3.bf16.msra.mxu1 %v1269_v0  ;;  %v1278_v5 = vld [vmem:[%s1730_s3 + $0x80] sm:$0xff]   ;;  %v1274_v7 = vld [vmem:[#allocation5 + $0x28] sm:$0xff]   ;;  %v1275_v8 = vld [vmem:[#allocation5 + $0x30] sm:$0xff]   ;;  %s931_s5 = sshll.u32 %s1773_s17, 4  ;;  %s918_s13 = scalar_lea.sflag [#allocation4], %s1726_s19  ;;  %s1843_s5 = int_to_ptr.vmem [resolvable:$true] %s931_s5 }
  0x58   : > { %1114 = vmatprep.subr.bf16.mxu0 %v1270_v1  ;;  %1193 = vmatprep.subr.bf16.mxu1 %v1270_v1  ;;  %v1273_v6 = vld [vmem:[#allocation5 + $0x20] sm:$0xff]   ;;  %v1276_v9 = vld [vmem:[#allocation5 + $0x38] sm:$0xff]   ;;  %v1279_v10 = vld [vmem:[%s1730_s3 + $0x8] sm:$0xff]   ;;  %s1495_s28 = scalar_lea.vmem %s1843_s5, 8192  ;;  %s1571_s6 = smov [#allocation7]  }
  0x59   : > { %1128 = vmatprep.mubr.bf16.mxu0 %v1277_v4  ;;  %1160 = vmatprep.mubr.bf16.mxu1 %v1278_v5  ;;  %v1280_v11 = vld [vmem:[%s1730_s3 + $0x88] sm:$0xff]   ;;  %v1281_v12 = vld [vmem:[%s1730_s3 + $0x10] sm:$0xff]   ;;  %v1283_v14 = vld [vmem:[%s1730_s3 + $0x18] sm:$0xff]   ;;  %p1496_p4 = scmp.ne.s32.totalorder %s1843_s5, %s1495_s28  ;;  %s1499_s7 = sshll.u32 %s1571_s6, 4  ;;  %s1500_s7 = int_to_ptr.vmem [resolvable:$false] %s1499_s7 }
  0x5a   : > { %v1282_v13 = vld [vmem:[%s1730_s3 + $0x90] sm:$0xff]   ;;  %v1284_v15 = vld [vmem:[%s1730_s3 + $0x98] sm:$0xff]   ;;  %v1285_v16 = vld [vmem:[%s1730_s3 + $0x20] sm:$0xff]   ;;  %s1501_s20 = scalar_lea.vmem %s1500_s7, 16384  ;;  %p1502_p11 = scmp.lt.s32.totalorder %s1843_s5, %s1500_s7 }
  0x5b   : > { %1115 = vmatpush3.bf16.msra.mxu0 %v1270_v1  ;;  %1201 = vmatpush3.bf16.msra.mxu1 %v1270_v1  ;;  %v1286_v17 = vld [vmem:[%s1730_s3 + $0xa0] sm:$0xff]   ;;  %v1287_v18 = vld [vmem:[%s1730_s3 + $0x28] sm:$0xff]   ;;  %v1289_v20 = vld [vmem:[%s1730_s3 + $0x30] sm:$0xff]   ;;  %p1497_p6 = pnand %p1496_p4, %p1675_p12  ;;  %p1503_p13 = scmp.lt.s32.totalorder %s1501_s20, %s1495_s28 }
  0x5c   : > { %1116 = vmatprep.subr.bf16.mxu0 %v1271_v2  ;;  %1194 = vmatprep.subr.bf16.mxu1 %v1271_v2  ;;  %v1288_v19 = vld [vmem:[%s1730_s3 + $0xa8] sm:$0xff]   ;;  %v1290_v21 = vld [vmem:[%s1730_s3 + $0xb0] sm:$0xff]   ;;  %v1291_v22 = vld [vmem:[%s1730_s3 + $0x38] sm:$0xff]  }
  0x5d   : > { %v1292_v23 = vld [vmem:[%s1730_s3 + $0xb8] sm:$0xff]   ;;  %v1293_v24 = vld [vmem:[%s1730_s3 + $0x40] sm:$0xff]   ;;  %v1295_v26 = vld [vmem:[%s1730_s3 + $0x48] sm:$0xff]   ;;  %p1498_p8 = pneg %p1497_p6  ;;  %p1504_p3 = por %p1503_p13, %p1502_p11 }
  0x5e   : > { %v1294_v25 = vld [vmem:[%s1730_s3 + $0xc0] sm:$0xff]   ;;  %v1296_v27 = vld [vmem:[%s1730_s3 + $0xc8] sm:$0xff]   ;;  %v1297_v28 = vld [vmem:[%s1730_s3 + $0x50] sm:$0xff]  }
  0x5f   : > { %1117 = vmatpush3.bf16.msra.mxu0 %v1271_v2  ;;  %1202 = vmatpush3.bf16.msra.mxu1 %v1271_v2  ;;  %v1298_v29 = vld [vmem:[%s1730_s3 + $0xd0] sm:$0xff]   ;;  %v1299_v30 = vld [vmem:[%s1730_s3 + $0x58] sm:$0xff]   ;;  %v1301_v32 = vld [vmem:[%s1730_s3 + $0x60] sm:$0xff]   ;;  %p1505_p7 = pnand %p1504_p3, %p1498_p8 }
  0x60   : > { %1118 = vmatprep.subr.bf16.mxu0 %v1272_v3  ;;  %1195 = vmatprep.subr.bf16.mxu1 %v1272_v3  ;;  %v1300_v31 = vld [vmem:[%s1730_s3 + $0xd8] sm:$0xff]   ;;  %v1302_v33 = vld [vmem:[%s1730_s3 + $0xe0] sm:$0xff]   ;;  %v1303_v34 = vld [vmem:[%s1730_s3 + $0x68] sm:$0xff]  }
  0x61   : > { %v1304_v35 = vld [vmem:[%s1730_s3 + $0xe8] sm:$0xff]   ;;  %v1305_v36 = vld [vmem:[%s1730_s3 + $0x70] sm:$0xff]   ;;  %v1307_v38 = vld [vmem:[%s1730_s3 + $0x78] sm:$0xff]  }
  0x62   : > { %v1306_v37 = vld [vmem:[%s1730_s3 + $0xf0] sm:$0xff]   ;;  %v1308_v39 = vld [vmem:[%s1730_s3 + $0xf8] sm:$0xff]  }
  0x63   : > { %1119 = vmatpush3.bf16.msra.mxu0 %v1272_v3  ;;  %1203 = vmatpush3.bf16.msra.mxu1 %v1272_v3 }
  0x64   : > { %1120 = vmatprep.subr.bf16.mxu0 %v1273_v6  ;;  %1196 = vmatprep.subr.bf16.mxu1 %v1273_v6 }
  0x67   : > { %1121 = vmatpush3.bf16.msra.mxu0 %v1273_v6  ;;  %1204 = vmatpush3.bf16.msra.mxu1 %v1273_v6 }
  0x68   : > { %1122 = vmatprep.subr.bf16.mxu0 %v1274_v7  ;;  %1197 = vmatprep.subr.bf16.mxu1 %v1274_v7 }
  0x6b   : > { %1123 = vmatpush3.bf16.msra.mxu0 %v1274_v7  ;;  %1205 = vmatpush3.bf16.msra.mxu1 %v1274_v7 }
  0x6c   : > { %1124 = vmatprep.subr.bf16.mxu0 %v1275_v8  ;;  %1198 = vmatprep.subr.bf16.mxu1 %v1275_v8 }
  0x6f   : > { %1125 = vmatpush3.bf16.msra.mxu0 %v1275_v8  ;;  %1206 = vmatpush3.bf16.msra.mxu1 %v1275_v8 }
  0x70   : > { %1126 = vmatprep.subr.bf16.mxu0 %v1276_v9  ;;  %1199 = vmatprep.subr.bf16.mxu1 %v1276_v9 }
  0x73   : > { %1127 = vmatpush3.bf16.msra.mxu0 %v1276_v9  ;;  %1207 = vmatpush3.bf16.msra.mxu1 %v1276_v9 }
  0x76   : > { %1129 = vmatmul.mubr.bf16.vlgmr.msra.gmra.mrb[0].mxu0 %v1279_v10  ;;  %1161 = vmatmul.mubr.bf16.vlgmr.msra.gmra.mrb[0].mxu1 %v1280_v11 }
  0x77   : > { %1132 = vmatprep.mubr.bf16.mxu0 %v1281_v12  ;;  %1164 = vmatprep.mubr.bf16.mxu1 %v1282_v13 }
  0x7e   : > { %1133 = vmatmul.mubr.bf16.gmra.mrb[4].mxu0 %v1283_v14  ;;  %1165 = vmatmul.mubr.bf16.gmra.mrb[4].mxu1 %v1284_v15 }
  0x7f   : > { %1136 = vmatprep.mubr.bf16.mxu0 %v1285_v16  ;;  %1168 = vmatprep.mubr.bf16.mxu1 %v1286_v17 }
  0x86   : > { %1137 = vmatmul.mubr.bf16.gmra.mrb[8].mxu0 %v1287_v18  ;;  %1169 = vmatmul.mubr.bf16.gmra.mrb[8].mxu1 %v1288_v19 }
  0x87   : > { %1140 = vmatprep.mubr.bf16.mxu0 %v1289_v20  ;;  %1172 = vmatprep.mubr.bf16.mxu1 %v1290_v21 }
  0x8e   : > { %1141 = vmatmul.mubr.bf16.gmra.mrb[12].mxu0 %v1291_v22  ;;  %1173 = vmatmul.mubr.bf16.gmra.mrb[12].mxu1 %v1292_v23 }
  0x8f   : > { %1144 = vmatprep.mubr.bf16.mxu0 %v1293_v24  ;;  %1176 = vmatprep.mubr.bf16.mxu1 %v1294_v25 }
  0x96   : > { %1145 = vmatmul.mubr.bf16.gmra.mrb[16].mxu0 %v1295_v26  ;;  %1177 = vmatmul.mubr.bf16.gmra.mrb[16].mxu1 %v1296_v27 }
  0x97   : > { %1148 = vmatprep.mubr.bf16.mxu0 %v1297_v28  ;;  %1180 = vmatprep.mubr.bf16.mxu1 %v1298_v29 }
  0x9e   : > { %1149 = vmatmul.mubr.bf16.gmra.mrb[20].mxu0 %v1299_v30  ;;  %1181 = vmatmul.mubr.bf16.gmra.mrb[20].mxu1 %v1300_v31 }
  0x9f   : > { %1152 = vmatprep.mubr.bf16.mxu0 %v1301_v32  ;;  %1184 = vmatprep.mubr.bf16.mxu1 %v1302_v33 }
  0xa6   : > { %1153 = vmatmul.mubr.bf16.gmra.mrb[24].mxu0 %v1303_v34  ;;  %1185 = vmatmul.mubr.bf16.gmra.mrb[24].mxu1 %v1304_v35 }
  0xa7   : > { %1156 = vmatprep.mubr.bf16.mxu0 %v1305_v36  ;;  %1188 = vmatprep.mubr.bf16.mxu1 %v1306_v37 }
  0xae   : > { %1157 = vmatmul.mubr.bf16.gmra.mrb[28].mxu0 %v1307_v38  ;;  %1189 = vmatmul.mubr.bf16.gmra.mrb[28].mxu1 %v1308_v39 }
 0x149   : > { %v1130_v40 = vpop.f32.mrb[0].mxu0  ;;  %v1162_v41 = vpop.f32.mrb[0].mxu1 }
 0x14a   : > { %1309 = vtanh.f32 %v1130_v40  ;;  %v534_v42 = vpop.f32.mrb[1].mxu0  ;;  %v662_v43 = vpop.f32.mrb[1].mxu1 }
 0x14b   : > { %1311 = vtanh.f32 %v1162_v41  ;;  %v1131_v44 = vpop.f32.mrb[2].mxu0  ;;  %v1163_v45 = vpop.f32.mrb[2].mxu1 }
 0x14c   : > { %1313 = vtanh.f32 %v534_v42  ;;  %v537_v46 = vpop.f32.mrb[3].mxu0  ;;  %v665_v47 = vpop.f32.mrb[3].mxu1 }
 0x14d   : > { %1315 = vtanh.f32 %v662_v43 }
 0x14e   : > { %1317 = vtanh.f32 %v1131_v44 }
 0x14f   : > { %1319 = vtanh.f32 %v1163_v45 }
 0x150   : > { %1321 = vtanh.f32 %v537_v46 }
 0x151   : > { %1323 = vtanh.f32 %v665_v47  ;;  %v1134_v48 = vpop.f32.mrb[4].mxu0  ;;  %v1166_v49 = vpop.f32.mrb[4].mxu1 }
 0x152   : > { %1325 = vtanh.f32 %v1134_v48  ;;  %v550_v50 = vpop.f32.mrb[5].mxu0  ;;  %v678_v51 = vpop.f32.mrb[5].mxu1 }
 0x153   : > { %1327 = vtanh.f32 %v1166_v49  ;;  %v1135_v52 = vpop.f32.mrb[6].mxu0  ;;  %v1167_v53 = vpop.f32.mrb[6].mxu1 }
 0x154   : > { %v1310_v54 = vpop.eup %1309  ;;  %1329 = vtanh.f32 %v550_v50  ;;  %v553_v55 = vpop.f32.mrb[7].mxu0 }
 0x155   : > { %v681_v56 = vpop.f32.mrb[7].mxu1  ;;  %v1312_v57 = vpop.eup %1311  ;;  %855 = vst [vmem:[%s1773_s17 + $0x10] sm:$0xff] %v1310_v54  ;;  %1331 = vtanh.f32 %v678_v51 }
 0x156   : > { %v1314_v58 = vpop.eup %1313  ;;  %887 = vst [vmem:[%s1773_s17 + $0x110] sm:$0xff] %v1312_v57  ;;  %1333 = vtanh.f32 %v1135_v52 }
 0x157   : > { %v1316_v59 = vpop.eup %1315  ;;  %853 = vst [vmem:[%s1773_s17] sm:$0xff] %v1314_v58  ;;  %1335 = vtanh.f32 %v1167_v53 }
 0x158   : > { %v1318_v60 = vpop.eup %1317  ;;  %885 = vst [vmem:[%s1773_s17 + $0x100] sm:$0xff] %v1316_v59  ;;  %1337 = vtanh.f32 %v553_v55 }
 0x159   : > { %v1320_v61 = vpop.eup %1319  ;;  %856 = vst [vmem:[%s1773_s17 + $0x18] sm:$0xff] %v1318_v60  ;;  %1339 = vtanh.f32 %v681_v56  ;;  %v1138_v62 = vpop.f32.mrb[8].mxu0 }
 0x15a   : > { %v1170_v63 = vpop.f32.mrb[8].mxu1  ;;  %v1322_v0 = vpop.eup %1321  ;;  %888 = vst [vmem:[%s1773_s17 + $0x118] sm:$0xff] %v1320_v61  ;;  %1341 = vtanh.f32 %v1138_v62 }
 0x15b   : > { %v566_v1 = vpop.f32.mrb[9].mxu0  ;;  %v694_v2 = vpop.f32.mrb[9].mxu1  ;;  %854 = vst [vmem:[%s1773_s17 + $0x8] sm:$0xff] %v1322_v0  ;;  %1343 = vtanh.f32 %v1170_v63 }
 0x15c   : > { %v1324_v3 = vpop.eup %1323  ;;  %v1139_v4 = vpop.f32.mrb[10].mxu0  ;;  %1345 = vtanh.f32 %v566_v1 }
 0x15d   : > { %v1171_v5 = vpop.f32.mrb[10].mxu1  ;;  %v1326_v6 = vpop.eup %1325  ;;  %886 = vst [vmem:[%s1773_s17 + $0x108] sm:$0xff] %v1324_v3  ;;  %1347 = vtanh.f32 %v694_v2 }
 0x15e   : > { %v569_v7 = vpop.f32.mrb[11].mxu0  ;;  %v697_v8 = vpop.f32.mrb[11].mxu1  ;;  %859 = vst [vmem:[%s1773_s17 + $0x30] sm:$0xff] %v1326_v6  ;;  %1349 = vtanh.f32 %v1139_v4 }
 0x15f   : > { %v1328_v9 = vpop.eup %1327  ;;  %1351 = vtanh.f32 %v1171_v5 }
 0x160   : > { %v1330_v10 = vpop.eup %1329  ;;  %891 = vst [vmem:[%s1773_s17 + $0x130] sm:$0xff] %v1328_v9  ;;  %1353 = vtanh.f32 %v569_v7 }
 0x161   : > { %v1332_v11 = vpop.eup %1331  ;;  %857 = vst [vmem:[%s1773_s17 + $0x20] sm:$0xff] %v1330_v10  ;;  %1355 = vtanh.f32 %v697_v8  ;;  %v1142_v14 = vpop.f32.mrb[12].mxu0 }
 0x162   : > { %v1334_v12 = vpop.eup %1333  ;;  %889 = vst [vmem:[%s1773_s17 + $0x120] sm:$0xff] %v1332_v11  ;;  %v1174_v15 = vpop.f32.mrb[12].mxu1  ;;  %1357 = vtanh.f32 %v1142_v14 }
 0x163   : > { %v1336_v13 = vpop.eup %1335  ;;  %860 = vst [vmem:[%s1773_s17 + $0x38] sm:$0xff] %v1334_v12  ;;  %v582_v17 = vpop.f32.mrb[13].mxu0  ;;  %1359 = vtanh.f32 %v1174_v15 }
 0x164   : > { %v1338_v16 = vpop.eup %1337  ;;  %892 = vst [vmem:[%s1773_s17 + $0x138] sm:$0xff] %v1336_v13  ;;  %v710_v18 = vpop.f32.mrb[13].mxu1  ;;  %1361 = vtanh.f32 %v582_v17 }
 0x165   : > { %v1340_v19 = vpop.eup %1339  ;;  %858 = vst [vmem:[%s1773_s17 + $0x28] sm:$0xff] %v1338_v16  ;;  %v1143_v20 = vpop.f32.mrb[14].mxu0  ;;  %1363 = vtanh.f32 %v710_v18 }
 0x166   : > { %v1175_v21 = vpop.f32.mrb[14].mxu1  ;;  %v1342_v22 = vpop.eup %1341  ;;  %890 = vst [vmem:[%s1773_s17 + $0x128] sm:$0xff] %v1340_v19  ;;  %1365 = vtanh.f32 %v1143_v20 }
 0x167   : > { %v585_v23 = vpop.f32.mrb[15].mxu0  ;;  %v713_v24 = vpop.f32.mrb[15].mxu1  ;;  %863 = vst [vmem:[%s1773_s17 + $0x50] sm:$0xff] %v1342_v22  ;;  %1367 = vtanh.f32 %v1175_v21 }
 0x168   : > { %v1344_v25 = vpop.eup %1343  ;;  %1369 = vtanh.f32 %v585_v23 }
 0x169   : > { %v1346_v26 = vpop.eup %1345  ;;  %895 = vst [vmem:[%s1773_s17 + $0x150] sm:$0xff] %v1344_v25  ;;  %1371 = vtanh.f32 %v713_v24  ;;  %v1146_v30 = vpop.f32.mrb[16].mxu0 }
 0x16a   : > { %v1348_v27 = vpop.eup %1347  ;;  %861 = vst [vmem:[%s1773_s17 + $0x40] sm:$0xff] %v1346_v26  ;;  %v1178_v31 = vpop.f32.mrb[16].mxu1  ;;  %1373 = vtanh.f32 %v1146_v30 }
 0x16b   : > { %v1350_v28 = vpop.eup %1349  ;;  %893 = vst [vmem:[%s1773_s17 + $0x140] sm:$0xff] %v1348_v27  ;;  %v598_v33 = vpop.f32.mrb[17].mxu0  ;;  %1375 = vtanh.f32 %v1178_v31 }
 0x16c   : > { %v1352_v29 = vpop.eup %1351  ;;  %864 = vst [vmem:[%s1773_s17 + $0x58] sm:$0xff] %v1350_v28  ;;  %v726_v34 = vpop.f32.mrb[17].mxu1  ;;  %1377 = vtanh.f32 %v598_v33 }
 0x16d   : > { %v1354_v32 = vpop.eup %1353  ;;  %896 = vst [vmem:[%s1773_s17 + $0x158] sm:$0xff] %v1352_v29  ;;  %v1147_v36 = vpop.f32.mrb[18].mxu0  ;;  %1379 = vtanh.f32 %v726_v34 }
 0x16e   : > { %v1356_v35 = vpop.eup %1355  ;;  %862 = vst [vmem:[%s1773_s17 + $0x48] sm:$0xff] %v1354_v32  ;;  %v1179_v37 = vpop.f32.mrb[18].mxu1  ;;  %1381 = vtanh.f32 %v1147_v36 }
 0x16f   : > { %v1358_v38 = vpop.eup %1357  ;;  %894 = vst [vmem:[%s1773_s17 + $0x148] sm:$0xff] %v1356_v35  ;;  %v601_v39 = vpop.f32.mrb[19].mxu0  ;;  %1383 = vtanh.f32 %v1179_v37 }
 0x170   : > { %v729_v40 = vpop.f32.mrb[19].mxu1  ;;  %v1360_v41 = vpop.eup %1359  ;;  %867 = vst [vmem:[%s1773_s17 + $0x70] sm:$0xff] %v1358_v38  ;;  %1385 = vtanh.f32 %v601_v39 }
 0x171   : > { %v1362_v42 = vpop.eup %1361  ;;  %899 = vst [vmem:[%s1773_s17 + $0x170] sm:$0xff] %v1360_v41  ;;  %1387 = vtanh.f32 %v729_v40  ;;  %v1150_v46 = vpop.f32.mrb[20].mxu0 }
 0x172   : > { %v1364_v43 = vpop.eup %1363  ;;  %865 = vst [vmem:[%s1773_s17 + $0x60] sm:$0xff] %v1362_v42  ;;  %v1182_v47 = vpop.f32.mrb[20].mxu1  ;;  %1389 = vtanh.f32 %v1150_v46 }
 0x173   : > { %v1366_v44 = vpop.eup %1365  ;;  %897 = vst [vmem:[%s1773_s17 + $0x160] sm:$0xff] %v1364_v43  ;;  %v614_v49 = vpop.f32.mrb[21].mxu0  ;;  %1391 = vtanh.f32 %v1182_v47 }
 0x174   : > { %v1368_v45 = vpop.eup %1367  ;;  %868 = vst [vmem:[%s1773_s17 + $0x78] sm:$0xff] %v1366_v44  ;;  %v742_v50 = vpop.f32.mrb[21].mxu1  ;;  %1393 = vtanh.f32 %v614_v49 }
 0x175   : > { %v1370_v48 = vpop.eup %1369  ;;  %900 = vst [vmem:[%s1773_s17 + $0x178] sm:$0xff] %v1368_v45  ;;  %v1151_v52 = vpop.f32.mrb[22].mxu0  ;;  %1395 = vtanh.f32 %v742_v50 }
 0x176   : > { %v1372_v51 = vpop.eup %1371  ;;  %866 = vst [vmem:[%s1773_s17 + $0x68] sm:$0xff] %v1370_v48  ;;  %v1183_v53 = vpop.f32.mrb[22].mxu1  ;;  %1397 = vtanh.f32 %v1151_v52 }
 0x177   : > { %v1374_v54 = vpop.eup %1373  ;;  %898 = vst [vmem:[%s1773_s17 + $0x168] sm:$0xff] %v1372_v51  ;;  %v617_v55 = vpop.f32.mrb[23].mxu0  ;;  %1399 = vtanh.f32 %v1183_v53 }
 0x178   : > { %v745_v56 = vpop.f32.mrb[23].mxu1  ;;  %v1376_v57 = vpop.eup %1375  ;;  %871 = vst [vmem:[%s1773_s17 + $0x90] sm:$0xff] %v1374_v54  ;;  %1401 = vtanh.f32 %v617_v55 }
 0x179   : > { %v1378_v58 = vpop.eup %1377  ;;  %903 = vst [vmem:[%s1773_s17 + $0x190] sm:$0xff] %v1376_v57  ;;  %1403 = vtanh.f32 %v745_v56  ;;  %v1154_v62 = vpop.f32.mrb[24].mxu0 }
 0x17a   : > { %v1380_v59 = vpop.eup %1379  ;;  %869 = vst [vmem:[%s1773_s17 + $0x80] sm:$0xff] %v1378_v58  ;;  %v1186_v63 = vpop.f32.mrb[24].mxu1  ;;  %1405 = vtanh.f32 %v1154_v62 }
 0x17b   : > { %v1382_v60 = vpop.eup %1381  ;;  %901 = vst [vmem:[%s1773_s17 + $0x180] sm:$0xff] %v1380_v59  ;;  %v630_v1 = vpop.f32.mrb[25].mxu0  ;;  %1407 = vtanh.f32 %v1186_v63 }
 0x17c   : > { %v1384_v61 = vpop.eup %1383  ;;  %872 = vst [vmem:[%s1773_s17 + $0x98] sm:$0xff] %v1382_v60  ;;  %v758_v2 = vpop.f32.mrb[25].mxu1  ;;  %1409 = vtanh.f32 %v630_v1 }
 0x17d   : > { %v1386_v0 = vpop.eup %1385  ;;  %904 = vst [vmem:[%s1773_s17 + $0x198] sm:$0xff] %v1384_v61  ;;  %v1155_v4 = vpop.f32.mrb[26].mxu0  ;;  %1411 = vtanh.f32 %v758_v2 }
 0x17e   : > { %v1388_v3 = vpop.eup %1387  ;;  %870 = vst [vmem:[%s1773_s17 + $0x88] sm:$0xff] %v1386_v0  ;;  %v1187_v5 = vpop.f32.mrb[26].mxu1  ;;  %1413 = vtanh.f32 %v1155_v4 }
 0x17f   : > { %v1390_v6 = vpop.eup %1389  ;;  %902 = vst [vmem:[%s1773_s17 + $0x188] sm:$0xff] %v1388_v3  ;;  %v633_v7 = vpop.f32.mrb[27].mxu0  ;;  %1415 = vtanh.f32 %v1187_v5 }
 0x180   : > { %v761_v8 = vpop.f32.mrb[27].mxu1  ;;  %v1392_v9 = vpop.eup %1391  ;;  %875 = vst [vmem:[%s1773_s17 + $0xb0] sm:$0xff] %v1390_v6  ;;  %1417 = vtanh.f32 %v633_v7 }
 0x181   : > { %v1394_v10 = vpop.eup %1393  ;;  %907 = vst [vmem:[%s1773_s17 + $0x1b0] sm:$0xff] %v1392_v9  ;;  %1419 = vtanh.f32 %v761_v8  ;;  %v1158_v14 = vpop.f32.mrb[28].mxu0 }
 0x182   : > { %v1396_v11 = vpop.eup %1395  ;;  %873 = vst [vmem:[%s1773_s17 + $0xa0] sm:$0xff] %v1394_v10  ;;  %v1190_v15 = vpop.f32.mrb[28].mxu1  ;;  %1421 = vtanh.f32 %v1158_v14 }
 0x183   : > { %v1398_v12 = vpop.eup %1397  ;;  %905 = vst [vmem:[%s1773_s17 + $0x1a0] sm:$0xff] %v1396_v11  ;;  %v646_v17 = vpop.f32.mrb[29].mxu0  ;;  %1423 = vtanh.f32 %v1190_v15 }
 0x184   : > { %v1400_v13 = vpop.eup %1399  ;;  %876 = vst [vmem:[%s1773_s17 + $0xb8] sm:$0xff] %v1398_v12  ;;  %v774_v18 = vpop.f32.mrb[29].mxu1  ;;  %1425 = vtanh.f32 %v646_v17 }
 0x185   : > { %v1402_v16 = vpop.eup %1401  ;;  %908 = vst [vmem:[%s1773_s17 + $0x1b8] sm:$0xff] %v1400_v13  ;;  %v1159_v20 = vpop.f32.mrb[30].mxu0  ;;  %1427 = vtanh.f32 %v774_v18 }
 0x186   : > { %v1404_v19 = vpop.eup %1403  ;;  %874 = vst [vmem:[%s1773_s17 + $0xa8] sm:$0xff] %v1402_v16  ;;  %v1191_v21 = vpop.f32.mrb[30].mxu1  ;;  %1429 = vtanh.f32 %v1159_v20 }
 0x187   : > { %v1406_v22 = vpop.eup %1405  ;;  %906 = vst [vmem:[%s1773_s17 + $0x1a8] sm:$0xff] %v1404_v19  ;;  %v649_v23 = vpop.f32.mrb[31].mxu0  ;;  %1431 = vtanh.f32 %v1191_v21 }
 0x188   : > { %v777_v24 = vpop.f32.mrb[31].mxu1  ;;  %v1408_v25 = vpop.eup %1407  ;;  %879 = vst [vmem:[%s1773_s17 + $0xd0] sm:$0xff] %v1406_v22  ;;  %1433 = vtanh.f32 %v649_v23 }
 0x189   : > { %v1410_v26 = vpop.eup %1409  ;;  %911 = vst [vmem:[%s1773_s17 + $0x1d0] sm:$0xff] %v1408_v25  ;;  %1435 = vtanh.f32 %v777_v24 }
 0x18a   : > { %v1412_v27 = vpop.eup %1411  ;;  %877 = vst [vmem:[%s1773_s17 + $0xc0] sm:$0xff] %v1410_v26 }
 0x18b   : > { %v1414_v28 = vpop.eup %1413  ;;  %909 = vst [vmem:[%s1773_s17 + $0x1c0] sm:$0xff] %v1412_v27 }
 0x18c   : > { %v1416_v29 = vpop.eup %1415  ;;  %880 = vst [vmem:[%s1773_s17 + $0xd8] sm:$0xff] %v1414_v28 }
 0x18d   : > { %v1418_v30 = vpop.eup %1417  ;;  %912 = vst [vmem:[%s1773_s17 + $0x1d8] sm:$0xff] %v1416_v29 }
 0x18e   : > { %v1420_v31 = vpop.eup %1419  ;;  %878 = vst [vmem:[%s1773_s17 + $0xc8] sm:$0xff] %v1418_v30 }
 0x18f   : > { %v1422_v32 = vpop.eup %1421  ;;  %910 = vst [vmem:[%s1773_s17 + $0x1c8] sm:$0xff] %v1420_v31 }
 0x190   : > { %v1424_v33 = vpop.eup %1423  ;;  %883 = vst [vmem:[%s1773_s17 + $0xf0] sm:$0xff] %v1422_v32 }
 0x191   : > { %v1426_v34 = vpop.eup %1425  ;;  %915 = vst [vmem:[%s1773_s17 + $0x1f0] sm:$0xff] %v1424_v33 }
 0x192   : > { %v1428_v35 = vpop.eup %1427  ;;  %881 = vst [vmem:[%s1773_s17 + $0xe0] sm:$0xff] %v1426_v34 }
 0x193   : > { %v1430_v36 = vpop.eup %1429  ;;  %913 = vst [vmem:[%s1773_s17 + $0x1e0] sm:$0xff] %v1428_v35 }
 0x194   : > { %v1432_v37 = vpop.eup %1431  ;;  %884 = vst [vmem:[%s1773_s17 + $0xf8] sm:$0xff] %v1430_v36 }
 0x195   : > { %v1434_v38 = vpop.eup %1433  ;;  %916 = vst [vmem:[%s1773_s17 + $0x1f8] sm:$0xff] %v1432_v37 }
 0x196   : > { %v1436_v39 = vpop.eup %1435  ;;  %882 = vst [vmem:[%s1773_s17 + $0xe8] sm:$0xff] %v1434_v38 }
 0x197   : > { %914 = vst [vmem:[%s1773_s17 + $0x1e8] sm:$0xff] %v1436_v39 }
 0x198   : > { %1508 = shalt.err (!%p1505_p7)
}
 0x199   : > { %s1509_s18 = scalar_lea.hbm %s1841_s23, 8192  ;;  %s1513_s26 = scalar_lea.hbm %s1891_s2, 32768 }
 0x19a   : > { %p1510_p9 = scmp.ne.s32.totalorder %s1841_s23, %s1509_s18  ;;  %p1514_p5 = scmp.lt.u32.totalorder %s1841_s23, %s1891_s2 }
 0x19b   : > { %p1515_p10 = scmp.lt.u32.totalorder %s1513_s26, %s1509_s18  ;;  %p1517_p4 = scmp.lt.u32.totalorder %s1509_s18, %s1841_s23 }
 0x19c   : > { %p1511_p1 = pnand %p1510_p9, %p1675_p12 }
 0x19d   : > { %p1516_p2 = por %p1515_p10, %p1514_p5 }
 0x19e   : > { %p1512_p0 = pneg %p1511_p1 }
 0x19f   : > { %p1518_p6 = por %p1517_p4, %p1516_p2 }
 0x1a1   : > { %p1519_p8 = pnand %p1518_p6, %p1512_p0 }
 0x1a3   : > { %1522 = shalt.err (!%p1519_p8)
}
 0x1a4   : > { %s1572_s3 = smov 128   ;;  %s1573_s15 = smov 8  }
 0x1a5   : > { %1214 = dma.vmem_to_hbm [thread:$0]  (%p1675_p12), %s1843_s5, 8192, %s1841_s23, %s918_s13, %s1572_s3, %s1572_s3, %s1573_s15  }
 0x1a6 PF: > { %p1231_p11 = scmp.ge.s32.totalorder %s1565_s12, 2  ;;  %s946_s17 = sand.u32 1, %s1553_s9  }
 0x1a7   : > { %p1906_p13 = scmp.ne.s32.totalorder %s1896_s16, 0  ;;  %s947_s4 = scalar_lea.sflag [#allocation4], %s946_s17 }
 0x1a9   : > { %p1225_p3 = pnand %p1231_p11, %p1906_p13 }
 0x1ab   : > { %1548 = dma.done.wait (!%p1225_p3), %s947_s4, 8192  }
 0x1ac   : > { %1550 = vsyncadd (!%p1225_p3), %s947_s4, 4294959104  ;;  %p16_p7 = scmp.ge.s32.totalorder %s1642_s21, 6   ;;  %s1907_s9 = smov %s1557_s10 }
 0x1ad   : > { %s1908_s10 = smov %s1561_s11  ;;  %s1909_s11 = smov %s1671_s8 }
 0x1ae   : > { %s1910_s12 = smov %s1642_s21  ;;  %18 = sbr.rel (!%p16_p7) target bundleno = 6 (0x6), region = 77 }
 0x1b5   :  { %952 = vsyncpa [#allocation3], 1 }
 0x1b6   :  { %954 = vsyncpa [#allocation3 + $0x1], 1 }
 0x1b7   :  { %955 = vsyncpa [#allocation6], 1 }
 0x1b8   :  { %956 = vsyncpa [#allocation4], 1 }
 0x1b9   :  { %958 = vsyncpa [#allocation4 + $0x1], 1 }

</bundles_post_ra>
